<compile_context>
chip_gen: v7x
topology: tpu7x:2x2x1
jax: 0.10.0
libtpu: 0.0.40
codegen_flags: <defaults>
</compile_context>

<pallas_src>
import jax
import jax.numpy as jnp
import numpy as np
from jax.experimental import pallas as pl
from jax.experimental.pallas import tpu as pltpu

# Module hyper-parameters (fixed by the PyTorch __init__).
C_IN, C_OUT, K = 50, 100, 21
STRIDE, DILATION, PADDING = 1, 2, 49


def _round_up(x, m):
    return ((x + m - 1) // m) * m


def _out_len(L_in):
    return (L_in - 1) * STRIDE - 2 * PADDING + DILATION * (K - 1) + 1


def prepare_weight(w_iok, L_in):
    """One-time parameter prep (host): fold ConvTranspose1d into a dense matrix.

    W_big[ci*L_in + l, co*L_out + t] = sum_k w[ci, co, k] * [t == l*stride - pad + dil*k]

    Zero-padded to lane-dense (multiple-of-128) dims and cast to bf16.
    """
    L_out = _out_len(L_in)
    assert L_out >= 1, "input length too small for these conv-transpose params"
    w_np = np.asarray(w_iok, dtype=np.float32)            # (C_in, C_out, K)
    W = np.zeros((C_IN * L_in, C_OUT * L_out), np.float32)
    for k in range(K):
        for l in range(L_in):
            t = l * STRIDE - PADDING + DILATION * k
            if 0 <= t < L_out:
                # rows ci*L_in + l, cols co*L_out + t, for all (ci, co) at once
                W[l::L_in, t::L_out] += w_np[:, :, k]
    KC_pad = _round_up(C_IN * L_in, 128)
    CO_pad = _round_up(C_OUT * L_out, 128)
    W_p = np.zeros((KC_pad, CO_pad), np.float32)
    W_p[: C_IN * L_in, : C_OUT * L_out] = W
    return jnp.asarray(W_p, dtype=jnp.bfloat16)


def convtr_hardsigmoid_kernel(x_ref, w_ref, o_ref):
    """One deep bf16 MXU contraction + fused hardsigmoid (f32 epilogue).

    x_ref : (M_pad, KC_pad)   bf16   activations, rows = batch samples
    w_ref : (KC_pad, CO_pad)  bf16   constant-folded conv-transpose matrix
    o_ref : (M_pad, CO_pad)   f32
    """
    y = jnp.dot(x_ref[...], w_ref[...], preferred_element_type=jnp.float32)
    o_ref[...] = (jnp.clip(y + 3.0, 0.0, 6.0) * (1.0 / 6.0)).astype(o_ref.dtype)


@jax.jit
def model_forward(x_ncl, w_big):
    """x_ncl: (N, C_in, L_in), w_big: prepared padded bf16 matrix -> (N, C_out, L_out)."""
    N, C_in, L_in = x_ncl.shape
    assert C_in == C_IN
    L_out = _out_len(L_in)
    KC = C_in * L_in
    KC_pad, CO_pad = w_big.shape
    M_pad = _round_up(max(N, 1), 16)       # bf16 sublane-tile friendly

    x2 = x_ncl.reshape(N, KC).astype(jnp.bfloat16)
    x2 = jnp.pad(x2, ((0, M_pad - N), (0, KC_pad - KC)))

    out_p = pl.pallas_call(
        convtr_hardsigmoid_kernel,
        out_shape=jax.ShapeDtypeStruct((M_pad, CO_pad), jnp.float32),
        grid=(1,),
        in_specs=[
            pl.BlockSpec((M_pad, KC_pad), lambda i: (0, 0)),
            pl.BlockSpec((KC_pad, CO_pad), lambda i: (0, 0)),
        ],
        out_specs=pl.BlockSpec((M_pad, CO_pad), lambda i: (0, 0)),
        compiler_params=pltpu.CompilerParams(
            dimension_semantics=("arbitrary",)),
    )(x2, w_big)

    # Columns of w_big are (co, t)-major, so this reshapes directly to NCL order.
    return out_p[:N, : C_OUT * L_out].reshape(N, C_OUT, L_out)


def reference_forward(x_ncl, w_iok):
    """Plain-JAX f32 reference using the scatter formulation of conv-transpose."""
    N, C_in, L_in = x_ncl.shape
    L_out = _out_len(L_in)
    x_nlc = jnp.transpose(x_ncl, (0, 2, 1)).astype(jnp.float32)   # (N, L_in, C_in)
    w = jnp.asarray(w_iok, jnp.float32)
    y = jnp.zeros((N, L_out, C_OUT), jnp.float32)
    for k in range(K):
        t = jnp.arange(L_in) * STRIDE - PADDING + DILATION * k
        valid = (t >= 0) & (t < L_out)
        contrib = jnp.einsum("nlc,cd->nld", x_nlc, w[:, :, k])
        contrib = jnp.where(valid[None, :, None], contrib, 0.0)
        y = y.at[:, jnp.where(valid, t, 0), :].add(contrib)
    y = jnp.clip(y + 3.0, 0.0, 6.0) / 6.0
    return jnp.transpose(y, (0, 2, 1))


if __name__ == "__main__":
    key = jax.random.PRNGKey(0)
    kx, kw = jax.random.split(key)

    N, L_IN = 4, 64                        # small, valid shapes
    L_OUT = _out_len(L_IN)                 # = 6
    x = jax.random.normal(kx, (N, C_IN, L_IN), dtype=jnp.float32)
    # Deterministic weight, PyTorch layout (in_channels, out_channels, kernel).
    w = 0.05 * jax.random.normal(kw, (C_IN, C_OUT, K), dtype=jnp.float32)

    # One-time parameter prep (hoisted out of the forward pass).
    w_big = prepare_weight(w, L_IN)

    out = model_forward(x, w_big)
    out = jax.block_until_ready(out)
    assert out.shape == (N, C_OUT, L_OUT), out.shape

    ref = reference_forward(x, w)
    # bf16 MXU operands -> slightly looser tolerance than the previous f32 run.
    np.testing.assert_allclose(np.asarray(out), np.asarray(ref), rtol=2e-2, atol=2e-2)

    print("KERNEL_OK")
</pallas_src>

<mosaic_0001>
module attributes {stable_mosaic.version = 11 : i64} {
  func.func @convtr_hardsigmoid_kernel(%arg0: i32, %arg1: memref<16x3200xbf16, #tpu.memory_space<vmem>>, %arg2: memref<3200x640xbf16, #tpu.memory_space<vmem>>, %arg3: memref<16x640xf32, #tpu.memory_space<vmem>>) attributes {dimension_semantics = [#tpu.dimension_semantics<arbitrary>], iteration_bounds = array<i64: 1>, scalar_prefetch = 0 : i64, scratch_operands = 0 : i64, tpu.core_type = #tpu.core_type<tc>, window_params = [{pipeline_mode = #tpu.pipeline_mode<synchronous>, transform_indices = @transform_0, window_bounds = array<i64: 16, 3200>}, {pipeline_mode = #tpu.pipeline_mode<synchronous>, transform_indices = @transform_1, window_bounds = array<i64: 3200, 640>}, {pipeline_mode = #tpu.pipeline_mode<synchronous>, transform_indices = @transform_2, window_bounds = array<i64: 16, 640>}]} {
    %c0 = arith.constant 0 : index
    %c0_0 = arith.constant 0 : index
    %0 = vector.load %arg1[%c0, %c0_0] : memref<16x3200xbf16, #tpu.memory_space<vmem>>, vector<16x3200xbf16>
    %c0_1 = arith.constant 0 : index
    %c0_2 = arith.constant 0 : index
    %1 = vector.load %arg2[%c0_1, %c0_2] : memref<3200x640xbf16, #tpu.memory_space<vmem>>, vector<3200x640xbf16>
    %cst = arith.constant dense<0.000000e+00> : vector<16x640xf32>
    %2 = tpu.matmul %0, %1, %cst {dimension_numbers = #tpu.dot_dimension_numbers<[1], [0], [0], [1], [0, 0, 1, 1], [], []>} : vector<16x3200xbf16>, vector<3200x640xbf16>, vector<16x640xf32> -> vector<16x640xf32>
    %cst_3 = arith.constant 3.000000e+00 : f32
    %3 = vector.broadcast %cst_3 : f32 to vector<16x640xf32>
    %4 = arith.addf %2, %3 : vector<16x640xf32>
    %cst_4 = arith.constant 0.000000e+00 : f32
    %cst_5 = arith.constant 6.000000e+00 : f32
    %5 = vector.broadcast %cst_4 : f32 to vector<16x640xf32>
    %6 = arith.maximumf %5, %4 : vector<16x640xf32>
    %7 = vector.broadcast %cst_5 : f32 to vector<16x640xf32>
    %8 = arith.minimumf %7, %6 : vector<16x640xf32>
    %cst_6 = arith.constant 0.166666672 : f32
    %9 = vector.broadcast %cst_6 : f32 to vector<16x640xf32>
    %10 = arith.mulf %8, %9 : vector<16x640xf32>
    %c0_7 = arith.constant 0 : index
    %c0_8 = arith.constant 0 : index
    %11 = vector.load %arg3[%c0_7, %c0_8] : memref<16x640xf32, #tpu.memory_space<vmem>>, vector<16x640xf32>
    tpu.vector_store %arg3[%c0_7, %c0_8], %10 {strides = array<i32>} : memref<16x640xf32, #tpu.memory_space<vmem>>, vector<16x640xf32>,
    return
  }
  func.func @transform_0(%arg0: i32) -> (i32, i32) {
    %c0_i32 = arith.constant 0 : i32
    %c0_i32_0 = arith.constant 0 : i32
    %c0_i32_1 = arith.constant 0 : i32
    return %c0_i32, %c0_i32_0 : i32, i32
  }
  func.func @transform_1(%arg0: i32) -> (i32, i32) {
    %c0_i32 = arith.constant 0 : i32
    %c0_i32_0 = arith.constant 0 : i32
    %c0_i32_1 = arith.constant 0 : i32
    return %c0_i32, %c0_i32_0 : i32, i32
  }
  func.func @transform_2(%arg0: i32) -> (i32, i32) {
    %c0_i32 = arith.constant 0 : i32
    %c0_i32_0 = arith.constant 0 : i32
    %c0_i32_1 = arith.constant 0 : i32
    return %c0_i32, %c0_i32_0 : i32, i32
  }
}

</mosaic_0001>

<bundles_post_ra>
// kernel: model_forward.1
= control target key start
LH: loop header
LB: loop body
LE: loop exit
PB: predicated region body
PF: predicated region fallthrough
CT: control target
= control target key end

     0   :  { %7 = vsyncpa [#allocation3], 0  ;;  %s11186_s9 = smov [#allocation2]   ;;  %s11403_s0 = inlined_call_operand.vmem [shape: bf16[16,3200], index: 0, kind: input, shape index: {}]   ;;  %s11404_s1 = inlined_call_operand.hbm [shape: bf16[3200,640], index: 1, kind: input, shape index: {}]   ;;  %s11405_s2 = inlined_call_operand.vmem [shape: f32[16,640], index: 2, kind: output, shape index: {}]  }
   0x1   :  { %s15_s10 = sshll.u32 %s11186_s9, 4  ;;  %s11162_s13 = scalar_lea.hbm %s11404_s1, 128000  ;;  %s16_s10 = int_to_ptr.vmem [resolvable:$true] %s15_s10 }
   0x2   :  { %p11163_p0 = scmp.ne.s32.totalorder %s11404_s1, %s11162_s13  ;;  %p11166_p1 = scmp.lt.u32.totalorder %s11162_s13, %s11404_s1 }
   0x4   :  { %p11168_p2 = pnand %p11166_p1, %p11163_p0 }
   0x6   :  { %11171 = shalt.err (!%p11168_p2)
}
   0x7   :  { %s11172_s18 = scalar_lea.vmem %s16_s10, 128000  ;;  %p11177_p4 = scmp.lt.s32.totalorder %s16_s10, %s16_s10 }
   0x8   :  { %p11173_p3 = scmp.ne.s32.totalorder %s16_s10, %s11172_s18  ;;  %p11178_p5 = scmp.lt.s32.totalorder %s11172_s18, %s11172_s18 }
   0xa   :  { %p11179_p6 = por %p11178_p5, %p11177_p4 }
   0xc   :  { %p11180_p7 = pnand %p11179_p6, %p11173_p3 }
   0xe   :  { %11183 = shalt.err (!%p11180_p7)
}
   0xf   :  { %s11187_s19 = smov 320   ;;  %s11188_s20 = smov 20  }
  0x10   :  { %21 = dma.hbm_to_vmem [thread:$0]  %s11404_s1, 128000, %s16_s10, [#allocation3], %s11187_s19, %s11187_s19, %s11188_s20  }
  0x11   :  { %11184 = dma.done.wait [#allocation3], 128000  }
  0x12   :  { %11185 = vsyncadd [#allocation3], 4294839296  ;;  %v9702_v0 = vld [vmem:[#allocation2 + $0x4] ss:$20 sps:$4 sm:$0xff]   ;;  %v9704_v1 = vld [vmem:[#allocation2 + $0xc] ss:$20 sps:$4 sm:$0xff]  }
  0x13   :  { %6578 = vmatprep.subr.bf16.mxu0 %v9702_v0  ;;  %v9706_v2 = vld [vmem:[#allocation2] ss:$20 sps:$4 sm:$0xff]   ;;  %v9707_v3 = vld [vmem:[#allocation2 + $0x8] ss:$20 sps:$4 sm:$0xff]   ;;  %7137 = vmatprep.subr.bf16.mxu1 %v9704_v1  ;;  %v9713_v7 = vld [vmem:[#allocation2 + $0x30] ss:$20 sps:$4 sm:$0xff]  }
  0x14   :  { %v9708_v4 = vld [vmem:[#allocation2 + $0x2c] ss:$20 sps:$4 sm:$0xff]   ;;  %6579 = vmatpush1.bf16.msra.mxu0 %v9706_v2  ;;  %7138 = vmatpush1.bf16.msra.mxu1 %v9707_v3  ;;  %v9710_v5 = vld [vmem:[#allocation2 + $0x34] ss:$20 sps:$4 sm:$0xff]   ;;  %v9716_v9 = vld [vmem:[#allocation2 + $0x5c] ss:$20 sps:$4 sm:$0xff]  }
  0x15   :  { %v9712_v6 = vld [vmem:[#allocation2 + $0x28] ss:$20 sps:$4 sm:$0xff]   ;;  %6580 = vmatprep.subr.bf16.mxu0 %v9708_v4  ;;  %7139 = vmatprep.subr.bf16.mxu1 %v9710_v5  ;;  %v9718_v10 = vld [vmem:[#allocation2 + $0x50] ss:$20 sps:$4 sm:$0xff]   ;;  %v9719_v11 = vld [vmem:[#allocation2 + $0x58] ss:$20 sps:$4 sm:$0xff]  }
  0x16   :  { %v9714_v8 = vld [vmem:[#allocation2 + $0x54] ss:$20 sps:$4 sm:$0xff]   ;;  %v9720_v12 = vld [vmem:[#allocation2 + $0x7c] ss:$20 sps:$4 sm:$0xff]   ;;  %v9722_v13 = vld [vmem:[#allocation2 + $0x84] ss:$20 sps:$4 sm:$0xff]  }
  0x17   :  { %v9724_v14 = vld [vmem:[#allocation2 + $0x78] ss:$20 sps:$4 sm:$0xff]   ;;  %v9725_v15 = vld [vmem:[#allocation2 + $0x80] ss:$20 sps:$4 sm:$0xff]   ;;  %v9731_v19 = vld [vmem:[#allocation2 + $0xa8] ss:$20 sps:$4 sm:$0xff]  }
  0x18   :  { %6581 = vmatpush1.bf16.msra.mxu0 %v9712_v6  ;;  %7140 = vmatpush1.bf16.msra.mxu1 %v9713_v7  ;;  %v9726_v16 = vld [vmem:[#allocation2 + $0xa4] ss:$20 sps:$4 sm:$0xff]   ;;  %v9728_v17 = vld [vmem:[#allocation2 + $0xac] ss:$20 sps:$4 sm:$0xff]   ;;  %v9734_v21 = vld [vmem:[#allocation2 + $0xd4] ss:$20 sps:$4 sm:$0xff]  }
  0x19   :  { %6582 = vmatprep.subr.bf16.mxu0 %v9714_v8  ;;  %7141 = vmatprep.subr.bf16.mxu1 %v9716_v9  ;;  %v9730_v18 = vld [vmem:[#allocation2 + $0xa0] ss:$20 sps:$4 sm:$0xff]   ;;  %v9736_v22 = vld [vmem:[#allocation2 + $0xc8] ss:$20 sps:$4 sm:$0xff]   ;;  %v9737_v23 = vld [vmem:[#allocation2 + $0xd0] ss:$20 sps:$4 sm:$0xff]  }
  0x1a   :  { %v9732_v20 = vld [vmem:[#allocation2 + $0xcc] ss:$20 sps:$4 sm:$0xff]   ;;  %v9738_v24 = vld [vmem:[#allocation2 + $0xf4] ss:$20 sps:$4 sm:$0xff]   ;;  %v9740_v25 = vld [vmem:[#allocation2 + $0xfc] ss:$20 sps:$4 sm:$0xff]  }
  0x1b   :  { %v9742_v26 = vld [vmem:[#allocation2 + $0xf0] ss:$20 sps:$4 sm:$0xff]   ;;  %v9743_v27 = vld [vmem:[#allocation2 + $0xf8] ss:$20 sps:$4 sm:$0xff]   ;;  %v9749_v31 = vld [vmem:[#allocation2 + $0x120] ss:$20 sps:$4 sm:$0xff]  }
  0x1c   :  { %6583 = vmatpush1.bf16.msra.mxu0 %v9718_v10  ;;  %7142 = vmatpush1.bf16.msra.mxu1 %v9719_v11  ;;  %v9744_v28 = vld [vmem:[#allocation2 + $0x11c] ss:$20 sps:$4 sm:$0xff]   ;;  %v9746_v29 = vld [vmem:[#allocation2 + $0x124] ss:$20 sps:$4 sm:$0xff]   ;;  %v9752_v33 = vld [vmem:[#allocation2 + $0x14c] ss:$20 sps:$4 sm:$0xff]  }
  0x1d   :  { %6584 = vmatprep.subr.bf16.mxu0 %v9720_v12  ;;  %7143 = vmatprep.subr.bf16.mxu1 %v9722_v13  ;;  %v9748_v30 = vld [vmem:[#allocation2 + $0x118] ss:$20 sps:$4 sm:$0xff]   ;;  %v9754_v34 = vld [vmem:[#allocation2 + $0x140] ss:$20 sps:$4 sm:$0xff]   ;;  %v9755_v35 = vld [vmem:[#allocation2 + $0x148] ss:$20 sps:$4 sm:$0xff]  }
  0x1e   :  { %v9750_v32 = vld [vmem:[#allocation2 + $0x144] ss:$20 sps:$4 sm:$0xff]   ;;  %v9756_v36 = vld [vmem:[#allocation2 + $0x16c] ss:$20 sps:$4 sm:$0xff]   ;;  %v9758_v37 = vld [vmem:[#allocation2 + $0x174] ss:$20 sps:$4 sm:$0xff]  }
  0x1f   :  { %v9760_v38 = vld [vmem:[#allocation2 + $0x168] ss:$20 sps:$4 sm:$0xff]   ;;  %v9761_v39 = vld [vmem:[#allocation2 + $0x170] ss:$20 sps:$4 sm:$0xff]   ;;  %v9767_v43 = vld [vmem:[#allocation2 + $0x198] ss:$20 sps:$4 sm:$0xff]  }
  0x20   :  { %6585 = vmatpush1.bf16.msra.mxu0 %v9724_v14  ;;  %7144 = vmatpush1.bf16.msra.mxu1 %v9725_v15  ;;  %v9762_v40 = vld [vmem:[#allocation2 + $0x194] ss:$20 sps:$4 sm:$0xff]   ;;  %v9764_v41 = vld [vmem:[#allocation2 + $0x19c] ss:$20 sps:$4 sm:$0xff]   ;;  %v9770_v45 = vld [vmem:[#allocation2 + $0x1c4] ss:$20 sps:$4 sm:$0xff]  }
  0x21   :  { %6586 = vmatprep.subr.bf16.mxu0 %v9726_v16  ;;  %7145 = vmatprep.subr.bf16.mxu1 %v9728_v17  ;;  %v9766_v42 = vld [vmem:[#allocation2 + $0x190] ss:$20 sps:$4 sm:$0xff]   ;;  %v9772_v46 = vld [vmem:[#allocation2 + $0x1b8] ss:$20 sps:$4 sm:$0xff]   ;;  %v9773_v48 = vld [vmem:[#allocation2 + $0x1c0] ss:$20 sps:$4 sm:$0xff]  }
  0x22   :  { %v9768_v44 = vld [vmem:[#allocation2 + $0x1bc] ss:$20 sps:$4 sm:$0xff]   ;;  %v9798_v47 = vld [vmem:[%s11403_s0 + $0x4] ss:$100 sps:$4 sm:$0xff]   ;;  %v9776_v50 = vld [vmem:[#allocation2 + $0x1ec] ss:$20 sps:$4 sm:$0xff]  }
  0x23   :  { %v9774_v49 = vld [vmem:[#allocation2 + $0x1e4] ss:$20 sps:$4 sm:$0xff]   ;;  %6610 = vmatprep.mubr.bf16.mxu0 %v9798_v47  ;;  %7169 = vmatprep.mubr.bf16.mxu1 %v9798_v47  ;;  %v9778_v51 = vld [vmem:[#allocation2 + $0x1e0] ss:$20 sps:$4 sm:$0xff]   ;;  %v9779_v52 = vld [vmem:[#allocation2 + $0x1e8] ss:$20 sps:$4 sm:$0xff]  }
  0x24   :  { %6587 = vmatpush1.bf16.msra.mxu0 %v9730_v18  ;;  %7146 = vmatpush1.bf16.msra.mxu1 %v9731_v19  ;;  %v9780_v53 = vld [vmem:[#allocation2 + $0x20c] ss:$20 sps:$4 sm:$0xff]   ;;  %v9782_v54 = vld [vmem:[#allocation2 + $0x214] ss:$20 sps:$4 sm:$0xff]   ;;  %v9785_v56 = vld [vmem:[#allocation2 + $0x210] ss:$20 sps:$4 sm:$0xff]  }
  0x25   :  { %6588 = vmatprep.subr.bf16.mxu0 %v9732_v20  ;;  %7147 = vmatprep.subr.bf16.mxu1 %v9734_v21  ;;  %v9784_v55 = vld [vmem:[#allocation2 + $0x208] ss:$20 sps:$4 sm:$0xff]   ;;  %v9790_v59 = vld [vmem:[#allocation2 + $0x230] ss:$20 sps:$4 sm:$0xff]   ;;  %v9791_v60 = vld [vmem:[#allocation2 + $0x238] ss:$20 sps:$4 sm:$0xff]  }
  0x26   :  { %v9786_v57 = vld [vmem:[#allocation2 + $0x234] ss:$20 sps:$4 sm:$0xff]   ;;  %v9788_v58 = vld [vmem:[#allocation2 + $0x23c] ss:$20 sps:$4 sm:$0xff]   ;;  %v9794_v62 = vld [vmem:[#allocation2 + $0x264] ss:$20 sps:$4 sm:$0xff]  }
  0x27   :  { %v9792_v61 = vld [vmem:[#allocation2 + $0x25c] ss:$20 sps:$4 sm:$0xff]   ;;  %v9796_v63 = vld [vmem:[#allocation2 + $0x258] ss:$20 sps:$4 sm:$0xff]   ;;  %v9797_v0 = vld [vmem:[#allocation2 + $0x260] ss:$20 sps:$4 sm:$0xff]  }
  0x28   :  { %6589 = vmatpush1.bf16.msra.mxu0 %v9736_v22  ;;  %7148 = vmatpush1.bf16.msra.mxu1 %v9737_v23  ;;  %v9802_v1 = vld [vmem:[#allocation2 + $0x284] ss:$20 sps:$4 sm:$0xff]   ;;  %v9805_v2 = vld [vmem:[#allocation2 + $0x28c] ss:$20 sps:$4 sm:$0xff]   ;;  %v9803_v4 = vld [vmem:[#allocation2 + $0x288] ss:$20 sps:$4 sm:$0xff]  }
  0x29   :  { %6590 = vmatprep.subr.bf16.mxu0 %v9738_v24  ;;  %7149 = vmatprep.subr.bf16.mxu1 %v9740_v25  ;;  %v9800_v3 = vld [vmem:[#allocation2 + $0x280] ss:$20 sps:$4 sm:$0xff]   ;;  %v9807_v8 = vld [vmem:[#allocation2 + $0x2a8] ss:$20 sps:$4 sm:$0xff]   ;;  %v9810_v9 = vld [vmem:[#allocation2 + $0x2b0] ss:$20 sps:$4 sm:$0xff]  }
  0x2a   :  { %v9806_v5 = vld [vmem:[%s11403_s0] ss:$100 sps:$4 sm:$0xff]   ;;  %v9812_v7 = vld [vmem:[#allocation2 + $0x2b4] ss:$20 sps:$4 sm:$0xff]   ;;  %v9818_v11 = vld [vmem:[#allocation2 + $0x2dc] ss:$20 sps:$4 sm:$0xff]  }
  0x2b   :  { %v9809_v6 = vld [vmem:[#allocation2 + $0x2ac] ss:$20 sps:$4 sm:$0xff]   ;;  %v9815_v10 = vld [vmem:[#allocation2 + $0x2d4] ss:$20 sps:$4 sm:$0xff]   ;;  %v9813_v12 = vld [vmem:[#allocation2 + $0x2d0] ss:$20 sps:$4 sm:$0xff]  }
  0x2c   :  { %6591 = vmatpush1.bf16.msra.mxu0 %v9742_v26  ;;  %7150 = vmatpush1.bf16.msra.mxu1 %v9743_v27  ;;  %v9816_v13 = vld [vmem:[#allocation2 + $0x2d8] ss:$20 sps:$4 sm:$0xff]   ;;  %v9821_v14 = vld [vmem:[#allocation2 + $0x2fc] ss:$20 sps:$4 sm:$0xff]   ;;  %v9822_v17 = vld [vmem:[#allocation2 + $0x300] ss:$20 sps:$4 sm:$0xff]  }
  0x2d   :  { %6592 = vmatprep.subr.bf16.mxu0 %v9744_v28  ;;  %7151 = vmatprep.subr.bf16.mxu1 %v9746_v29  ;;  %v9824_v15 = vld [vmem:[#allocation2 + $0x304] ss:$20 sps:$4 sm:$0xff]   ;;  %v9830_v19 = vld [vmem:[#allocation2 + $0x32c] ss:$20 sps:$4 sm:$0xff]   ;;  %v9828_v21 = vld [vmem:[#allocation2 + $0x328] ss:$20 sps:$4 sm:$0xff]  }
  0x2e   :  { %v9819_v16 = vld [vmem:[#allocation2 + $0x2f8] ss:$20 sps:$4 sm:$0xff]   ;;  %v9825_v20 = vld [vmem:[#allocation2 + $0x320] ss:$20 sps:$4 sm:$0xff]   ;;  %v9831_v24 = vld [vmem:[#allocation2 + $0x348] ss:$20 sps:$4 sm:$0xff]  }
  0x2f   :  { %v9827_v18 = vld [vmem:[#allocation2 + $0x324] ss:$20 sps:$4 sm:$0xff]   ;;  %v9833_v22 = vld [vmem:[#allocation2 + $0x34c] ss:$20 sps:$4 sm:$0xff]   ;;  %v9836_v23 = vld [vmem:[#allocation2 + $0x354] ss:$20 sps:$4 sm:$0xff]  }
  0x30   :  { %6593 = vmatpush1.bf16.msra.mxu0 %v9748_v30  ;;  %7152 = vmatpush1.bf16.msra.mxu1 %v9749_v31  ;;  %v9834_v25 = vld [vmem:[#allocation2 + $0x350] ss:$20 sps:$4 sm:$0xff]   ;;  %v9839_v26 = vld [vmem:[#allocation2 + $0x374] ss:$20 sps:$4 sm:$0xff]   ;;  %v9840_v29 = vld [vmem:[#allocation2 + $0x378] ss:$20 sps:$4 sm:$0xff]  }
  0x31   :  { %6594 = vmatprep.subr.bf16.mxu0 %v9750_v32  ;;  %7153 = vmatprep.subr.bf16.mxu1 %v9752_v33  ;;  %v9842_v27 = vld [vmem:[#allocation2 + $0x37c] ss:$20 sps:$4 sm:$0xff]   ;;  %v9848_v32 = vld [vmem:[#allocation2 + $0x3a4] ss:$20 sps:$4 sm:$0xff]   ;;  %vm11191_vm0 = vmmov 0  }
  0x32   :  { %v9837_v28 = vld [vmem:[#allocation2 + $0x370] ss:$20 sps:$4 sm:$0xff]   ;;  %v9843_v33 = vld [vmem:[#allocation2 + $0x398] ss:$20 sps:$4 sm:$0xff]  }
  0x33   :  { %v9899_v30 = vld [vmem:[%s11403_s0 + $0xc] ss:$100 sps:$4 sm:$0xff]  }
  0x34   :  { %6595 = vmatpush1.bf16.msra.mxu0 %v9754_v34  ;;  %7154 = vmatpush1.bf16.msra.mxu1 %v9755_v35  ;;  %v9845_v31 = vld [vmem:[#allocation2 + $0x39c] ss:$20 sps:$4 sm:$0xff]   ;;  %v9846_v34 = vld [vmem:[#allocation2 + $0x3a0] ss:$20 sps:$4 sm:$0xff]   ;;  %v9851_v35 = vld [vmem:[#allocation2 + $0x3c4] ss:$20 sps:$4 sm:$0xff]  }
  0x35   :  { %6596 = vmatprep.subr.bf16.mxu0 %v9756_v36  ;;  %7155 = vmatprep.subr.bf16.mxu1 %v9758_v37  ;;  %v9854_v36 = vld [vmem:[#allocation2 + $0x3cc] ss:$20 sps:$4 sm:$0xff]   ;;  %v9869_v47 = vld [vmem:[#allocation2 + $0x43c] ss:$20 sps:$4 sm:$0xff]  }
  0x36   :  { %v9849_v37 = vld [vmem:[#allocation2 + $0x3c0] ss:$20 sps:$4 sm:$0xff]  }
  0x38   :  { %6597 = vmatpush1.bf16.msra.mxu0 %v9760_v38  ;;  %7156 = vmatpush1.bf16.msra.mxu1 %v9761_v39  ;;  %v9852_v38 = vld [vmem:[#allocation2 + $0x3c8] ss:$20 sps:$4 sm:$0xff]   ;;  %v9857_v39 = vld [vmem:[#allocation2 + $0x3ec] ss:$20 sps:$4 sm:$0xff]  }
  0x39   :  { %6598 = vmatprep.subr.bf16.mxu0 %v9762_v40  ;;  %7157 = vmatprep.subr.bf16.mxu1 %v9764_v41  ;;  %v9860_v40 = vld [vmem:[#allocation2 + $0x3f4] ss:$20 sps:$4 sm:$0xff]  }
  0x3a   :  { %v9855_v41 = vld [vmem:[#allocation2 + $0x3e8] ss:$20 sps:$4 sm:$0xff]  }
  0x3c   :  { %6599 = vmatpush1.bf16.msra.mxu0 %v9766_v42  ;;  %7158 = vmatpush1.bf16.msra.mxu1 %v9767_v43  ;;  %v9858_v42 = vld [vmem:[#allocation2 + $0x3f0] ss:$20 sps:$4 sm:$0xff]   ;;  %v9863_v43 = vld [vmem:[#allocation2 + $0x414] ss:$20 sps:$4 sm:$0xff]  }
  0x3d   :  { %6600 = vmatprep.subr.bf16.mxu0 %v9768_v44  ;;  %7159 = vmatprep.subr.bf16.mxu1 %v9770_v45  ;;  %v9866_v44 = vld [vmem:[#allocation2 + $0x41c] ss:$20 sps:$4 sm:$0xff]  }
  0x3e   :  { %v9861_v45 = vld [vmem:[#allocation2 + $0x410] ss:$20 sps:$4 sm:$0xff]  }
  0x40   :  { %6601 = vmatpush1.bf16.msra.mxu0 %v9772_v46  ;;  %7160 = vmatpush1.bf16.msra.mxu1 %v9773_v48  ;;  %v9864_v46 = vld [vmem:[#allocation2 + $0x418] ss:$20 sps:$4 sm:$0xff]  }
  0x41   :  { %6602 = vmatprep.subr.bf16.mxu0 %v9774_v49  ;;  %7161 = vmatprep.subr.bf16.mxu1 %v9776_v50  ;;  %v9872_v48 = vld [vmem:[#allocation2 + $0x444] ss:$20 sps:$4 sm:$0xff]   ;;  %v9870_v50 = vld [vmem:[#allocation2 + $0x440] ss:$20 sps:$4 sm:$0xff]  }
  0x42   :  { %v9867_v49 = vld [vmem:[#allocation2 + $0x438] ss:$20 sps:$4 sm:$0xff]  }
  0x44   :  { %6603 = vmatpush1.bf16.msra.mxu0 %v9778_v51  ;;  %7162 = vmatpush1.bf16.msra.mxu1 %v9779_v52  ;;  %v9875_v51 = vld [vmem:[#allocation2 + $0x464] ss:$20 sps:$4 sm:$0xff]   ;;  %v9878_v52 = vld [vmem:[#allocation2 + $0x46c] ss:$20 sps:$4 sm:$0xff]  }
  0x45   :  { %6604 = vmatprep.subr.bf16.mxu0 %v9780_v53  ;;  %7163 = vmatprep.subr.bf16.mxu1 %v9782_v54  ;;  %v9873_v53 = vld [vmem:[#allocation2 + $0x460] ss:$20 sps:$4 sm:$0xff]   ;;  %v9876_v54 = vld [vmem:[#allocation2 + $0x468] ss:$20 sps:$4 sm:$0xff]  }
  0x48   :  { %6605 = vmatpush1.bf16.msra.mxu0 %v9784_v55  ;;  %7164 = vmatpush1.bf16.msra.mxu1 %v9785_v56  ;;  %v9881_v55 = vld [vmem:[#allocation2 + $0x48c] ss:$20 sps:$4 sm:$0xff]   ;;  %v9884_v56 = vld [vmem:[#allocation2 + $0x494] ss:$20 sps:$4 sm:$0xff]  }
  0x49   :  { %6606 = vmatprep.subr.bf16.mxu0 %v9786_v57  ;;  %7165 = vmatprep.subr.bf16.mxu1 %v9788_v58  ;;  %v9879_v57 = vld [vmem:[#allocation2 + $0x488] ss:$20 sps:$4 sm:$0xff]   ;;  %v9882_v58 = vld [vmem:[#allocation2 + $0x490] ss:$20 sps:$4 sm:$0xff]  }
  0x4c   :  { %6607 = vmatpush1.bf16.msra.mxu0 %v9790_v59  ;;  %7166 = vmatpush1.bf16.msra.mxu1 %v9791_v60  ;;  %v9887_v59 = vld [vmem:[#allocation2 + $0x4b4] ss:$20 sps:$4 sm:$0xff]   ;;  %v9890_v60 = vld [vmem:[#allocation2 + $0x4bc] ss:$20 sps:$4 sm:$0xff]  }
  0x4d   :  { %6608 = vmatprep.subr.bf16.mxu0 %v9792_v61  ;;  %7167 = vmatprep.subr.bf16.mxu1 %v9794_v62  ;;  %v9885_v61 = vld [vmem:[#allocation2 + $0x4b0] ss:$20 sps:$4 sm:$0xff]   ;;  %v9888_v62 = vld [vmem:[#allocation2 + $0x4b8] ss:$20 sps:$4 sm:$0xff]  }
  0x50   :  { %6609 = vmatpush1.bf16.msra.mxu0 %v9796_v63  ;;  %7168 = vmatpush1.bf16.msra.mxu1 %v9797_v0  ;;  %v9893_v63 = vld [vmem:[#allocation2 + $0x4dc] ss:$20 sps:$4 sm:$0xff]   ;;  %v9896_v0 = vld [vmem:[#allocation2 + $0x4e4] ss:$20 sps:$4 sm:$0xff]  }
  0x51   :  { %6621 = vmatprep.subr.bf16.mxu0 %v9802_v1  ;;  %7180 = vmatprep.subr.bf16.mxu1 %v9805_v2  ;;  %v9891_v1 = vld [vmem:[#allocation2 + $0x4d8] ss:$20 sps:$4 sm:$0xff]   ;;  %v9894_v2 = vld [vmem:[#allocation2 + $0x4e0] ss:$20 sps:$4 sm:$0xff]  }
  0x53   :  { %6611 = vmatmul.mubr.bf16.vlgmr.msra.gmra.mrb[0].mxu0 %v9806_v5  ;;  %7170 = vmatmul.mubr.bf16.vlgmr.msra.gmra.mrb[0].mxu1 %v9806_v5  ;;  %v9897_v5 = vld [vmem:[%s11403_s0 + $0x8] ss:$100 sps:$4 sm:$0xff]  }
  0x54   :  { %6622 = vmatpush1.bf16.msra.mxu0 %v9800_v3  ;;  %7181 = vmatpush1.bf16.msra.mxu1 %v9803_v4  ;;  %v9902_v3 = vld [vmem:[#allocation2 + $0x504] ss:$20 sps:$4 sm:$0xff]   ;;  %v9905_v4 = vld [vmem:[#allocation2 + $0x50c] ss:$20 sps:$4 sm:$0xff]  }
  0x55   :  { %6623 = vmatprep.subr.bf16.mxu0 %v9809_v6  ;;  %7182 = vmatprep.subr.bf16.mxu1 %v9812_v7  ;;  %v9900_v6 = vld [vmem:[#allocation2 + $0x500] ss:$20 sps:$4 sm:$0xff]   ;;  %v9903_v7 = vld [vmem:[#allocation2 + $0x508] ss:$20 sps:$4 sm:$0xff]  }
  0x56   :  { %6653 = vmatprep.mubr.bf16.mxu0 %v9899_v30  ;;  %7212 = vmatprep.mubr.bf16.mxu1 %v9899_v30  ;;  %v9941_v30 = vld [vmem:[#allocation2 + $0x5fc] ss:$20 sps:$4 sm:$0xff]  }
  0x58   :  { %6624 = vmatpush1.bf16.msra.mxu0 %v9807_v8  ;;  %7183 = vmatpush1.bf16.msra.mxu1 %v9810_v9  ;;  %v9908_v8 = vld [vmem:[#allocation2 + $0x52c] ss:$20 sps:$4 sm:$0xff]   ;;  %v9911_v9 = vld [vmem:[#allocation2 + $0x534] ss:$20 sps:$4 sm:$0xff]  }
  0x59   :  { %6625 = vmatprep.subr.bf16.mxu0 %v9815_v10  ;;  %7184 = vmatprep.subr.bf16.mxu1 %v9818_v11  ;;  %v9906_v10 = vld [vmem:[#allocation2 + $0x528] ss:$20 sps:$4 sm:$0xff]   ;;  %v9909_v11 = vld [vmem:[#allocation2 + $0x530] ss:$20 sps:$4 sm:$0xff]  }
  0x5c   :  { %6626 = vmatpush1.bf16.msra.mxu0 %v9813_v12  ;;  %7185 = vmatpush1.bf16.msra.mxu1 %v9816_v13  ;;  %v9998_v12 = vld [vmem:[%s11403_s0 + $0x14] ss:$100 sps:$4 sm:$0xff]  }
  0x5d   :  { %6627 = vmatprep.subr.bf16.mxu0 %v9821_v14  ;;  %7186 = vmatprep.subr.bf16.mxu1 %v9824_v15  ;;  %v9914_v13 = vld [vmem:[#allocation2 + $0x554] ss:$20 sps:$4 sm:$0xff]   ;;  %v9917_v14 = vld [vmem:[#allocation2 + $0x55c] ss:$20 sps:$4 sm:$0xff]  }
  0x5e   :  { %v9912_v15 = vld [vmem:[#allocation2 + $0x550] ss:$20 sps:$4 sm:$0xff]  }
  0x60   :  { %6628 = vmatpush1.bf16.msra.mxu0 %v9819_v16  ;;  %7187 = vmatpush1.bf16.msra.mxu1 %v9822_v17  ;;  %v9915_v16 = vld [vmem:[#allocation2 + $0x558] ss:$20 sps:$4 sm:$0xff]   ;;  %v9920_v17 = vld [vmem:[#allocation2 + $0x57c] ss:$20 sps:$4 sm:$0xff]  }
  0x61   :  { %6629 = vmatprep.subr.bf16.mxu0 %v9827_v18  ;;  %7188 = vmatprep.subr.bf16.mxu1 %v9830_v19  ;;  %v9923_v18 = vld [vmem:[#allocation2 + $0x584] ss:$20 sps:$4 sm:$0xff]  }
  0x62   :  { %v9918_v19 = vld [vmem:[#allocation2 + $0x578] ss:$20 sps:$4 sm:$0xff]  }
  0x64   :  { %6630 = vmatpush1.bf16.msra.mxu0 %v9825_v20  ;;  %7189 = vmatpush1.bf16.msra.mxu1 %v9828_v21  ;;  %v9921_v20 = vld [vmem:[#allocation2 + $0x580] ss:$20 sps:$4 sm:$0xff]   ;;  %v9926_v21 = vld [vmem:[#allocation2 + $0x5a4] ss:$20 sps:$4 sm:$0xff]  }
  0x65   :  { %6631 = vmatprep.subr.bf16.mxu0 %v9833_v22  ;;  %7190 = vmatprep.subr.bf16.mxu1 %v9836_v23  ;;  %v9929_v22 = vld [vmem:[#allocation2 + $0x5ac] ss:$20 sps:$4 sm:$0xff]  }
  0x66   :  { %v9924_v23 = vld [vmem:[#allocation2 + $0x5a0] ss:$20 sps:$4 sm:$0xff]  }
  0x68   :  { %6632 = vmatpush1.bf16.msra.mxu0 %v9831_v24  ;;  %7191 = vmatpush1.bf16.msra.mxu1 %v9834_v25  ;;  %v9927_v24 = vld [vmem:[#allocation2 + $0x5a8] ss:$20 sps:$4 sm:$0xff]   ;;  %v9932_v25 = vld [vmem:[#allocation2 + $0x5cc] ss:$20 sps:$4 sm:$0xff]  }
  0x69   :  { %6633 = vmatprep.subr.bf16.mxu0 %v9839_v26  ;;  %7192 = vmatprep.subr.bf16.mxu1 %v9842_v27  ;;  %v9935_v26 = vld [vmem:[#allocation2 + $0x5d4] ss:$20 sps:$4 sm:$0xff]  }
  0x6a   :  { %v9930_v27 = vld [vmem:[#allocation2 + $0x5c8] ss:$20 sps:$4 sm:$0xff]  }
  0x6c   :  { %6634 = vmatpush1.bf16.msra.mxu0 %v9837_v28  ;;  %7193 = vmatpush1.bf16.msra.mxu1 %v9840_v29  ;;  %v9933_v28 = vld [vmem:[#allocation2 + $0x5d0] ss:$20 sps:$4 sm:$0xff]   ;;  %v9938_v29 = vld [vmem:[#allocation2 + $0x5f4] ss:$20 sps:$4 sm:$0xff]  }
  0x6d   :  { %6635 = vmatprep.subr.bf16.mxu0 %v9845_v31  ;;  %7194 = vmatprep.subr.bf16.mxu1 %v9848_v32  ;;  %v9936_v31 = vld [vmem:[#allocation2 + $0x5f0] ss:$20 sps:$4 sm:$0xff]   ;;  %v9939_v32 = vld [vmem:[#allocation2 + $0x5f8] ss:$20 sps:$4 sm:$0xff]  }
  0x70   :  { %6636 = vmatpush1.bf16.msra.mxu0 %v9843_v33  ;;  %7195 = vmatpush1.bf16.msra.mxu1 %v9846_v34  ;;  %v9944_v33 = vld [vmem:[#allocation2 + $0x61c] ss:$20 sps:$4 sm:$0xff]   ;;  %v9947_v34 = vld [vmem:[#allocation2 + $0x624] ss:$20 sps:$4 sm:$0xff]  }
  0x71   :  { %6637 = vmatprep.subr.bf16.mxu0 %v9851_v35  ;;  %7196 = vmatprep.subr.bf16.mxu1 %v9854_v36  ;;  %v9942_v35 = vld [vmem:[#allocation2 + $0x618] ss:$20 sps:$4 sm:$0xff]   ;;  %v9945_v36 = vld [vmem:[#allocation2 + $0x620] ss:$20 sps:$4 sm:$0xff]  }
  0x74   :  { %6638 = vmatpush1.bf16.msra.mxu0 %v9849_v37  ;;  %7197 = vmatpush1.bf16.msra.mxu1 %v9852_v38  ;;  %v9950_v37 = vld [vmem:[#allocation2 + $0x644] ss:$20 sps:$4 sm:$0xff]   ;;  %v9953_v38 = vld [vmem:[#allocation2 + $0x64c] ss:$20 sps:$4 sm:$0xff]  }
  0x75   :  { %6639 = vmatprep.subr.bf16.mxu0 %v9857_v39  ;;  %7198 = vmatprep.subr.bf16.mxu1 %v9860_v40  ;;  %v9948_v39 = vld [vmem:[#allocation2 + $0x640] ss:$20 sps:$4 sm:$0xff]   ;;  %v9951_v40 = vld [vmem:[#allocation2 + $0x648] ss:$20 sps:$4 sm:$0xff]  }
  0x78   :  { %6640 = vmatpush1.bf16.msra.mxu0 %v9855_v41  ;;  %7199 = vmatpush1.bf16.msra.mxu1 %v9858_v42  ;;  %v9956_v41 = vld [vmem:[#allocation2 + $0x66c] ss:$20 sps:$4 sm:$0xff]   ;;  %v9959_v42 = vld [vmem:[#allocation2 + $0x674] ss:$20 sps:$4 sm:$0xff]  }
  0x79   :  { %6641 = vmatprep.subr.bf16.mxu0 %v9863_v43  ;;  %7200 = vmatprep.subr.bf16.mxu1 %v9866_v44  ;;  %v9954_v43 = vld [vmem:[#allocation2 + $0x668] ss:$20 sps:$4 sm:$0xff]   ;;  %v9957_v44 = vld [vmem:[#allocation2 + $0x670] ss:$20 sps:$4 sm:$0xff]  }
  0x7c   :  { %6642 = vmatpush1.bf16.msra.mxu0 %v9861_v45  ;;  %7201 = vmatpush1.bf16.msra.mxu1 %v9864_v46  ;;  %v9962_v45 = vld [vmem:[#allocation2 + $0x694] ss:$20 sps:$4 sm:$0xff]   ;;  %v9965_v46 = vld [vmem:[#allocation2 + $0x69c] ss:$20 sps:$4 sm:$0xff]  }
  0x7d   :  { %6643 = vmatprep.subr.bf16.mxu0 %v9869_v47  ;;  %7202 = vmatprep.subr.bf16.mxu1 %v9872_v48  ;;  %v9960_v47 = vld [vmem:[#allocation2 + $0x690] ss:$20 sps:$4 sm:$0xff]   ;;  %v9963_v48 = vld [vmem:[#allocation2 + $0x698] ss:$20 sps:$4 sm:$0xff]  }
  0x80   :  { %6644 = vmatpush1.bf16.msra.mxu0 %v9867_v49  ;;  %7203 = vmatpush1.bf16.msra.mxu1 %v9870_v50  ;;  %v9968_v49 = vld [vmem:[#allocation2 + $0x6bc] ss:$20 sps:$4 sm:$0xff]   ;;  %v9971_v50 = vld [vmem:[#allocation2 + $0x6c4] ss:$20 sps:$4 sm:$0xff]  }
  0x81   :  { %6645 = vmatprep.subr.bf16.mxu0 %v9875_v51  ;;  %7204 = vmatprep.subr.bf16.mxu1 %v9878_v52  ;;  %v9966_v51 = vld [vmem:[#allocation2 + $0x6b8] ss:$20 sps:$4 sm:$0xff]   ;;  %v9969_v52 = vld [vmem:[#allocation2 + $0x6c0] ss:$20 sps:$4 sm:$0xff]  }
  0x84   :  { %6646 = vmatpush1.bf16.msra.mxu0 %v9873_v53  ;;  %7205 = vmatpush1.bf16.msra.mxu1 %v9876_v54  ;;  %v9974_v53 = vld [vmem:[#allocation2 + $0x6e4] ss:$20 sps:$4 sm:$0xff]   ;;  %v9977_v54 = vld [vmem:[#allocation2 + $0x6ec] ss:$20 sps:$4 sm:$0xff]  }
  0x85   :  { %6647 = vmatprep.subr.bf16.mxu0 %v9881_v55  ;;  %7206 = vmatprep.subr.bf16.mxu1 %v9884_v56  ;;  %v9972_v55 = vld [vmem:[#allocation2 + $0x6e0] ss:$20 sps:$4 sm:$0xff]   ;;  %v9975_v56 = vld [vmem:[#allocation2 + $0x6e8] ss:$20 sps:$4 sm:$0xff]  }
  0x88   :  { %6648 = vmatpush1.bf16.msra.mxu0 %v9879_v57  ;;  %7207 = vmatpush1.bf16.msra.mxu1 %v9882_v58  ;;  %v9980_v57 = vld [vmem:[#allocation2 + $0x70c] ss:$20 sps:$4 sm:$0xff]   ;;  %v9983_v58 = vld [vmem:[#allocation2 + $0x714] ss:$20 sps:$4 sm:$0xff]  }
  0x89   :  { %6649 = vmatprep.subr.bf16.mxu0 %v9887_v59  ;;  %7208 = vmatprep.subr.bf16.mxu1 %v9890_v60  ;;  %v9978_v59 = vld [vmem:[#allocation2 + $0x708] ss:$20 sps:$4 sm:$0xff]   ;;  %v9981_v60 = vld [vmem:[#allocation2 + $0x710] ss:$20 sps:$4 sm:$0xff]  }
  0x8c   :  { %6650 = vmatpush1.bf16.msra.mxu0 %v9885_v61  ;;  %7209 = vmatpush1.bf16.msra.mxu1 %v9888_v62  ;;  %v9986_v61 = vld [vmem:[#allocation2 + $0x734] ss:$20 sps:$4 sm:$0xff]   ;;  %v9989_v62 = vld [vmem:[#allocation2 + $0x73c] ss:$20 sps:$4 sm:$0xff]  }
  0x8d   :  { %6651 = vmatprep.subr.bf16.mxu0 %v9893_v63  ;;  %7210 = vmatprep.subr.bf16.mxu1 %v9896_v0  ;;  %v9984_v63 = vld [vmem:[#allocation2 + $0x730] ss:$20 sps:$4 sm:$0xff]   ;;  %v9987_v0 = vld [vmem:[#allocation2 + $0x738] ss:$20 sps:$4 sm:$0xff]  }
  0x90   :  { %6652 = vmatpush1.bf16.msra.mxu0 %v9891_v1  ;;  %7211 = vmatpush1.bf16.msra.mxu1 %v9894_v2  ;;  %v9992_v1 = vld [vmem:[#allocation2 + $0x75c] ss:$20 sps:$4 sm:$0xff]   ;;  %v9995_v2 = vld [vmem:[#allocation2 + $0x764] ss:$20 sps:$4 sm:$0xff]  }
  0x91   :  { %6664 = vmatprep.subr.bf16.mxu0 %v9902_v3  ;;  %7223 = vmatprep.subr.bf16.mxu1 %v9905_v4  ;;  %v9990_v3 = vld [vmem:[#allocation2 + $0x758] ss:$20 sps:$4 sm:$0xff]   ;;  %v9993_v4 = vld [vmem:[#allocation2 + $0x760] ss:$20 sps:$4 sm:$0xff]  }
  0x93   :  { %6654 = vmatmul.mubr.bf16.vlgmr.msra.gmra.mrb[0].mxu0 %v9897_v5  ;;  %7213 = vmatmul.mubr.bf16.vlgmr.msra.gmra.mrb[0].mxu1 %v9897_v5  ;;  %v10001_v5 = vld [vmem:[#allocation2 + $0x784] ss:$20 sps:$4 sm:$0xff]  }
  0x94   :  { %6665 = vmatpush1.bf16.msra.mxu0 %v9900_v6  ;;  %7224 = vmatpush1.bf16.msra.mxu1 %v9903_v7  ;;  %v10004_v6 = vld [vmem:[#allocation2 + $0x78c] ss:$20 sps:$4 sm:$0xff]   ;;  %v9996_v7 = vld [vmem:[%s11403_s0 + $0x10] ss:$100 sps:$4 sm:$0xff]  }
  0x95   :  { %6666 = vmatprep.subr.bf16.mxu0 %v9908_v8  ;;  %7225 = vmatprep.subr.bf16.mxu1 %v9911_v9  ;;  %v9999_v8 = vld [vmem:[#allocation2 + $0x780] ss:$20 sps:$4 sm:$0xff]   ;;  %v10002_v9 = vld [vmem:[#allocation2 + $0x788] ss:$20 sps:$4 sm:$0xff]  }
  0x96   :  { %6696 = vmatprep.mubr.bf16.mxu0 %v9998_v12  ;;  %7255 = vmatprep.mubr.bf16.mxu1 %v9998_v12  ;;  %v10097_v12 = vld [vmem:[%s11403_s0 + $0x1c] ss:$100 sps:$4 sm:$0xff]  }
  0x98   :  { %6667 = vmatpush1.bf16.msra.mxu0 %v9906_v10  ;;  %7226 = vmatpush1.bf16.msra.mxu1 %v9909_v11  ;;  %v10007_v10 = vld [vmem:[#allocation2 + $0x7ac] ss:$20 sps:$4 sm:$0xff]   ;;  %v10010_v11 = vld [vmem:[#allocation2 + $0x7b4] ss:$20 sps:$4 sm:$0xff]  }
  0x99   :  { %6668 = vmatprep.subr.bf16.mxu0 %v9914_v13  ;;  %7227 = vmatprep.subr.bf16.mxu1 %v9917_v14  ;;  %v10005_v13 = vld [vmem:[#allocation2 + $0x7a8] ss:$20 sps:$4 sm:$0xff]   ;;  %v10008_v14 = vld [vmem:[#allocation2 + $0x7b0] ss:$20 sps:$4 sm:$0xff]  }
  0x9c   :  { %6669 = vmatpush1.bf16.msra.mxu0 %v9912_v15  ;;  %7228 = vmatpush1.bf16.msra.mxu1 %v9915_v16  ;;  %v10013_v15 = vld [vmem:[#allocation2 + $0x7d4] ss:$20 sps:$4 sm:$0xff]   ;;  %v10016_v16 = vld [vmem:[#allocation2 + $0x7dc] ss:$20 sps:$4 sm:$0xff]  }
  0x9d   :  { %6670 = vmatprep.subr.bf16.mxu0 %v9920_v17  ;;  %7229 = vmatprep.subr.bf16.mxu1 %v9923_v18  ;;  %v10011_v17 = vld [vmem:[#allocation2 + $0x7d0] ss:$20 sps:$4 sm:$0xff]   ;;  %v10014_v18 = vld [vmem:[#allocation2 + $0x7d8] ss:$20 sps:$4 sm:$0xff]  }
  0xa0   :  { %6671 = vmatpush1.bf16.msra.mxu0 %v9918_v19  ;;  %7230 = vmatpush1.bf16.msra.mxu1 %v9921_v20  ;;  %v10019_v19 = vld [vmem:[#allocation2 + $0x7fc] ss:$20 sps:$4 sm:$0xff]   ;;  %v10022_v20 = vld [vmem:[#allocation2 + $0x804] ss:$20 sps:$4 sm:$0xff]  }
  0xa1   :  { %6672 = vmatprep.subr.bf16.mxu0 %v9926_v21  ;;  %7231 = vmatprep.subr.bf16.mxu1 %v9929_v22  ;;  %v10017_v21 = vld [vmem:[#allocation2 + $0x7f8] ss:$20 sps:$4 sm:$0xff]   ;;  %v10020_v22 = vld [vmem:[#allocation2 + $0x800] ss:$20 sps:$4 sm:$0xff]  }
  0xa4   :  { %6673 = vmatpush1.bf16.msra.mxu0 %v9924_v23  ;;  %7232 = vmatpush1.bf16.msra.mxu1 %v9927_v24  ;;  %v10025_v23 = vld [vmem:[#allocation2 + $0x824] ss:$20 sps:$4 sm:$0xff]   ;;  %v10028_v24 = vld [vmem:[#allocation2 + $0x82c] ss:$20 sps:$4 sm:$0xff]  }
  0xa5   :  { %6674 = vmatprep.subr.bf16.mxu0 %v9932_v25  ;;  %7233 = vmatprep.subr.bf16.mxu1 %v9935_v26  ;;  %v10023_v25 = vld [vmem:[#allocation2 + $0x820] ss:$20 sps:$4 sm:$0xff]   ;;  %v10026_v26 = vld [vmem:[#allocation2 + $0x828] ss:$20 sps:$4 sm:$0xff]  }
  0xa8   :  { %6675 = vmatpush1.bf16.msra.mxu0 %v9930_v27  ;;  %7234 = vmatpush1.bf16.msra.mxu1 %v9933_v28  ;;  %v10031_v27 = vld [vmem:[#allocation2 + $0x84c] ss:$20 sps:$4 sm:$0xff]   ;;  %v10034_v28 = vld [vmem:[#allocation2 + $0x854] ss:$20 sps:$4 sm:$0xff]  }
  0xa9   :  { %6676 = vmatprep.subr.bf16.mxu0 %v9938_v29  ;;  %7235 = vmatprep.subr.bf16.mxu1 %v9941_v30  ;;  %v10029_v29 = vld [vmem:[#allocation2 + $0x848] ss:$20 sps:$4 sm:$0xff]   ;;  %v10032_v30 = vld [vmem:[#allocation2 + $0x850] ss:$20 sps:$4 sm:$0xff]  }
  0xac   :  { %6677 = vmatpush1.bf16.msra.mxu0 %v9936_v31  ;;  %7236 = vmatpush1.bf16.msra.mxu1 %v9939_v32  ;;  %v10037_v31 = vld [vmem:[#allocation2 + $0x874] ss:$20 sps:$4 sm:$0xff]   ;;  %v10040_v32 = vld [vmem:[#allocation2 + $0x87c] ss:$20 sps:$4 sm:$0xff]  }
  0xad   :  { %6678 = vmatprep.subr.bf16.mxu0 %v9944_v33  ;;  %7237 = vmatprep.subr.bf16.mxu1 %v9947_v34  ;;  %v10035_v33 = vld [vmem:[#allocation2 + $0x870] ss:$20 sps:$4 sm:$0xff]   ;;  %v10038_v34 = vld [vmem:[#allocation2 + $0x878] ss:$20 sps:$4 sm:$0xff]  }
  0xb0   :  { %6679 = vmatpush1.bf16.msra.mxu0 %v9942_v35  ;;  %7238 = vmatpush1.bf16.msra.mxu1 %v9945_v36  ;;  %v10043_v35 = vld [vmem:[#allocation2 + $0x89c] ss:$20 sps:$4 sm:$0xff]   ;;  %v10046_v36 = vld [vmem:[#allocation2 + $0x8a4] ss:$20 sps:$4 sm:$0xff]  }
  0xb1   :  { %6680 = vmatprep.subr.bf16.mxu0 %v9950_v37  ;;  %7239 = vmatprep.subr.bf16.mxu1 %v9953_v38  ;;  %v10041_v37 = vld [vmem:[#allocation2 + $0x898] ss:$20 sps:$4 sm:$0xff]   ;;  %v10044_v38 = vld [vmem:[#allocation2 + $0x8a0] ss:$20 sps:$4 sm:$0xff]  }
  0xb4   :  { %6681 = vmatpush1.bf16.msra.mxu0 %v9948_v39  ;;  %7240 = vmatpush1.bf16.msra.mxu1 %v9951_v40  ;;  %v10049_v39 = vld [vmem:[#allocation2 + $0x8c4] ss:$20 sps:$4 sm:$0xff]   ;;  %v10052_v40 = vld [vmem:[#allocation2 + $0x8cc] ss:$20 sps:$4 sm:$0xff]  }
  0xb5   :  { %6682 = vmatprep.subr.bf16.mxu0 %v9956_v41  ;;  %7241 = vmatprep.subr.bf16.mxu1 %v9959_v42  ;;  %v10047_v41 = vld [vmem:[#allocation2 + $0x8c0] ss:$20 sps:$4 sm:$0xff]   ;;  %v10050_v42 = vld [vmem:[#allocation2 + $0x8c8] ss:$20 sps:$4 sm:$0xff]  }
  0xb8   :  { %6683 = vmatpush1.bf16.msra.mxu0 %v9954_v43  ;;  %7242 = vmatpush1.bf16.msra.mxu1 %v9957_v44  ;;  %v10055_v43 = vld [vmem:[#allocation2 + $0x8ec] ss:$20 sps:$4 sm:$0xff]   ;;  %v10058_v44 = vld [vmem:[#allocation2 + $0x8f4] ss:$20 sps:$4 sm:$0xff]  }
  0xb9   :  { %6684 = vmatprep.subr.bf16.mxu0 %v9962_v45  ;;  %7243 = vmatprep.subr.bf16.mxu1 %v9965_v46  ;;  %v10053_v45 = vld [vmem:[#allocation2 + $0x8e8] ss:$20 sps:$4 sm:$0xff]   ;;  %v10056_v46 = vld [vmem:[#allocation2 + $0x8f0] ss:$20 sps:$4 sm:$0xff]  }
  0xbc   :  { %6685 = vmatpush1.bf16.msra.mxu0 %v9960_v47  ;;  %7244 = vmatpush1.bf16.msra.mxu1 %v9963_v48  ;;  %v10061_v47 = vld [vmem:[#allocation2 + $0x914] ss:$20 sps:$4 sm:$0xff]   ;;  %v10064_v48 = vld [vmem:[#allocation2 + $0x91c] ss:$20 sps:$4 sm:$0xff]  }
  0xbd   :  { %6686 = vmatprep.subr.bf16.mxu0 %v9968_v49  ;;  %7245 = vmatprep.subr.bf16.mxu1 %v9971_v50  ;;  %v10059_v49 = vld [vmem:[#allocation2 + $0x910] ss:$20 sps:$4 sm:$0xff]   ;;  %v10062_v50 = vld [vmem:[#allocation2 + $0x918] ss:$20 sps:$4 sm:$0xff]  }
  0xc0   :  { %6687 = vmatpush1.bf16.msra.mxu0 %v9966_v51  ;;  %7246 = vmatpush1.bf16.msra.mxu1 %v9969_v52  ;;  %v10067_v51 = vld [vmem:[#allocation2 + $0x93c] ss:$20 sps:$4 sm:$0xff]   ;;  %v10070_v52 = vld [vmem:[#allocation2 + $0x944] ss:$20 sps:$4 sm:$0xff]  }
  0xc1   :  { %6688 = vmatprep.subr.bf16.mxu0 %v9974_v53  ;;  %7247 = vmatprep.subr.bf16.mxu1 %v9977_v54  ;;  %v10065_v53 = vld [vmem:[#allocation2 + $0x938] ss:$20 sps:$4 sm:$0xff]   ;;  %v10068_v54 = vld [vmem:[#allocation2 + $0x940] ss:$20 sps:$4 sm:$0xff]  }
  0xc4   :  { %6689 = vmatpush1.bf16.msra.mxu0 %v9972_v55  ;;  %7248 = vmatpush1.bf16.msra.mxu1 %v9975_v56  ;;  %v10073_v55 = vld [vmem:[#allocation2 + $0x964] ss:$20 sps:$4 sm:$0xff]   ;;  %v10076_v56 = vld [vmem:[#allocation2 + $0x96c] ss:$20 sps:$4 sm:$0xff]  }
  0xc5   :  { %6690 = vmatprep.subr.bf16.mxu0 %v9980_v57  ;;  %7249 = vmatprep.subr.bf16.mxu1 %v9983_v58  ;;  %v10071_v57 = vld [vmem:[#allocation2 + $0x960] ss:$20 sps:$4 sm:$0xff]   ;;  %v10074_v58 = vld [vmem:[#allocation2 + $0x968] ss:$20 sps:$4 sm:$0xff]  }
  0xc8   :  { %6691 = vmatpush1.bf16.msra.mxu0 %v9978_v59  ;;  %7250 = vmatpush1.bf16.msra.mxu1 %v9981_v60  ;;  %v10079_v59 = vld [vmem:[#allocation2 + $0x98c] ss:$20 sps:$4 sm:$0xff]   ;;  %v10082_v60 = vld [vmem:[#allocation2 + $0x994] ss:$20 sps:$4 sm:$0xff]  }
  0xc9   :  { %6692 = vmatprep.subr.bf16.mxu0 %v9986_v61  ;;  %7251 = vmatprep.subr.bf16.mxu1 %v9989_v62  ;;  %v10077_v61 = vld [vmem:[#allocation2 + $0x988] ss:$20 sps:$4 sm:$0xff]   ;;  %v10080_v62 = vld [vmem:[#allocation2 + $0x990] ss:$20 sps:$4 sm:$0xff]  }
  0xcc   :  { %6693 = vmatpush1.bf16.msra.mxu0 %v9984_v63  ;;  %7252 = vmatpush1.bf16.msra.mxu1 %v9987_v0  ;;  %v10085_v63 = vld [vmem:[#allocation2 + $0x9b4] ss:$20 sps:$4 sm:$0xff]   ;;  %v10088_v0 = vld [vmem:[#allocation2 + $0x9bc] ss:$20 sps:$4 sm:$0xff]  }
  0xcd   :  { %6694 = vmatprep.subr.bf16.mxu0 %v9992_v1  ;;  %7253 = vmatprep.subr.bf16.mxu1 %v9995_v2  ;;  %v10083_v1 = vld [vmem:[#allocation2 + $0x9b0] ss:$20 sps:$4 sm:$0xff]   ;;  %v10086_v2 = vld [vmem:[#allocation2 + $0x9b8] ss:$20 sps:$4 sm:$0xff]  }
  0xd0   :  { %6695 = vmatpush1.bf16.msra.mxu0 %v9990_v3  ;;  %7254 = vmatpush1.bf16.msra.mxu1 %v9993_v4  ;;  %v10091_v3 = vld [vmem:[#allocation2 + $0x9dc] ss:$20 sps:$4 sm:$0xff]   ;;  %v10094_v4 = vld [vmem:[#allocation2 + $0x9e4] ss:$20 sps:$4 sm:$0xff]  }
  0xd1   :  { %6707 = vmatprep.subr.bf16.mxu0 %v10001_v5  ;;  %7266 = vmatprep.subr.bf16.mxu1 %v10004_v6  ;;  %v10089_v5 = vld [vmem:[#allocation2 + $0x9d8] ss:$20 sps:$4 sm:$0xff]   ;;  %v10092_v6 = vld [vmem:[#allocation2 + $0x9e0] ss:$20 sps:$4 sm:$0xff]  }
  0xd3   :  { %6697 = vmatmul.mubr.bf16.vlgmr.msra.gmra.mrb[0].mxu0 %v9996_v7  ;;  %7256 = vmatmul.mubr.bf16.vlgmr.msra.gmra.mrb[0].mxu1 %v9996_v7  ;;  %v10100_v7 = vld [vmem:[#allocation2 + $0xa04] ss:$20 sps:$4 sm:$0xff]  }
  0xd4   :  { %6708 = vmatpush1.bf16.msra.mxu0 %v9999_v8  ;;  %7267 = vmatpush1.bf16.msra.mxu1 %v10002_v9  ;;  %v10103_v8 = vld [vmem:[#allocation2 + $0xa0c] ss:$20 sps:$4 sm:$0xff]   ;;  %v10095_v9 = vld [vmem:[%s11403_s0 + $0x18] ss:$100 sps:$4 sm:$0xff]  }
  0xd5   :  { %6709 = vmatprep.subr.bf16.mxu0 %v10007_v10  ;;  %7268 = vmatprep.subr.bf16.mxu1 %v10010_v11  ;;  %v10098_v10 = vld [vmem:[#allocation2 + $0xa00] ss:$20 sps:$4 sm:$0xff]   ;;  %v10101_v11 = vld [vmem:[#allocation2 + $0xa08] ss:$20 sps:$4 sm:$0xff]  }
  0xd6   :  { %6739 = vmatprep.mubr.bf16.mxu0 %v10097_v12  ;;  %7298 = vmatprep.mubr.bf16.mxu1 %v10097_v12  ;;  %v10106_v12 = vld [vmem:[#allocation2 + $0xa2c] ss:$20 sps:$4 sm:$0xff]  }
  0xd8   :  { %6710 = vmatpush1.bf16.msra.mxu0 %v10005_v13  ;;  %7269 = vmatpush1.bf16.msra.mxu1 %v10008_v14  ;;  %v10109_v13 = vld [vmem:[#allocation2 + $0xa34] ss:$20 sps:$4 sm:$0xff]  }
  0xd9   :  { %6711 = vmatprep.subr.bf16.mxu0 %v10013_v15  ;;  %7270 = vmatprep.subr.bf16.mxu1 %v10016_v16  ;;  %v10196_v14 = vld [vmem:[%s11403_s0 + $0x24] ss:$100 sps:$4 sm:$0xff]  }
  0xda   :  { %v10104_v15 = vld [vmem:[#allocation2 + $0xa28] ss:$20 sps:$4 sm:$0xff]   ;;  %v10107_v16 = vld [vmem:[#allocation2 + $0xa30] ss:$20 sps:$4 sm:$0xff]  }
  0xdc   :  { %6712 = vmatpush1.bf16.msra.mxu0 %v10011_v17  ;;  %7271 = vmatpush1.bf16.msra.mxu1 %v10014_v18  ;;  %v10112_v17 = vld [vmem:[#allocation2 + $0xa54] ss:$20 sps:$4 sm:$0xff]   ;;  %v10115_v18 = vld [vmem:[#allocation2 + $0xa5c] ss:$20 sps:$4 sm:$0xff]  }
  0xdd   :  { %6713 = vmatprep.subr.bf16.mxu0 %v10019_v19  ;;  %7272 = vmatprep.subr.bf16.mxu1 %v10022_v20  ;;  %v10110_v19 = vld [vmem:[#allocation2 + $0xa50] ss:$20 sps:$4 sm:$0xff]   ;;  %v10113_v20 = vld [vmem:[#allocation2 + $0xa58] ss:$20 sps:$4 sm:$0xff]  }
  0xe0   :  { %6714 = vmatpush1.bf16.msra.mxu0 %v10017_v21  ;;  %7273 = vmatpush1.bf16.msra.mxu1 %v10020_v22  ;;  %v10118_v21 = vld [vmem:[#allocation2 + $0xa7c] ss:$20 sps:$4 sm:$0xff]   ;;  %v10121_v22 = vld [vmem:[#allocation2 + $0xa84] ss:$20 sps:$4 sm:$0xff]  }
  0xe1   :  { %6715 = vmatprep.subr.bf16.mxu0 %v10025_v23  ;;  %7274 = vmatprep.subr.bf16.mxu1 %v10028_v24  ;;  %v10116_v23 = vld [vmem:[#allocation2 + $0xa78] ss:$20 sps:$4 sm:$0xff]   ;;  %v10119_v24 = vld [vmem:[#allocation2 + $0xa80] ss:$20 sps:$4 sm:$0xff]  }
  0xe4   :  { %6716 = vmatpush1.bf16.msra.mxu0 %v10023_v25  ;;  %7275 = vmatpush1.bf16.msra.mxu1 %v10026_v26  ;;  %v10124_v25 = vld [vmem:[#allocation2 + $0xaa4] ss:$20 sps:$4 sm:$0xff]   ;;  %v10127_v26 = vld [vmem:[#allocation2 + $0xaac] ss:$20 sps:$4 sm:$0xff]  }
  0xe5   :  { %6717 = vmatprep.subr.bf16.mxu0 %v10031_v27  ;;  %7276 = vmatprep.subr.bf16.mxu1 %v10034_v28  ;;  %v10122_v27 = vld [vmem:[#allocation2 + $0xaa0] ss:$20 sps:$4 sm:$0xff]   ;;  %v10125_v28 = vld [vmem:[#allocation2 + $0xaa8] ss:$20 sps:$4 sm:$0xff]  }
  0xe8   :  { %6718 = vmatpush1.bf16.msra.mxu0 %v10029_v29  ;;  %7277 = vmatpush1.bf16.msra.mxu1 %v10032_v30  ;;  %v10130_v29 = vld [vmem:[#allocation2 + $0xacc] ss:$20 sps:$4 sm:$0xff]   ;;  %v10133_v30 = vld [vmem:[#allocation2 + $0xad4] ss:$20 sps:$4 sm:$0xff]  }
  0xe9   :  { %6719 = vmatprep.subr.bf16.mxu0 %v10037_v31  ;;  %7278 = vmatprep.subr.bf16.mxu1 %v10040_v32  ;;  %v10128_v31 = vld [vmem:[#allocation2 + $0xac8] ss:$20 sps:$4 sm:$0xff]   ;;  %v10131_v32 = vld [vmem:[#allocation2 + $0xad0] ss:$20 sps:$4 sm:$0xff]  }
  0xec   :  { %6720 = vmatpush1.bf16.msra.mxu0 %v10035_v33  ;;  %7279 = vmatpush1.bf16.msra.mxu1 %v10038_v34  ;;  %v10136_v33 = vld [vmem:[#allocation2 + $0xaf4] ss:$20 sps:$4 sm:$0xff]   ;;  %v10139_v34 = vld [vmem:[#allocation2 + $0xafc] ss:$20 sps:$4 sm:$0xff]  }
  0xed   :  { %6721 = vmatprep.subr.bf16.mxu0 %v10043_v35  ;;  %7280 = vmatprep.subr.bf16.mxu1 %v10046_v36  ;;  %v10134_v35 = vld [vmem:[#allocation2 + $0xaf0] ss:$20 sps:$4 sm:$0xff]   ;;  %v10137_v36 = vld [vmem:[#allocation2 + $0xaf8] ss:$20 sps:$4 sm:$0xff]  }
  0xf0   :  { %6722 = vmatpush1.bf16.msra.mxu0 %v10041_v37  ;;  %7281 = vmatpush1.bf16.msra.mxu1 %v10044_v38  ;;  %v10142_v37 = vld [vmem:[#allocation2 + $0xb1c] ss:$20 sps:$4 sm:$0xff]   ;;  %v10145_v38 = vld [vmem:[#allocation2 + $0xb24] ss:$20 sps:$4 sm:$0xff]  }
  0xf1   :  { %6723 = vmatprep.subr.bf16.mxu0 %v10049_v39  ;;  %7282 = vmatprep.subr.bf16.mxu1 %v10052_v40  ;;  %v10140_v39 = vld [vmem:[#allocation2 + $0xb18] ss:$20 sps:$4 sm:$0xff]   ;;  %v10143_v40 = vld [vmem:[#allocation2 + $0xb20] ss:$20 sps:$4 sm:$0xff]  }
  0xf4   :  { %6724 = vmatpush1.bf16.msra.mxu0 %v10047_v41  ;;  %7283 = vmatpush1.bf16.msra.mxu1 %v10050_v42  ;;  %v10148_v41 = vld [vmem:[#allocation2 + $0xb44] ss:$20 sps:$4 sm:$0xff]   ;;  %v10151_v42 = vld [vmem:[#allocation2 + $0xb4c] ss:$20 sps:$4 sm:$0xff]  }
  0xf5   :  { %6725 = vmatprep.subr.bf16.mxu0 %v10055_v43  ;;  %7284 = vmatprep.subr.bf16.mxu1 %v10058_v44  ;;  %v10146_v43 = vld [vmem:[#allocation2 + $0xb40] ss:$20 sps:$4 sm:$0xff]   ;;  %v10149_v44 = vld [vmem:[#allocation2 + $0xb48] ss:$20 sps:$4 sm:$0xff]  }
  0xf8   :  { %6726 = vmatpush1.bf16.msra.mxu0 %v10053_v45  ;;  %7285 = vmatpush1.bf16.msra.mxu1 %v10056_v46  ;;  %v10154_v45 = vld [vmem:[#allocation2 + $0xb6c] ss:$20 sps:$4 sm:$0xff]   ;;  %v10157_v46 = vld [vmem:[#allocation2 + $0xb74] ss:$20 sps:$4 sm:$0xff]  }
  0xf9   :  { %6727 = vmatprep.subr.bf16.mxu0 %v10061_v47  ;;  %7286 = vmatprep.subr.bf16.mxu1 %v10064_v48  ;;  %v10152_v47 = vld [vmem:[#allocation2 + $0xb68] ss:$20 sps:$4 sm:$0xff]   ;;  %v10155_v48 = vld [vmem:[#allocation2 + $0xb70] ss:$20 sps:$4 sm:$0xff]  }
  0xfc   :  { %6728 = vmatpush1.bf16.msra.mxu0 %v10059_v49  ;;  %7287 = vmatpush1.bf16.msra.mxu1 %v10062_v50  ;;  %v10160_v49 = vld [vmem:[#allocation2 + $0xb94] ss:$20 sps:$4 sm:$0xff]   ;;  %v10163_v50 = vld [vmem:[#allocation2 + $0xb9c] ss:$20 sps:$4 sm:$0xff]  }
  0xfd   :  { %6729 = vmatprep.subr.bf16.mxu0 %v10067_v51  ;;  %7288 = vmatprep.subr.bf16.mxu1 %v10070_v52  ;;  %v10158_v51 = vld [vmem:[#allocation2 + $0xb90] ss:$20 sps:$4 sm:$0xff]   ;;  %v10161_v52 = vld [vmem:[#allocation2 + $0xb98] ss:$20 sps:$4 sm:$0xff]  }
 0x100   :  { %6730 = vmatpush1.bf16.msra.mxu0 %v10065_v53  ;;  %7289 = vmatpush1.bf16.msra.mxu1 %v10068_v54  ;;  %v10166_v53 = vld [vmem:[#allocation2 + $0xbbc] ss:$20 sps:$4 sm:$0xff]   ;;  %v10169_v54 = vld [vmem:[#allocation2 + $0xbc4] ss:$20 sps:$4 sm:$0xff]  }
 0x101   :  { %6731 = vmatprep.subr.bf16.mxu0 %v10073_v55  ;;  %7290 = vmatprep.subr.bf16.mxu1 %v10076_v56  ;;  %v10164_v55 = vld [vmem:[#allocation2 + $0xbb8] ss:$20 sps:$4 sm:$0xff]   ;;  %v10167_v56 = vld [vmem:[#allocation2 + $0xbc0] ss:$20 sps:$4 sm:$0xff]  }
 0x104   :  { %6732 = vmatpush1.bf16.msra.mxu0 %v10071_v57  ;;  %7291 = vmatpush1.bf16.msra.mxu1 %v10074_v58  ;;  %v10172_v57 = vld [vmem:[#allocation2 + $0xbe4] ss:$20 sps:$4 sm:$0xff]   ;;  %v10175_v58 = vld [vmem:[#allocation2 + $0xbec] ss:$20 sps:$4 sm:$0xff]  }
 0x105   :  { %6733 = vmatprep.subr.bf16.mxu0 %v10079_v59  ;;  %7292 = vmatprep.subr.bf16.mxu1 %v10082_v60  ;;  %v10170_v59 = vld [vmem:[#allocation2 + $0xbe0] ss:$20 sps:$4 sm:$0xff]   ;;  %v10173_v60 = vld [vmem:[#allocation2 + $0xbe8] ss:$20 sps:$4 sm:$0xff]  }
 0x108   :  { %6734 = vmatpush1.bf16.msra.mxu0 %v10077_v61  ;;  %7293 = vmatpush1.bf16.msra.mxu1 %v10080_v62  ;;  %v10178_v61 = vld [vmem:[#allocation2 + $0xc0c] ss:$20 sps:$4 sm:$0xff]   ;;  %v10181_v62 = vld [vmem:[#allocation2 + $0xc14] ss:$20 sps:$4 sm:$0xff]  }
 0x109   :  { %6735 = vmatprep.subr.bf16.mxu0 %v10085_v63  ;;  %7294 = vmatprep.subr.bf16.mxu1 %v10088_v0  ;;  %v10176_v63 = vld [vmem:[#allocation2 + $0xc08] ss:$20 sps:$4 sm:$0xff]   ;;  %v10179_v0 = vld [vmem:[#allocation2 + $0xc10] ss:$20 sps:$4 sm:$0xff]  }
 0x10c   :  { %6736 = vmatpush1.bf16.msra.mxu0 %v10083_v1  ;;  %7295 = vmatpush1.bf16.msra.mxu1 %v10086_v2  ;;  %v10184_v1 = vld [vmem:[#allocation2 + $0xc34] ss:$20 sps:$4 sm:$0xff]   ;;  %v10187_v2 = vld [vmem:[#allocation2 + $0xc3c] ss:$20 sps:$4 sm:$0xff]  }
 0x10d   :  { %6737 = vmatprep.subr.bf16.mxu0 %v10091_v3  ;;  %7296 = vmatprep.subr.bf16.mxu1 %v10094_v4  ;;  %v10182_v3 = vld [vmem:[#allocation2 + $0xc30] ss:$20 sps:$4 sm:$0xff]   ;;  %v10185_v4 = vld [vmem:[#allocation2 + $0xc38] ss:$20 sps:$4 sm:$0xff]  }
 0x110   :  { %6738 = vmatpush1.bf16.msra.mxu0 %v10089_v5  ;;  %7297 = vmatpush1.bf16.msra.mxu1 %v10092_v6  ;;  %v10190_v5 = vld [vmem:[#allocation2 + $0xc5c] ss:$20 sps:$4 sm:$0xff]   ;;  %v10193_v6 = vld [vmem:[#allocation2 + $0xc64] ss:$20 sps:$4 sm:$0xff]  }
 0x111   :  { %6750 = vmatprep.subr.bf16.mxu0 %v10100_v7  ;;  %7309 = vmatprep.subr.bf16.mxu1 %v10103_v8  ;;  %v10188_v7 = vld [vmem:[#allocation2 + $0xc58] ss:$20 sps:$4 sm:$0xff]   ;;  %v10191_v8 = vld [vmem:[#allocation2 + $0xc60] ss:$20 sps:$4 sm:$0xff]  }
 0x113   :  { %6740 = vmatmul.mubr.bf16.vlgmr.msra.gmra.mrb[0].mxu0 %v10095_v9  ;;  %7299 = vmatmul.mubr.bf16.vlgmr.msra.gmra.mrb[0].mxu1 %v10095_v9  ;;  %v10194_v9 = vld [vmem:[%s11403_s0 + $0x20] ss:$100 sps:$4 sm:$0xff]  }
 0x114   :  { %6751 = vmatpush1.bf16.msra.mxu0 %v10098_v10  ;;  %7310 = vmatpush1.bf16.msra.mxu1 %v10101_v11  ;;  %v10199_v10 = vld [vmem:[#allocation2 + $0xc84] ss:$20 sps:$4 sm:$0xff]   ;;  %v10202_v11 = vld [vmem:[#allocation2 + $0xc8c] ss:$20 sps:$4 sm:$0xff]  }
 0x115   :  { %6752 = vmatprep.subr.bf16.mxu0 %v10106_v12  ;;  %7311 = vmatprep.subr.bf16.mxu1 %v10109_v13  ;;  %v10197_v12 = vld [vmem:[#allocation2 + $0xc80] ss:$20 sps:$4 sm:$0xff]   ;;  %v10200_v13 = vld [vmem:[#allocation2 + $0xc88] ss:$20 sps:$4 sm:$0xff]  }
 0x116   :  { %6782 = vmatprep.mubr.bf16.mxu0 %v10196_v14  ;;  %7341 = vmatprep.mubr.bf16.mxu1 %v10196_v14  ;;  %v10205_v14 = vld [vmem:[#allocation2 + $0xcac] ss:$20 sps:$4 sm:$0xff]  }
 0x118   :  { %6753 = vmatpush1.bf16.msra.mxu0 %v10104_v15  ;;  %7312 = vmatpush1.bf16.msra.mxu1 %v10107_v16  ;;  %v10208_v15 = vld [vmem:[#allocation2 + $0xcb4] ss:$20 sps:$4 sm:$0xff]   ;;  %v10295_v16 = vld [vmem:[%s11403_s0 + $0x2c] ss:$100 sps:$4 sm:$0xff]  }
 0x119   :  { %6754 = vmatprep.subr.bf16.mxu0 %v10112_v17  ;;  %7313 = vmatprep.subr.bf16.mxu1 %v10115_v18  ;;  %v10203_v17 = vld [vmem:[#allocation2 + $0xca8] ss:$20 sps:$4 sm:$0xff]   ;;  %v10206_v18 = vld [vmem:[#allocation2 + $0xcb0] ss:$20 sps:$4 sm:$0xff]  }
 0x11c   :  { %6755 = vmatpush1.bf16.msra.mxu0 %v10110_v19  ;;  %7314 = vmatpush1.bf16.msra.mxu1 %v10113_v20  ;;  %v10211_v19 = vld [vmem:[#allocation2 + $0xcd4] ss:$20 sps:$4 sm:$0xff]   ;;  %v10214_v20 = vld [vmem:[#allocation2 + $0xcdc] ss:$20 sps:$4 sm:$0xff]  }
 0x11d   :  { %6756 = vmatprep.subr.bf16.mxu0 %v10118_v21  ;;  %7315 = vmatprep.subr.bf16.mxu1 %v10121_v22  ;;  %v10209_v21 = vld [vmem:[#allocation2 + $0xcd0] ss:$20 sps:$4 sm:$0xff]   ;;  %v10212_v22 = vld [vmem:[#allocation2 + $0xcd8] ss:$20 sps:$4 sm:$0xff]  }
 0x120   :  { %6757 = vmatpush1.bf16.msra.mxu0 %v10116_v23  ;;  %7316 = vmatpush1.bf16.msra.mxu1 %v10119_v24  ;;  %v10217_v23 = vld [vmem:[#allocation2 + $0xcfc] ss:$20 sps:$4 sm:$0xff]   ;;  %v10220_v24 = vld [vmem:[#allocation2 + $0xd04] ss:$20 sps:$4 sm:$0xff]  }
 0x121   :  { %6758 = vmatprep.subr.bf16.mxu0 %v10124_v25  ;;  %7317 = vmatprep.subr.bf16.mxu1 %v10127_v26  ;;  %v10215_v25 = vld [vmem:[#allocation2 + $0xcf8] ss:$20 sps:$4 sm:$0xff]   ;;  %v10218_v26 = vld [vmem:[#allocation2 + $0xd00] ss:$20 sps:$4 sm:$0xff]  }
 0x124   :  { %6759 = vmatpush1.bf16.msra.mxu0 %v10122_v27  ;;  %7318 = vmatpush1.bf16.msra.mxu1 %v10125_v28  ;;  %v10223_v27 = vld [vmem:[#allocation2 + $0xd24] ss:$20 sps:$4 sm:$0xff]   ;;  %v10226_v28 = vld [vmem:[#allocation2 + $0xd2c] ss:$20 sps:$4 sm:$0xff]  }
 0x125   :  { %6760 = vmatprep.subr.bf16.mxu0 %v10130_v29  ;;  %7319 = vmatprep.subr.bf16.mxu1 %v10133_v30  ;;  %v10221_v29 = vld [vmem:[#allocation2 + $0xd20] ss:$20 sps:$4 sm:$0xff]   ;;  %v10224_v30 = vld [vmem:[#allocation2 + $0xd28] ss:$20 sps:$4 sm:$0xff]  }
 0x128   :  { %6761 = vmatpush1.bf16.msra.mxu0 %v10128_v31  ;;  %7320 = vmatpush1.bf16.msra.mxu1 %v10131_v32  ;;  %v10229_v31 = vld [vmem:[#allocation2 + $0xd4c] ss:$20 sps:$4 sm:$0xff]   ;;  %v10232_v32 = vld [vmem:[#allocation2 + $0xd54] ss:$20 sps:$4 sm:$0xff]  }
 0x129   :  { %6762 = vmatprep.subr.bf16.mxu0 %v10136_v33  ;;  %7321 = vmatprep.subr.bf16.mxu1 %v10139_v34  ;;  %v10227_v33 = vld [vmem:[#allocation2 + $0xd48] ss:$20 sps:$4 sm:$0xff]   ;;  %v10230_v34 = vld [vmem:[#allocation2 + $0xd50] ss:$20 sps:$4 sm:$0xff]  }
 0x12c   :  { %6763 = vmatpush1.bf16.msra.mxu0 %v10134_v35  ;;  %7322 = vmatpush1.bf16.msra.mxu1 %v10137_v36  ;;  %v10235_v35 = vld [vmem:[#allocation2 + $0xd74] ss:$20 sps:$4 sm:$0xff]   ;;  %v10238_v36 = vld [vmem:[#allocation2 + $0xd7c] ss:$20 sps:$4 sm:$0xff]  }
 0x12d   :  { %6764 = vmatprep.subr.bf16.mxu0 %v10142_v37  ;;  %7323 = vmatprep.subr.bf16.mxu1 %v10145_v38  ;;  %v10233_v37 = vld [vmem:[#allocation2 + $0xd70] ss:$20 sps:$4 sm:$0xff]   ;;  %v10236_v38 = vld [vmem:[#allocation2 + $0xd78] ss:$20 sps:$4 sm:$0xff]  }
 0x130   :  { %6765 = vmatpush1.bf16.msra.mxu0 %v10140_v39  ;;  %7324 = vmatpush1.bf16.msra.mxu1 %v10143_v40  ;;  %v10241_v39 = vld [vmem:[#allocation2 + $0xd9c] ss:$20 sps:$4 sm:$0xff]   ;;  %v10244_v40 = vld [vmem:[#allocation2 + $0xda4] ss:$20 sps:$4 sm:$0xff]  }
 0x131   :  { %6766 = vmatprep.subr.bf16.mxu0 %v10148_v41  ;;  %7325 = vmatprep.subr.bf16.mxu1 %v10151_v42  ;;  %v10239_v41 = vld [vmem:[#allocation2 + $0xd98] ss:$20 sps:$4 sm:$0xff]   ;;  %v10242_v42 = vld [vmem:[#allocation2 + $0xda0] ss:$20 sps:$4 sm:$0xff]  }
 0x134   :  { %6767 = vmatpush1.bf16.msra.mxu0 %v10146_v43  ;;  %7326 = vmatpush1.bf16.msra.mxu1 %v10149_v44  ;;  %v10247_v43 = vld [vmem:[#allocation2 + $0xdc4] ss:$20 sps:$4 sm:$0xff]   ;;  %v10250_v44 = vld [vmem:[#allocation2 + $0xdcc] ss:$20 sps:$4 sm:$0xff]  }
 0x135   :  { %6768 = vmatprep.subr.bf16.mxu0 %v10154_v45  ;;  %7327 = vmatprep.subr.bf16.mxu1 %v10157_v46  ;;  %v10245_v45 = vld [vmem:[#allocation2 + $0xdc0] ss:$20 sps:$4 sm:$0xff]   ;;  %v10248_v46 = vld [vmem:[#allocation2 + $0xdc8] ss:$20 sps:$4 sm:$0xff]  }
 0x138   :  { %6769 = vmatpush1.bf16.msra.mxu0 %v10152_v47  ;;  %7328 = vmatpush1.bf16.msra.mxu1 %v10155_v48  ;;  %v10253_v47 = vld [vmem:[#allocation2 + $0xdec] ss:$20 sps:$4 sm:$0xff]   ;;  %v10256_v48 = vld [vmem:[#allocation2 + $0xdf4] ss:$20 sps:$4 sm:$0xff]  }
 0x139   :  { %6770 = vmatprep.subr.bf16.mxu0 %v10160_v49  ;;  %7329 = vmatprep.subr.bf16.mxu1 %v10163_v50  ;;  %v10251_v49 = vld [vmem:[#allocation2 + $0xde8] ss:$20 sps:$4 sm:$0xff]   ;;  %v10254_v50 = vld [vmem:[#allocation2 + $0xdf0] ss:$20 sps:$4 sm:$0xff]  }
 0x13c   :  { %6771 = vmatpush1.bf16.msra.mxu0 %v10158_v51  ;;  %7330 = vmatpush1.bf16.msra.mxu1 %v10161_v52  ;;  %v10259_v51 = vld [vmem:[#allocation2 + $0xe14] ss:$20 sps:$4 sm:$0xff]   ;;  %v10262_v52 = vld [vmem:[#allocation2 + $0xe1c] ss:$20 sps:$4 sm:$0xff]  }
 0x13d   :  { %6772 = vmatprep.subr.bf16.mxu0 %v10166_v53  ;;  %7331 = vmatprep.subr.bf16.mxu1 %v10169_v54  ;;  %v10257_v53 = vld [vmem:[#allocation2 + $0xe10] ss:$20 sps:$4 sm:$0xff]   ;;  %v10260_v54 = vld [vmem:[#allocation2 + $0xe18] ss:$20 sps:$4 sm:$0xff]  }
 0x140   :  { %6773 = vmatpush1.bf16.msra.mxu0 %v10164_v55  ;;  %7332 = vmatpush1.bf16.msra.mxu1 %v10167_v56  ;;  %v10265_v55 = vld [vmem:[#allocation2 + $0xe3c] ss:$20 sps:$4 sm:$0xff]   ;;  %v10268_v56 = vld [vmem:[#allocation2 + $0xe44] ss:$20 sps:$4 sm:$0xff]  }
 0x141   :  { %6774 = vmatprep.subr.bf16.mxu0 %v10172_v57  ;;  %7333 = vmatprep.subr.bf16.mxu1 %v10175_v58  ;;  %v10263_v57 = vld [vmem:[#allocation2 + $0xe38] ss:$20 sps:$4 sm:$0xff]   ;;  %v10266_v58 = vld [vmem:[#allocation2 + $0xe40] ss:$20 sps:$4 sm:$0xff]  }
 0x144   :  { %6775 = vmatpush1.bf16.msra.mxu0 %v10170_v59  ;;  %7334 = vmatpush1.bf16.msra.mxu1 %v10173_v60  ;;  %v10271_v59 = vld [vmem:[#allocation2 + $0xe64] ss:$20 sps:$4 sm:$0xff]   ;;  %v10274_v60 = vld [vmem:[#allocation2 + $0xe6c] ss:$20 sps:$4 sm:$0xff]  }
 0x145   :  { %6776 = vmatprep.subr.bf16.mxu0 %v10178_v61  ;;  %7335 = vmatprep.subr.bf16.mxu1 %v10181_v62  ;;  %v10269_v61 = vld [vmem:[#allocation2 + $0xe60] ss:$20 sps:$4 sm:$0xff]   ;;  %v10272_v62 = vld [vmem:[#allocation2 + $0xe68] ss:$20 sps:$4 sm:$0xff]  }
 0x148   :  { %6777 = vmatpush1.bf16.msra.mxu0 %v10176_v63  ;;  %7336 = vmatpush1.bf16.msra.mxu1 %v10179_v0  ;;  %v10277_v63 = vld [vmem:[#allocation2 + $0xe8c] ss:$20 sps:$4 sm:$0xff]   ;;  %v10280_v0 = vld [vmem:[#allocation2 + $0xe94] ss:$20 sps:$4 sm:$0xff]  }
 0x149   :  { %6778 = vmatprep.subr.bf16.mxu0 %v10184_v1  ;;  %7337 = vmatprep.subr.bf16.mxu1 %v10187_v2  ;;  %v10275_v1 = vld [vmem:[#allocation2 + $0xe88] ss:$20 sps:$4 sm:$0xff]   ;;  %v10278_v2 = vld [vmem:[#allocation2 + $0xe90] ss:$20 sps:$4 sm:$0xff]  }
 0x14c   :  { %6779 = vmatpush1.bf16.msra.mxu0 %v10182_v3  ;;  %7338 = vmatpush1.bf16.msra.mxu1 %v10185_v4  ;;  %v10283_v3 = vld [vmem:[#allocation2 + $0xeb4] ss:$20 sps:$4 sm:$0xff]   ;;  %v10286_v4 = vld [vmem:[#allocation2 + $0xebc] ss:$20 sps:$4 sm:$0xff]  }
 0x14d   :  { %6780 = vmatprep.subr.bf16.mxu0 %v10190_v5  ;;  %7339 = vmatprep.subr.bf16.mxu1 %v10193_v6  ;;  %v10281_v5 = vld [vmem:[#allocation2 + $0xeb0] ss:$20 sps:$4 sm:$0xff]   ;;  %v10284_v6 = vld [vmem:[#allocation2 + $0xeb8] ss:$20 sps:$4 sm:$0xff]  }
 0x150   :  { %6781 = vmatpush1.bf16.msra.mxu0 %v10188_v7  ;;  %7340 = vmatpush1.bf16.msra.mxu1 %v10191_v8  ;;  %v10289_v7 = vld [vmem:[#allocation2 + $0xedc] ss:$20 sps:$4 sm:$0xff]   ;;  %v10292_v8 = vld [vmem:[#allocation2 + $0xee4] ss:$20 sps:$4 sm:$0xff]  }
 0x151   :  { %6793 = vmatprep.subr.bf16.mxu0 %v10199_v10  ;;  %7352 = vmatprep.subr.bf16.mxu1 %v10202_v11  ;;  %v10290_v10 = vld [vmem:[#allocation2 + $0xee0] ss:$20 sps:$4 sm:$0xff]   ;;  %v10293_v11 = vld [vmem:[%s11403_s0 + $0x28] ss:$100 sps:$4 sm:$0xff]  }
 0x153   :  { %6783 = vmatmul.mubr.bf16.vlgmr.msra.gmra.mrb[0].mxu0 %v10194_v9  ;;  %7342 = vmatmul.mubr.bf16.vlgmr.msra.gmra.mrb[0].mxu1 %v10194_v9  ;;  %v10287_v9 = vld [vmem:[#allocation2 + $0xed8] ss:$20 sps:$4 sm:$0xff]  }
 0x154   :  { %6794 = vmatpush1.bf16.msra.mxu0 %v10197_v12  ;;  %7353 = vmatpush1.bf16.msra.mxu1 %v10200_v13  ;;  %v10298_v12 = vld [vmem:[#allocation2 + $0xf04] ss:$20 sps:$4 sm:$0xff]   ;;  %v10301_v13 = vld [vmem:[#allocation2 + $0xf0c] ss:$20 sps:$4 sm:$0xff]  }
 0x155   :  { %6795 = vmatprep.subr.bf16.mxu0 %v10205_v14  ;;  %7354 = vmatprep.subr.bf16.mxu1 %v10208_v15  ;;  %v10296_v14 = vld [vmem:[#allocation2 + $0xf00] ss:$20 sps:$4 sm:$0xff]   ;;  %v10299_v15 = vld [vmem:[#allocation2 + $0xf08] ss:$20 sps:$4 sm:$0xff]  }
 0x156   :  { %6825 = vmatprep.mubr.bf16.mxu0 %v10295_v16  ;;  %7384 = vmatprep.mubr.bf16.mxu1 %v10295_v16  ;;  %v10304_v16 = vld [vmem:[#allocation2 + $0xf2c] ss:$20 sps:$4 sm:$0xff]  }
 0x158   :  { %6796 = vmatpush1.bf16.msra.mxu0 %v10203_v17  ;;  %7355 = vmatpush1.bf16.msra.mxu1 %v10206_v18  ;;  %v10307_v17 = vld [vmem:[#allocation2 + $0xf34] ss:$20 sps:$4 sm:$0xff]  }
 0x159   :  { %6797 = vmatprep.subr.bf16.mxu0 %v10211_v19  ;;  %7356 = vmatprep.subr.bf16.mxu1 %v10214_v20  ;;  %v10394_v18 = vld [vmem:[%s11403_s0 + $0x34] ss:$100 sps:$4 sm:$0xff]   ;;  %v10302_v19 = vld [vmem:[#allocation2 + $0xf28] ss:$20 sps:$4 sm:$0xff]   ;;  %v10305_v20 = vld [vmem:[#allocation2 + $0xf30] ss:$20 sps:$4 sm:$0xff]  }
 0x15c   :  { %6798 = vmatpush1.bf16.msra.mxu0 %v10209_v21  ;;  %7357 = vmatpush1.bf16.msra.mxu1 %v10212_v22  ;;  %v10310_v21 = vld [vmem:[#allocation2 + $0xf54] ss:$20 sps:$4 sm:$0xff]   ;;  %v10313_v22 = vld [vmem:[#allocation2 + $0xf5c] ss:$20 sps:$4 sm:$0xff]  }
 0x15d   :  { %6799 = vmatprep.subr.bf16.mxu0 %v10217_v23  ;;  %7358 = vmatprep.subr.bf16.mxu1 %v10220_v24  ;;  %v10308_v23 = vld [vmem:[#allocation2 + $0xf50] ss:$20 sps:$4 sm:$0xff]   ;;  %v10311_v24 = vld [vmem:[#allocation2 + $0xf58] ss:$20 sps:$4 sm:$0xff]  }
 0x160   :  { %6800 = vmatpush1.bf16.msra.mxu0 %v10215_v25  ;;  %7359 = vmatpush1.bf16.msra.mxu1 %v10218_v26  ;;  %v10316_v25 = vld [vmem:[#allocation2 + $0xf7c] ss:$20 sps:$4 sm:$0xff]   ;;  %v10319_v26 = vld [vmem:[#allocation2 + $0xf84] ss:$20 sps:$4 sm:$0xff]  }
 0x161   :  { %6801 = vmatprep.subr.bf16.mxu0 %v10223_v27  ;;  %7360 = vmatprep.subr.bf16.mxu1 %v10226_v28  ;;  %v10314_v27 = vld [vmem:[#allocation2 + $0xf78] ss:$20 sps:$4 sm:$0xff]   ;;  %v10317_v28 = vld [vmem:[#allocation2 + $0xf80] ss:$20 sps:$4 sm:$0xff]  }
 0x164   :  { %6802 = vmatpush1.bf16.msra.mxu0 %v10221_v29  ;;  %7361 = vmatpush1.bf16.msra.mxu1 %v10224_v30  ;;  %v10322_v29 = vld [vmem:[#allocation2 + $0xfa4] ss:$20 sps:$4 sm:$0xff]   ;;  %v10325_v30 = vld [vmem:[#allocation2 + $0xfac] ss:$20 sps:$4 sm:$0xff]  }
 0x165   :  { %6803 = vmatprep.subr.bf16.mxu0 %v10229_v31  ;;  %7362 = vmatprep.subr.bf16.mxu1 %v10232_v32  ;;  %v10320_v31 = vld [vmem:[#allocation2 + $0xfa0] ss:$20 sps:$4 sm:$0xff]   ;;  %v10323_v32 = vld [vmem:[#allocation2 + $0xfa8] ss:$20 sps:$4 sm:$0xff]  }
 0x168   :  { %6804 = vmatpush1.bf16.msra.mxu0 %v10227_v33  ;;  %7363 = vmatpush1.bf16.msra.mxu1 %v10230_v34  ;;  %v10328_v33 = vld [vmem:[#allocation2 + $0xfcc] ss:$20 sps:$4 sm:$0xff]   ;;  %v10331_v34 = vld [vmem:[#allocation2 + $0xfd4] ss:$20 sps:$4 sm:$0xff]  }
 0x169   :  { %6805 = vmatprep.subr.bf16.mxu0 %v10235_v35  ;;  %7364 = vmatprep.subr.bf16.mxu1 %v10238_v36  ;;  %v10326_v35 = vld [vmem:[#allocation2 + $0xfc8] ss:$20 sps:$4 sm:$0xff]   ;;  %v10329_v36 = vld [vmem:[#allocation2 + $0xfd0] ss:$20 sps:$4 sm:$0xff]  }
 0x16c   :  { %6806 = vmatpush1.bf16.msra.mxu0 %v10233_v37  ;;  %7365 = vmatpush1.bf16.msra.mxu1 %v10236_v38  ;;  %v10334_v37 = vld [vmem:[#allocation2 + $0xff4] ss:$20 sps:$4 sm:$0xff]   ;;  %v10337_v38 = vld [vmem:[#allocation2 + $0xffc] ss:$20 sps:$4 sm:$0xff]  }
 0x16d   :  { %6807 = vmatprep.subr.bf16.mxu0 %v10241_v39  ;;  %7366 = vmatprep.subr.bf16.mxu1 %v10244_v40  ;;  %v10332_v39 = vld [vmem:[#allocation2 + $0xff0] ss:$20 sps:$4 sm:$0xff]   ;;  %v10335_v40 = vld [vmem:[#allocation2 + $0xff8] ss:$20 sps:$4 sm:$0xff]  }
 0x170   :  { %6808 = vmatpush1.bf16.msra.mxu0 %v10239_v41  ;;  %7367 = vmatpush1.bf16.msra.mxu1 %v10242_v42  ;;  %v10340_v41 = vld [vmem:[#allocation2 + $0x101c] ss:$20 sps:$4 sm:$0xff]   ;;  %v10343_v42 = vld [vmem:[#allocation2 + $0x1024] ss:$20 sps:$4 sm:$0xff]  }
 0x171   :  { %6809 = vmatprep.subr.bf16.mxu0 %v10247_v43  ;;  %7368 = vmatprep.subr.bf16.mxu1 %v10250_v44  ;;  %v10338_v43 = vld [vmem:[#allocation2 + $0x1018] ss:$20 sps:$4 sm:$0xff]   ;;  %v10341_v44 = vld [vmem:[#allocation2 + $0x1020] ss:$20 sps:$4 sm:$0xff]  }
 0x174   :  { %6810 = vmatpush1.bf16.msra.mxu0 %v10245_v45  ;;  %7369 = vmatpush1.bf16.msra.mxu1 %v10248_v46  ;;  %v10346_v45 = vld [vmem:[#allocation2 + $0x1044] ss:$20 sps:$4 sm:$0xff]   ;;  %v10349_v46 = vld [vmem:[#allocation2 + $0x104c] ss:$20 sps:$4 sm:$0xff]  }
 0x175   :  { %6811 = vmatprep.subr.bf16.mxu0 %v10253_v47  ;;  %7370 = vmatprep.subr.bf16.mxu1 %v10256_v48  ;;  %v10344_v47 = vld [vmem:[#allocation2 + $0x1040] ss:$20 sps:$4 sm:$0xff]   ;;  %v10347_v48 = vld [vmem:[#allocation2 + $0x1048] ss:$20 sps:$4 sm:$0xff]  }
 0x178   :  { %6812 = vmatpush1.bf16.msra.mxu0 %v10251_v49  ;;  %7371 = vmatpush1.bf16.msra.mxu1 %v10254_v50  ;;  %v10352_v49 = vld [vmem:[#allocation2 + $0x106c] ss:$20 sps:$4 sm:$0xff]   ;;  %v10355_v50 = vld [vmem:[#allocation2 + $0x1074] ss:$20 sps:$4 sm:$0xff]  }
 0x179   :  { %6813 = vmatprep.subr.bf16.mxu0 %v10259_v51  ;;  %7372 = vmatprep.subr.bf16.mxu1 %v10262_v52  ;;  %v10350_v51 = vld [vmem:[#allocation2 + $0x1068] ss:$20 sps:$4 sm:$0xff]   ;;  %v10353_v52 = vld [vmem:[#allocation2 + $0x1070] ss:$20 sps:$4 sm:$0xff]  }
 0x17c   :  { %6814 = vmatpush1.bf16.msra.mxu0 %v10257_v53  ;;  %7373 = vmatpush1.bf16.msra.mxu1 %v10260_v54  ;;  %v10358_v53 = vld [vmem:[#allocation2 + $0x1094] ss:$20 sps:$4 sm:$0xff]   ;;  %v10361_v54 = vld [vmem:[#allocation2 + $0x109c] ss:$20 sps:$4 sm:$0xff]  }
 0x17d   :  { %6815 = vmatprep.subr.bf16.mxu0 %v10265_v55  ;;  %7374 = vmatprep.subr.bf16.mxu1 %v10268_v56  ;;  %v10356_v55 = vld [vmem:[#allocation2 + $0x1090] ss:$20 sps:$4 sm:$0xff]   ;;  %v10359_v56 = vld [vmem:[#allocation2 + $0x1098] ss:$20 sps:$4 sm:$0xff]  }
 0x180   :  { %6816 = vmatpush1.bf16.msra.mxu0 %v10263_v57  ;;  %7375 = vmatpush1.bf16.msra.mxu1 %v10266_v58  ;;  %v10364_v57 = vld [vmem:[#allocation2 + $0x10bc] ss:$20 sps:$4 sm:$0xff]   ;;  %v10367_v58 = vld [vmem:[#allocation2 + $0x10c4] ss:$20 sps:$4 sm:$0xff]  }
 0x181   :  { %6817 = vmatprep.subr.bf16.mxu0 %v10271_v59  ;;  %7376 = vmatprep.subr.bf16.mxu1 %v10274_v60  ;;  %v10362_v59 = vld [vmem:[#allocation2 + $0x10b8] ss:$20 sps:$4 sm:$0xff]   ;;  %v10365_v60 = vld [vmem:[#allocation2 + $0x10c0] ss:$20 sps:$4 sm:$0xff]  }
 0x184   :  { %6818 = vmatpush1.bf16.msra.mxu0 %v10269_v61  ;;  %7377 = vmatpush1.bf16.msra.mxu1 %v10272_v62  ;;  %v10370_v61 = vld [vmem:[#allocation2 + $0x10e4] ss:$20 sps:$4 sm:$0xff]   ;;  %v10373_v62 = vld [vmem:[#allocation2 + $0x10ec] ss:$20 sps:$4 sm:$0xff]  }
 0x185   :  { %6819 = vmatprep.subr.bf16.mxu0 %v10277_v63  ;;  %7378 = vmatprep.subr.bf16.mxu1 %v10280_v0  ;;  %v10368_v63 = vld [vmem:[#allocation2 + $0x10e0] ss:$20 sps:$4 sm:$0xff]   ;;  %v10371_v0 = vld [vmem:[#allocation2 + $0x10e8] ss:$20 sps:$4 sm:$0xff]  }
 0x188   :  { %6820 = vmatpush1.bf16.msra.mxu0 %v10275_v1  ;;  %7379 = vmatpush1.bf16.msra.mxu1 %v10278_v2  ;;  %v10376_v1 = vld [vmem:[#allocation2 + $0x110c] ss:$20 sps:$4 sm:$0xff]   ;;  %v10379_v2 = vld [vmem:[#allocation2 + $0x1114] ss:$20 sps:$4 sm:$0xff]  }
 0x189   :  { %6821 = vmatprep.subr.bf16.mxu0 %v10283_v3  ;;  %7380 = vmatprep.subr.bf16.mxu1 %v10286_v4  ;;  %v10374_v3 = vld [vmem:[#allocation2 + $0x1108] ss:$20 sps:$4 sm:$0xff]   ;;  %v10377_v4 = vld [vmem:[#allocation2 + $0x1110] ss:$20 sps:$4 sm:$0xff]  }
 0x18c   :  { %6822 = vmatpush1.bf16.msra.mxu0 %v10281_v5  ;;  %7381 = vmatpush1.bf16.msra.mxu1 %v10284_v6  ;;  %v10382_v5 = vld [vmem:[#allocation2 + $0x1134] ss:$20 sps:$4 sm:$0xff]   ;;  %v10385_v6 = vld [vmem:[#allocation2 + $0x113c] ss:$20 sps:$4 sm:$0xff]  }
 0x18d   :  { %6823 = vmatprep.subr.bf16.mxu0 %v10289_v7  ;;  %7382 = vmatprep.subr.bf16.mxu1 %v10292_v8  ;;  %v10380_v7 = vld [vmem:[#allocation2 + $0x1130] ss:$20 sps:$4 sm:$0xff]   ;;  %v10383_v8 = vld [vmem:[#allocation2 + $0x1138] ss:$20 sps:$4 sm:$0xff]  }
 0x190   :  { %6824 = vmatpush1.bf16.msra.mxu0 %v10287_v9  ;;  %7383 = vmatpush1.bf16.msra.mxu1 %v10290_v10  ;;  %v10388_v9 = vld [vmem:[#allocation2 + $0x115c] ss:$20 sps:$4 sm:$0xff]   ;;  %v10391_v10 = vld [vmem:[#allocation2 + $0x1164] ss:$20 sps:$4 sm:$0xff]  }
 0x191   :  { %6836 = vmatprep.subr.bf16.mxu0 %v10298_v12  ;;  %7395 = vmatprep.subr.bf16.mxu1 %v10301_v13  ;;  %v10389_v12 = vld [vmem:[#allocation2 + $0x1160] ss:$20 sps:$4 sm:$0xff]  }
 0x192   :  { %v10392_v13 = vld [vmem:[%s11403_s0 + $0x30] ss:$100 sps:$4 sm:$0xff]  }
 0x193   :  { %6826 = vmatmul.mubr.bf16.vlgmr.msra.gmra.mrb[0].mxu0 %v10293_v11  ;;  %7385 = vmatmul.mubr.bf16.vlgmr.msra.gmra.mrb[0].mxu1 %v10293_v11  ;;  %v10386_v11 = vld [vmem:[#allocation2 + $0x1158] ss:$20 sps:$4 sm:$0xff]  }
 0x194   :  { %6837 = vmatpush1.bf16.msra.mxu0 %v10296_v14  ;;  %7396 = vmatpush1.bf16.msra.mxu1 %v10299_v15  ;;  %v10397_v14 = vld [vmem:[#allocation2 + $0x1184] ss:$20 sps:$4 sm:$0xff]   ;;  %v10400_v15 = vld [vmem:[#allocation2 + $0x118c] ss:$20 sps:$4 sm:$0xff]  }
 0x195   :  { %6838 = vmatprep.subr.bf16.mxu0 %v10304_v16  ;;  %7397 = vmatprep.subr.bf16.mxu1 %v10307_v17  ;;  %v10395_v16 = vld [vmem:[#allocation2 + $0x1180] ss:$20 sps:$4 sm:$0xff]   ;;  %v10398_v17 = vld [vmem:[#allocation2 + $0x1188] ss:$20 sps:$4 sm:$0xff]  }
 0x196   :  { %6868 = vmatprep.mubr.bf16.mxu0 %v10394_v18  ;;  %7427 = vmatprep.mubr.bf16.mxu1 %v10394_v18  ;;  %v10403_v18 = vld [vmem:[#allocation2 + $0x11ac] ss:$20 sps:$4 sm:$0xff]  }
 0x198   :  { %6839 = vmatpush1.bf16.msra.mxu0 %v10302_v19  ;;  %7398 = vmatpush1.bf16.msra.mxu1 %v10305_v20  ;;  %v10406_v19 = vld [vmem:[#allocation2 + $0x11b4] ss:$20 sps:$4 sm:$0xff]   ;;  %v10493_v20 = vld [vmem:[%s11403_s0 + $0x3c] ss:$100 sps:$4 sm:$0xff]  }
 0x199   :  { %6840 = vmatprep.subr.bf16.mxu0 %v10310_v21  ;;  %7399 = vmatprep.subr.bf16.mxu1 %v10313_v22  ;;  %v10401_v21 = vld [vmem:[#allocation2 + $0x11a8] ss:$20 sps:$4 sm:$0xff]   ;;  %v10404_v22 = vld [vmem:[#allocation2 + $0x11b0] ss:$20 sps:$4 sm:$0xff]  }
 0x19c   :  { %6841 = vmatpush1.bf16.msra.mxu0 %v10308_v23  ;;  %7400 = vmatpush1.bf16.msra.mxu1 %v10311_v24  ;;  %v10409_v23 = vld [vmem:[#allocation2 + $0x11d4] ss:$20 sps:$4 sm:$0xff]   ;;  %v10412_v24 = vld [vmem:[#allocation2 + $0x11dc] ss:$20 sps:$4 sm:$0xff]  }
 0x19d   :  { %6842 = vmatprep.subr.bf16.mxu0 %v10316_v25  ;;  %7401 = vmatprep.subr.bf16.mxu1 %v10319_v26  ;;  %v10407_v25 = vld [vmem:[#allocation2 + $0x11d0] ss:$20 sps:$4 sm:$0xff]   ;;  %v10410_v26 = vld [vmem:[#allocation2 + $0x11d8] ss:$20 sps:$4 sm:$0xff]  }
 0x1a0   :  { %6843 = vmatpush1.bf16.msra.mxu0 %v10314_v27  ;;  %7402 = vmatpush1.bf16.msra.mxu1 %v10317_v28  ;;  %v10415_v27 = vld [vmem:[#allocation2 + $0x11fc] ss:$20 sps:$4 sm:$0xff]   ;;  %v10418_v28 = vld [vmem:[#allocation2 + $0x1204] ss:$20 sps:$4 sm:$0xff]  }
 0x1a1   :  { %6844 = vmatprep.subr.bf16.mxu0 %v10322_v29  ;;  %7403 = vmatprep.subr.bf16.mxu1 %v10325_v30  ;;  %v10413_v29 = vld [vmem:[#allocation2 + $0x11f8] ss:$20 sps:$4 sm:$0xff]   ;;  %v10416_v30 = vld [vmem:[#allocation2 + $0x1200] ss:$20 sps:$4 sm:$0xff]  }
 0x1a4   :  { %6845 = vmatpush1.bf16.msra.mxu0 %v10320_v31  ;;  %7404 = vmatpush1.bf16.msra.mxu1 %v10323_v32  ;;  %v10421_v31 = vld [vmem:[#allocation2 + $0x1224] ss:$20 sps:$4 sm:$0xff]   ;;  %v10424_v32 = vld [vmem:[#allocation2 + $0x122c] ss:$20 sps:$4 sm:$0xff]  }
 0x1a5   :  { %6846 = vmatprep.subr.bf16.mxu0 %v10328_v33  ;;  %7405 = vmatprep.subr.bf16.mxu1 %v10331_v34  ;;  %v10419_v33 = vld [vmem:[#allocation2 + $0x1220] ss:$20 sps:$4 sm:$0xff]   ;;  %v10422_v34 = vld [vmem:[#allocation2 + $0x1228] ss:$20 sps:$4 sm:$0xff]  }
 0x1a8   :  { %6847 = vmatpush1.bf16.msra.mxu0 %v10326_v35  ;;  %7406 = vmatpush1.bf16.msra.mxu1 %v10329_v36  ;;  %v10427_v35 = vld [vmem:[#allocation2 + $0x124c] ss:$20 sps:$4 sm:$0xff]   ;;  %v10430_v36 = vld [vmem:[#allocation2 + $0x1254] ss:$20 sps:$4 sm:$0xff]  }
 0x1a9   :  { %6848 = vmatprep.subr.bf16.mxu0 %v10334_v37  ;;  %7407 = vmatprep.subr.bf16.mxu1 %v10337_v38  ;;  %v10425_v37 = vld [vmem:[#allocation2 + $0x1248] ss:$20 sps:$4 sm:$0xff]   ;;  %v10428_v38 = vld [vmem:[#allocation2 + $0x1250] ss:$20 sps:$4 sm:$0xff]  }
 0x1ac   :  { %6849 = vmatpush1.bf16.msra.mxu0 %v10332_v39  ;;  %7408 = vmatpush1.bf16.msra.mxu1 %v10335_v40  ;;  %v10433_v39 = vld [vmem:[#allocation2 + $0x1274] ss:$20 sps:$4 sm:$0xff]   ;;  %v10436_v40 = vld [vmem:[#allocation2 + $0x127c] ss:$20 sps:$4 sm:$0xff]  }
 0x1ad   :  { %6850 = vmatprep.subr.bf16.mxu0 %v10340_v41  ;;  %7409 = vmatprep.subr.bf16.mxu1 %v10343_v42  ;;  %v10431_v41 = vld [vmem:[#allocation2 + $0x1270] ss:$20 sps:$4 sm:$0xff]   ;;  %v10434_v42 = vld [vmem:[#allocation2 + $0x1278] ss:$20 sps:$4 sm:$0xff]  }
 0x1b0   :  { %6851 = vmatpush1.bf16.msra.mxu0 %v10338_v43  ;;  %7410 = vmatpush1.bf16.msra.mxu1 %v10341_v44  ;;  %v10439_v43 = vld [vmem:[#allocation2 + $0x129c] ss:$20 sps:$4 sm:$0xff]   ;;  %v10442_v44 = vld [vmem:[#allocation2 + $0x12a4] ss:$20 sps:$4 sm:$0xff]  }
 0x1b1   :  { %6852 = vmatprep.subr.bf16.mxu0 %v10346_v45  ;;  %7411 = vmatprep.subr.bf16.mxu1 %v10349_v46  ;;  %v10437_v45 = vld [vmem:[#allocation2 + $0x1298] ss:$20 sps:$4 sm:$0xff]   ;;  %v10440_v46 = vld [vmem:[#allocation2 + $0x12a0] ss:$20 sps:$4 sm:$0xff]  }
 0x1b4   :  { %6853 = vmatpush1.bf16.msra.mxu0 %v10344_v47  ;;  %7412 = vmatpush1.bf16.msra.mxu1 %v10347_v48  ;;  %v10445_v47 = vld [vmem:[#allocation2 + $0x12c4] ss:$20 sps:$4 sm:$0xff]   ;;  %v10448_v48 = vld [vmem:[#allocation2 + $0x12cc] ss:$20 sps:$4 sm:$0xff]  }
 0x1b5   :  { %6854 = vmatprep.subr.bf16.mxu0 %v10352_v49  ;;  %7413 = vmatprep.subr.bf16.mxu1 %v10355_v50  ;;  %v10443_v49 = vld [vmem:[#allocation2 + $0x12c0] ss:$20 sps:$4 sm:$0xff]   ;;  %v10446_v50 = vld [vmem:[#allocation2 + $0x12c8] ss:$20 sps:$4 sm:$0xff]  }
 0x1b8   :  { %6855 = vmatpush1.bf16.msra.mxu0 %v10350_v51  ;;  %7414 = vmatpush1.bf16.msra.mxu1 %v10353_v52  ;;  %v10451_v51 = vld [vmem:[#allocation2 + $0x12ec] ss:$20 sps:$4 sm:$0xff]   ;;  %v10454_v52 = vld [vmem:[#allocation2 + $0x12f4] ss:$20 sps:$4 sm:$0xff]  }
 0x1b9   :  { %6856 = vmatprep.subr.bf16.mxu0 %v10358_v53  ;;  %7415 = vmatprep.subr.bf16.mxu1 %v10361_v54  ;;  %v10449_v53 = vld [vmem:[#allocation2 + $0x12e8] ss:$20 sps:$4 sm:$0xff]   ;;  %v10452_v54 = vld [vmem:[#allocation2 + $0x12f0] ss:$20 sps:$4 sm:$0xff]  }
 0x1bc   :  { %6857 = vmatpush1.bf16.msra.mxu0 %v10356_v55  ;;  %7416 = vmatpush1.bf16.msra.mxu1 %v10359_v56  ;;  %v10457_v55 = vld [vmem:[#allocation2 + $0x1314] ss:$20 sps:$4 sm:$0xff]   ;;  %v10460_v56 = vld [vmem:[#allocation2 + $0x131c] ss:$20 sps:$4 sm:$0xff]  }
 0x1bd   :  { %6858 = vmatprep.subr.bf16.mxu0 %v10364_v57  ;;  %7417 = vmatprep.subr.bf16.mxu1 %v10367_v58  ;;  %v10455_v57 = vld [vmem:[#allocation2 + $0x1310] ss:$20 sps:$4 sm:$0xff]   ;;  %v10458_v58 = vld [vmem:[#allocation2 + $0x1318] ss:$20 sps:$4 sm:$0xff]  }
 0x1c0   :  { %6859 = vmatpush1.bf16.msra.mxu0 %v10362_v59  ;;  %7418 = vmatpush1.bf16.msra.mxu1 %v10365_v60  ;;  %v10463_v59 = vld [vmem:[#allocation2 + $0x133c] ss:$20 sps:$4 sm:$0xff]   ;;  %v10466_v60 = vld [vmem:[#allocation2 + $0x1344] ss:$20 sps:$4 sm:$0xff]  }
 0x1c1   :  { %6860 = vmatprep.subr.bf16.mxu0 %v10370_v61  ;;  %7419 = vmatprep.subr.bf16.mxu1 %v10373_v62  ;;  %v10461_v61 = vld [vmem:[#allocation2 + $0x1338] ss:$20 sps:$4 sm:$0xff]   ;;  %v10464_v62 = vld [vmem:[#allocation2 + $0x1340] ss:$20 sps:$4 sm:$0xff]  }
 0x1c4   :  { %6861 = vmatpush1.bf16.msra.mxu0 %v10368_v63  ;;  %7420 = vmatpush1.bf16.msra.mxu1 %v10371_v0  ;;  %v10469_v63 = vld [vmem:[#allocation2 + $0x1364] ss:$20 sps:$4 sm:$0xff]   ;;  %v10472_v0 = vld [vmem:[#allocation2 + $0x136c] ss:$20 sps:$4 sm:$0xff]  }
 0x1c5   :  { %6862 = vmatprep.subr.bf16.mxu0 %v10376_v1  ;;  %7421 = vmatprep.subr.bf16.mxu1 %v10379_v2  ;;  %v10467_v1 = vld [vmem:[#allocation2 + $0x1360] ss:$20 sps:$4 sm:$0xff]   ;;  %v10470_v2 = vld [vmem:[#allocation2 + $0x1368] ss:$20 sps:$4 sm:$0xff]  }
 0x1c8   :  { %6863 = vmatpush1.bf16.msra.mxu0 %v10374_v3  ;;  %7422 = vmatpush1.bf16.msra.mxu1 %v10377_v4  ;;  %v10475_v3 = vld [vmem:[#allocation2 + $0x138c] ss:$20 sps:$4 sm:$0xff]   ;;  %v10478_v4 = vld [vmem:[#allocation2 + $0x1394] ss:$20 sps:$4 sm:$0xff]  }
 0x1c9   :  { %6864 = vmatprep.subr.bf16.mxu0 %v10382_v5  ;;  %7423 = vmatprep.subr.bf16.mxu1 %v10385_v6  ;;  %v10473_v5 = vld [vmem:[#allocation2 + $0x1388] ss:$20 sps:$4 sm:$0xff]   ;;  %v10476_v6 = vld [vmem:[#allocation2 + $0x1390] ss:$20 sps:$4 sm:$0xff]  }
 0x1cc   :  { %6865 = vmatpush1.bf16.msra.mxu0 %v10380_v7  ;;  %7424 = vmatpush1.bf16.msra.mxu1 %v10383_v8  ;;  %v10481_v7 = vld [vmem:[#allocation2 + $0x13b4] ss:$20 sps:$4 sm:$0xff]   ;;  %v10484_v8 = vld [vmem:[#allocation2 + $0x13bc] ss:$20 sps:$4 sm:$0xff]  }
 0x1cd   :  { %6866 = vmatprep.subr.bf16.mxu0 %v10388_v9  ;;  %7425 = vmatprep.subr.bf16.mxu1 %v10391_v10  ;;  %v10479_v9 = vld [vmem:[#allocation2 + $0x13b0] ss:$20 sps:$4 sm:$0xff]   ;;  %v10482_v10 = vld [vmem:[#allocation2 + $0x13b8] ss:$20 sps:$4 sm:$0xff]  }
 0x1d0   :  { %6867 = vmatpush1.bf16.msra.mxu0 %v10386_v11  ;;  %7426 = vmatpush1.bf16.msra.mxu1 %v10389_v12  ;;  %v10487_v11 = vld [vmem:[#allocation2 + $0x13dc] ss:$20 sps:$4 sm:$0xff]   ;;  %v10490_v12 = vld [vmem:[#allocation2 + $0x13e4] ss:$20 sps:$4 sm:$0xff]  }
 0x1d1   :  { %6879 = vmatprep.subr.bf16.mxu0 %v10397_v14  ;;  %7438 = vmatprep.subr.bf16.mxu1 %v10400_v15  ;;  %v10488_v14 = vld [vmem:[#allocation2 + $0x13e0] ss:$20 sps:$4 sm:$0xff]   ;;  %v10491_v15 = vld [vmem:[%s11403_s0 + $0x38] ss:$100 sps:$4 sm:$0xff]  }
 0x1d3   :  { %6869 = vmatmul.mubr.bf16.vlgmr.msra.gmra.mrb[0].mxu0 %v10392_v13  ;;  %7428 = vmatmul.mubr.bf16.vlgmr.msra.gmra.mrb[0].mxu1 %v10392_v13  ;;  %v10485_v13 = vld [vmem:[#allocation2 + $0x13d8] ss:$20 sps:$4 sm:$0xff]  }
 0x1d4   :  { %6880 = vmatpush1.bf16.msra.mxu0 %v10395_v16  ;;  %7439 = vmatpush1.bf16.msra.mxu1 %v10398_v17  ;;  %v10496_v16 = vld [vmem:[#allocation2 + $0x1404] ss:$20 sps:$4 sm:$0xff]   ;;  %v10499_v17 = vld [vmem:[#allocation2 + $0x140c] ss:$20 sps:$4 sm:$0xff]  }
 0x1d5   :  { %6881 = vmatprep.subr.bf16.mxu0 %v10403_v18  ;;  %7440 = vmatprep.subr.bf16.mxu1 %v10406_v19  ;;  %v10494_v18 = vld [vmem:[#allocation2 + $0x1400] ss:$20 sps:$4 sm:$0xff]   ;;  %v10497_v19 = vld [vmem:[#allocation2 + $0x1408] ss:$20 sps:$4 sm:$0xff]  }
 0x1d6   :  { %6911 = vmatprep.mubr.bf16.mxu0 %v10493_v20  ;;  %7470 = vmatprep.mubr.bf16.mxu1 %v10493_v20  ;;  %v10502_v20 = vld [vmem:[#allocation2 + $0x142c] ss:$20 sps:$4 sm:$0xff]  }
 0x1d8   :  { %6882 = vmatpush1.bf16.msra.mxu0 %v10401_v21  ;;  %7441 = vmatpush1.bf16.msra.mxu1 %v10404_v22  ;;  %v10505_v21 = vld [vmem:[#allocation2 + $0x1434] ss:$20 sps:$4 sm:$0xff]  }
 0x1d9   :  { %6883 = vmatprep.subr.bf16.mxu0 %v10409_v23  ;;  %7442 = vmatprep.subr.bf16.mxu1 %v10412_v24  ;;  %v10592_v22 = vld [vmem:[%s11403_s0 + $0x44] ss:$100 sps:$4 sm:$0xff]  }
 0x1da   :  { %v10500_v23 = vld [vmem:[#allocation2 + $0x1428] ss:$20 sps:$4 sm:$0xff]   ;;  %v10503_v24 = vld [vmem:[#allocation2 + $0x1430] ss:$20 sps:$4 sm:$0xff]  }
 0x1dc   :  { %6884 = vmatpush1.bf16.msra.mxu0 %v10407_v25  ;;  %7443 = vmatpush1.bf16.msra.mxu1 %v10410_v26  ;;  %v10508_v25 = vld [vmem:[#allocation2 + $0x1454] ss:$20 sps:$4 sm:$0xff]   ;;  %v10511_v26 = vld [vmem:[#allocation2 + $0x145c] ss:$20 sps:$4 sm:$0xff]  }
 0x1dd   :  { %6885 = vmatprep.subr.bf16.mxu0 %v10415_v27  ;;  %7444 = vmatprep.subr.bf16.mxu1 %v10418_v28  ;;  %v10506_v27 = vld [vmem:[#allocation2 + $0x1450] ss:$20 sps:$4 sm:$0xff]   ;;  %v10509_v28 = vld [vmem:[#allocation2 + $0x1458] ss:$20 sps:$4 sm:$0xff]  }
 0x1e0   :  { %6886 = vmatpush1.bf16.msra.mxu0 %v10413_v29  ;;  %7445 = vmatpush1.bf16.msra.mxu1 %v10416_v30  ;;  %v10514_v29 = vld [vmem:[#allocation2 + $0x147c] ss:$20 sps:$4 sm:$0xff]   ;;  %v10517_v30 = vld [vmem:[#allocation2 + $0x1484] ss:$20 sps:$4 sm:$0xff]  }
 0x1e1   :  { %6887 = vmatprep.subr.bf16.mxu0 %v10421_v31  ;;  %7446 = vmatprep.subr.bf16.mxu1 %v10424_v32  ;;  %v10512_v31 = vld [vmem:[#allocation2 + $0x1478] ss:$20 sps:$4 sm:$0xff]   ;;  %v10515_v32 = vld [vmem:[#allocation2 + $0x1480] ss:$20 sps:$4 sm:$0xff]  }
 0x1e4   :  { %6888 = vmatpush1.bf16.msra.mxu0 %v10419_v33  ;;  %7447 = vmatpush1.bf16.msra.mxu1 %v10422_v34  ;;  %v10520_v33 = vld [vmem:[#allocation2 + $0x14a4] ss:$20 sps:$4 sm:$0xff]   ;;  %v10523_v34 = vld [vmem:[#allocation2 + $0x14ac] ss:$20 sps:$4 sm:$0xff]  }
 0x1e5   :  { %6889 = vmatprep.subr.bf16.mxu0 %v10427_v35  ;;  %7448 = vmatprep.subr.bf16.mxu1 %v10430_v36  ;;  %v10518_v35 = vld [vmem:[#allocation2 + $0x14a0] ss:$20 sps:$4 sm:$0xff]   ;;  %v10521_v36 = vld [vmem:[#allocation2 + $0x14a8] ss:$20 sps:$4 sm:$0xff]  }
 0x1e8   :  { %6890 = vmatpush1.bf16.msra.mxu0 %v10425_v37  ;;  %7449 = vmatpush1.bf16.msra.mxu1 %v10428_v38  ;;  %v10526_v37 = vld [vmem:[#allocation2 + $0x14cc] ss:$20 sps:$4 sm:$0xff]   ;;  %v10529_v38 = vld [vmem:[#allocation2 + $0x14d4] ss:$20 sps:$4 sm:$0xff]  }
 0x1e9   :  { %6891 = vmatprep.subr.bf16.mxu0 %v10433_v39  ;;  %7450 = vmatprep.subr.bf16.mxu1 %v10436_v40  ;;  %v10524_v39 = vld [vmem:[#allocation2 + $0x14c8] ss:$20 sps:$4 sm:$0xff]   ;;  %v10527_v40 = vld [vmem:[#allocation2 + $0x14d0] ss:$20 sps:$4 sm:$0xff]  }
 0x1ec   :  { %6892 = vmatpush1.bf16.msra.mxu0 %v10431_v41  ;;  %7451 = vmatpush1.bf16.msra.mxu1 %v10434_v42  ;;  %v10532_v41 = vld [vmem:[#allocation2 + $0x14f4] ss:$20 sps:$4 sm:$0xff]   ;;  %v10535_v42 = vld [vmem:[#allocation2 + $0x14fc] ss:$20 sps:$4 sm:$0xff]  }
 0x1ed   :  { %6893 = vmatprep.subr.bf16.mxu0 %v10439_v43  ;;  %7452 = vmatprep.subr.bf16.mxu1 %v10442_v44  ;;  %v10530_v43 = vld [vmem:[#allocation2 + $0x14f0] ss:$20 sps:$4 sm:$0xff]   ;;  %v10533_v44 = vld [vmem:[#allocation2 + $0x14f8] ss:$20 sps:$4 sm:$0xff]  }
 0x1f0   :  { %6894 = vmatpush1.bf16.msra.mxu0 %v10437_v45  ;;  %7453 = vmatpush1.bf16.msra.mxu1 %v10440_v46  ;;  %v10538_v45 = vld [vmem:[#allocation2 + $0x151c] ss:$20 sps:$4 sm:$0xff]   ;;  %v10541_v46 = vld [vmem:[#allocation2 + $0x1524] ss:$20 sps:$4 sm:$0xff]  }
 0x1f1   :  { %6895 = vmatprep.subr.bf16.mxu0 %v10445_v47  ;;  %7454 = vmatprep.subr.bf16.mxu1 %v10448_v48  ;;  %v10536_v47 = vld [vmem:[#allocation2 + $0x1518] ss:$20 sps:$4 sm:$0xff]   ;;  %v10539_v48 = vld [vmem:[#allocation2 + $0x1520] ss:$20 sps:$4 sm:$0xff]  }
 0x1f4   :  { %6896 = vmatpush1.bf16.msra.mxu0 %v10443_v49  ;;  %7455 = vmatpush1.bf16.msra.mxu1 %v10446_v50  ;;  %v10544_v49 = vld [vmem:[#allocation2 + $0x1544] ss:$20 sps:$4 sm:$0xff]   ;;  %v10547_v50 = vld [vmem:[#allocation2 + $0x154c] ss:$20 sps:$4 sm:$0xff]  }
 0x1f5   :  { %6897 = vmatprep.subr.bf16.mxu0 %v10451_v51  ;;  %7456 = vmatprep.subr.bf16.mxu1 %v10454_v52  ;;  %v10542_v51 = vld [vmem:[#allocation2 + $0x1540] ss:$20 sps:$4 sm:$0xff]   ;;  %v10545_v52 = vld [vmem:[#allocation2 + $0x1548] ss:$20 sps:$4 sm:$0xff]  }
 0x1f8   :  { %6898 = vmatpush1.bf16.msra.mxu0 %v10449_v53  ;;  %7457 = vmatpush1.bf16.msra.mxu1 %v10452_v54  ;;  %v10550_v53 = vld [vmem:[#allocation2 + $0x156c] ss:$20 sps:$4 sm:$0xff]   ;;  %v10553_v54 = vld [vmem:[#allocation2 + $0x1574] ss:$20 sps:$4 sm:$0xff]  }
 0x1f9   :  { %6899 = vmatprep.subr.bf16.mxu0 %v10457_v55  ;;  %7458 = vmatprep.subr.bf16.mxu1 %v10460_v56  ;;  %v10548_v55 = vld [vmem:[#allocation2 + $0x1568] ss:$20 sps:$4 sm:$0xff]   ;;  %v10551_v56 = vld [vmem:[#allocation2 + $0x1570] ss:$20 sps:$4 sm:$0xff]  }
 0x1fc   :  { %6900 = vmatpush1.bf16.msra.mxu0 %v10455_v57  ;;  %7459 = vmatpush1.bf16.msra.mxu1 %v10458_v58  ;;  %v10556_v57 = vld [vmem:[#allocation2 + $0x1594] ss:$20 sps:$4 sm:$0xff]   ;;  %v10559_v58 = vld [vmem:[#allocation2 + $0x159c] ss:$20 sps:$4 sm:$0xff]  }
 0x1fd   :  { %6901 = vmatprep.subr.bf16.mxu0 %v10463_v59  ;;  %7460 = vmatprep.subr.bf16.mxu1 %v10466_v60  ;;  %v10554_v59 = vld [vmem:[#allocation2 + $0x1590] ss:$20 sps:$4 sm:$0xff]   ;;  %v10557_v60 = vld [vmem:[#allocation2 + $0x1598] ss:$20 sps:$4 sm:$0xff]  }
 0x200   :  { %6902 = vmatpush1.bf16.msra.mxu0 %v10461_v61  ;;  %7461 = vmatpush1.bf16.msra.mxu1 %v10464_v62  ;;  %v10562_v61 = vld [vmem:[#allocation2 + $0x15bc] ss:$20 sps:$4 sm:$0xff]   ;;  %v10565_v62 = vld [vmem:[#allocation2 + $0x15c4] ss:$20 sps:$4 sm:$0xff]  }
 0x201   :  { %6903 = vmatprep.subr.bf16.mxu0 %v10469_v63  ;;  %7462 = vmatprep.subr.bf16.mxu1 %v10472_v0  ;;  %v10560_v63 = vld [vmem:[#allocation2 + $0x15b8] ss:$20 sps:$4 sm:$0xff]   ;;  %v10563_v0 = vld [vmem:[#allocation2 + $0x15c0] ss:$20 sps:$4 sm:$0xff]  }
 0x204   :  { %6904 = vmatpush1.bf16.msra.mxu0 %v10467_v1  ;;  %7463 = vmatpush1.bf16.msra.mxu1 %v10470_v2  ;;  %v10568_v1 = vld [vmem:[#allocation2 + $0x15e4] ss:$20 sps:$4 sm:$0xff]   ;;  %v10571_v2 = vld [vmem:[#allocation2 + $0x15ec] ss:$20 sps:$4 sm:$0xff]  }
 0x205   :  { %6905 = vmatprep.subr.bf16.mxu0 %v10475_v3  ;;  %7464 = vmatprep.subr.bf16.mxu1 %v10478_v4  ;;  %v10566_v3 = vld [vmem:[#allocation2 + $0x15e0] ss:$20 sps:$4 sm:$0xff]   ;;  %v10569_v4 = vld [vmem:[#allocation2 + $0x15e8] ss:$20 sps:$4 sm:$0xff]  }
 0x208   :  { %6906 = vmatpush1.bf16.msra.mxu0 %v10473_v5  ;;  %7465 = vmatpush1.bf16.msra.mxu1 %v10476_v6  ;;  %v10574_v5 = vld [vmem:[#allocation2 + $0x160c] ss:$20 sps:$4 sm:$0xff]   ;;  %v10577_v6 = vld [vmem:[#allocation2 + $0x1614] ss:$20 sps:$4 sm:$0xff]  }
 0x209   :  { %6907 = vmatprep.subr.bf16.mxu0 %v10481_v7  ;;  %7466 = vmatprep.subr.bf16.mxu1 %v10484_v8  ;;  %v10572_v7 = vld [vmem:[#allocation2 + $0x1608] ss:$20 sps:$4 sm:$0xff]   ;;  %v10575_v8 = vld [vmem:[#allocation2 + $0x1610] ss:$20 sps:$4 sm:$0xff]  }
 0x20c   :  { %6908 = vmatpush1.bf16.msra.mxu0 %v10479_v9  ;;  %7467 = vmatpush1.bf16.msra.mxu1 %v10482_v10  ;;  %v10580_v9 = vld [vmem:[#allocation2 + $0x1634] ss:$20 sps:$4 sm:$0xff]   ;;  %v10583_v10 = vld [vmem:[#allocation2 + $0x163c] ss:$20 sps:$4 sm:$0xff]  }
 0x20d   :  { %6909 = vmatprep.subr.bf16.mxu0 %v10487_v11  ;;  %7468 = vmatprep.subr.bf16.mxu1 %v10490_v12  ;;  %v10578_v11 = vld [vmem:[#allocation2 + $0x1630] ss:$20 sps:$4 sm:$0xff]   ;;  %v10581_v12 = vld [vmem:[#allocation2 + $0x1638] ss:$20 sps:$4 sm:$0xff]  }
 0x210   :  { %6910 = vmatpush1.bf16.msra.mxu0 %v10485_v13  ;;  %7469 = vmatpush1.bf16.msra.mxu1 %v10488_v14  ;;  %v10586_v13 = vld [vmem:[#allocation2 + $0x165c] ss:$20 sps:$4 sm:$0xff]   ;;  %v10589_v14 = vld [vmem:[#allocation2 + $0x1664] ss:$20 sps:$4 sm:$0xff]  }
 0x211   :  { %6922 = vmatprep.subr.bf16.mxu0 %v10496_v16  ;;  %7481 = vmatprep.subr.bf16.mxu1 %v10499_v17  ;;  %v10587_v16 = vld [vmem:[#allocation2 + $0x1660] ss:$20 sps:$4 sm:$0xff]  }
 0x212   :  { %v10590_v17 = vld [vmem:[%s11403_s0 + $0x40] ss:$100 sps:$4 sm:$0xff]  }
 0x213   :  { %6912 = vmatmul.mubr.bf16.vlgmr.msra.gmra.mrb[0].mxu0 %v10491_v15  ;;  %7471 = vmatmul.mubr.bf16.vlgmr.msra.gmra.mrb[0].mxu1 %v10491_v15  ;;  %v10584_v15 = vld [vmem:[#allocation2 + $0x1658] ss:$20 sps:$4 sm:$0xff]  }
 0x214   :  { %6923 = vmatpush1.bf16.msra.mxu0 %v10494_v18  ;;  %7482 = vmatpush1.bf16.msra.mxu1 %v10497_v19  ;;  %v10595_v18 = vld [vmem:[#allocation2 + $0x1684] ss:$20 sps:$4 sm:$0xff]   ;;  %v10598_v19 = vld [vmem:[#allocation2 + $0x168c] ss:$20 sps:$4 sm:$0xff]  }
 0x215   :  { %6924 = vmatprep.subr.bf16.mxu0 %v10502_v20  ;;  %7483 = vmatprep.subr.bf16.mxu1 %v10505_v21  ;;  %v10593_v20 = vld [vmem:[#allocation2 + $0x1680] ss:$20 sps:$4 sm:$0xff]   ;;  %v10596_v21 = vld [vmem:[#allocation2 + $0x1688] ss:$20 sps:$4 sm:$0xff]  }
 0x216   :  { %6954 = vmatprep.mubr.bf16.mxu0 %v10592_v22  ;;  %7513 = vmatprep.mubr.bf16.mxu1 %v10592_v22  ;;  %v10601_v22 = vld [vmem:[#allocation2 + $0x16ac] ss:$20 sps:$4 sm:$0xff]  }
 0x218   :  { %6925 = vmatpush1.bf16.msra.mxu0 %v10500_v23  ;;  %7484 = vmatpush1.bf16.msra.mxu1 %v10503_v24  ;;  %v10604_v23 = vld [vmem:[#allocation2 + $0x16b4] ss:$20 sps:$4 sm:$0xff]   ;;  %v10691_v24 = vld [vmem:[%s11403_s0 + $0x4c] ss:$100 sps:$4 sm:$0xff]  }
 0x219   :  { %6926 = vmatprep.subr.bf16.mxu0 %v10508_v25  ;;  %7485 = vmatprep.subr.bf16.mxu1 %v10511_v26  ;;  %v10599_v25 = vld [vmem:[#allocation2 + $0x16a8] ss:$20 sps:$4 sm:$0xff]   ;;  %v10602_v26 = vld [vmem:[#allocation2 + $0x16b0] ss:$20 sps:$4 sm:$0xff]  }
 0x21c   :  { %6927 = vmatpush1.bf16.msra.mxu0 %v10506_v27  ;;  %7486 = vmatpush1.bf16.msra.mxu1 %v10509_v28  ;;  %v10607_v27 = vld [vmem:[#allocation2 + $0x16d4] ss:$20 sps:$4 sm:$0xff]   ;;  %v10610_v28 = vld [vmem:[#allocation2 + $0x16dc] ss:$20 sps:$4 sm:$0xff]  }
 0x21d   :  { %6928 = vmatprep.subr.bf16.mxu0 %v10514_v29  ;;  %7487 = vmatprep.subr.bf16.mxu1 %v10517_v30  ;;  %v10605_v29 = vld [vmem:[#allocation2 + $0x16d0] ss:$20 sps:$4 sm:$0xff]   ;;  %v10608_v30 = vld [vmem:[#allocation2 + $0x16d8] ss:$20 sps:$4 sm:$0xff]  }
 0x220   :  { %6929 = vmatpush1.bf16.msra.mxu0 %v10512_v31  ;;  %7488 = vmatpush1.bf16.msra.mxu1 %v10515_v32  ;;  %v10613_v31 = vld [vmem:[#allocation2 + $0x16fc] ss:$20 sps:$4 sm:$0xff]   ;;  %v10616_v32 = vld [vmem:[#allocation2 + $0x1704] ss:$20 sps:$4 sm:$0xff]  }
 0x221   :  { %6930 = vmatprep.subr.bf16.mxu0 %v10520_v33  ;;  %7489 = vmatprep.subr.bf16.mxu1 %v10523_v34  ;;  %v10611_v33 = vld [vmem:[#allocation2 + $0x16f8] ss:$20 sps:$4 sm:$0xff]   ;;  %v10614_v34 = vld [vmem:[#allocation2 + $0x1700] ss:$20 sps:$4 sm:$0xff]  }
 0x224   :  { %6931 = vmatpush1.bf16.msra.mxu0 %v10518_v35  ;;  %7490 = vmatpush1.bf16.msra.mxu1 %v10521_v36  ;;  %v10619_v35 = vld [vmem:[#allocation2 + $0x1724] ss:$20 sps:$4 sm:$0xff]   ;;  %v10622_v36 = vld [vmem:[#allocation2 + $0x172c] ss:$20 sps:$4 sm:$0xff]  }
 0x225   :  { %6932 = vmatprep.subr.bf16.mxu0 %v10526_v37  ;;  %7491 = vmatprep.subr.bf16.mxu1 %v10529_v38  ;;  %v10617_v37 = vld [vmem:[#allocation2 + $0x1720] ss:$20 sps:$4 sm:$0xff]   ;;  %v10620_v38 = vld [vmem:[#allocation2 + $0x1728] ss:$20 sps:$4 sm:$0xff]  }
 0x228   :  { %6933 = vmatpush1.bf16.msra.mxu0 %v10524_v39  ;;  %7492 = vmatpush1.bf16.msra.mxu1 %v10527_v40  ;;  %v10625_v39 = vld [vmem:[#allocation2 + $0x174c] ss:$20 sps:$4 sm:$0xff]   ;;  %v10628_v40 = vld [vmem:[#allocation2 + $0x1754] ss:$20 sps:$4 sm:$0xff]  }
 0x229   :  { %6934 = vmatprep.subr.bf16.mxu0 %v10532_v41  ;;  %7493 = vmatprep.subr.bf16.mxu1 %v10535_v42  ;;  %v10623_v41 = vld [vmem:[#allocation2 + $0x1748] ss:$20 sps:$4 sm:$0xff]   ;;  %v10626_v42 = vld [vmem:[#allocation2 + $0x1750] ss:$20 sps:$4 sm:$0xff]  }
 0x22c   :  { %6935 = vmatpush1.bf16.msra.mxu0 %v10530_v43  ;;  %7494 = vmatpush1.bf16.msra.mxu1 %v10533_v44  ;;  %v10631_v43 = vld [vmem:[#allocation2 + $0x1774] ss:$20 sps:$4 sm:$0xff]   ;;  %v10634_v44 = vld [vmem:[#allocation2 + $0x177c] ss:$20 sps:$4 sm:$0xff]  }
 0x22d   :  { %6936 = vmatprep.subr.bf16.mxu0 %v10538_v45  ;;  %7495 = vmatprep.subr.bf16.mxu1 %v10541_v46  ;;  %v10629_v45 = vld [vmem:[#allocation2 + $0x1770] ss:$20 sps:$4 sm:$0xff]   ;;  %v10632_v46 = vld [vmem:[#allocation2 + $0x1778] ss:$20 sps:$4 sm:$0xff]  }
 0x230   :  { %6937 = vmatpush1.bf16.msra.mxu0 %v10536_v47  ;;  %7496 = vmatpush1.bf16.msra.mxu1 %v10539_v48  ;;  %v10637_v47 = vld [vmem:[#allocation2 + $0x179c] ss:$20 sps:$4 sm:$0xff]   ;;  %v10640_v48 = vld [vmem:[#allocation2 + $0x17a4] ss:$20 sps:$4 sm:$0xff]  }
 0x231   :  { %6938 = vmatprep.subr.bf16.mxu0 %v10544_v49  ;;  %7497 = vmatprep.subr.bf16.mxu1 %v10547_v50  ;;  %v10635_v49 = vld [vmem:[#allocation2 + $0x1798] ss:$20 sps:$4 sm:$0xff]   ;;  %v10638_v50 = vld [vmem:[#allocation2 + $0x17a0] ss:$20 sps:$4 sm:$0xff]  }
 0x234   :  { %6939 = vmatpush1.bf16.msra.mxu0 %v10542_v51  ;;  %7498 = vmatpush1.bf16.msra.mxu1 %v10545_v52  ;;  %v10643_v51 = vld [vmem:[#allocation2 + $0x17c4] ss:$20 sps:$4 sm:$0xff]   ;;  %v10646_v52 = vld [vmem:[#allocation2 + $0x17cc] ss:$20 sps:$4 sm:$0xff]  }
 0x235   :  { %6940 = vmatprep.subr.bf16.mxu0 %v10550_v53  ;;  %7499 = vmatprep.subr.bf16.mxu1 %v10553_v54  ;;  %v10641_v53 = vld [vmem:[#allocation2 + $0x17c0] ss:$20 sps:$4 sm:$0xff]   ;;  %v10644_v54 = vld [vmem:[#allocation2 + $0x17c8] ss:$20 sps:$4 sm:$0xff]  }
 0x238   :  { %6941 = vmatpush1.bf16.msra.mxu0 %v10548_v55  ;;  %7500 = vmatpush1.bf16.msra.mxu1 %v10551_v56  ;;  %v10649_v55 = vld [vmem:[#allocation2 + $0x17ec] ss:$20 sps:$4 sm:$0xff]   ;;  %v10652_v56 = vld [vmem:[#allocation2 + $0x17f4] ss:$20 sps:$4 sm:$0xff]  }
 0x239   :  { %6942 = vmatprep.subr.bf16.mxu0 %v10556_v57  ;;  %7501 = vmatprep.subr.bf16.mxu1 %v10559_v58  ;;  %v10647_v57 = vld [vmem:[#allocation2 + $0x17e8] ss:$20 sps:$4 sm:$0xff]   ;;  %v10650_v58 = vld [vmem:[#allocation2 + $0x17f0] ss:$20 sps:$4 sm:$0xff]  }
 0x23c   :  { %6943 = vmatpush1.bf16.msra.mxu0 %v10554_v59  ;;  %7502 = vmatpush1.bf16.msra.mxu1 %v10557_v60  ;;  %v10655_v59 = vld [vmem:[#allocation2 + $0x1814] ss:$20 sps:$4 sm:$0xff]   ;;  %v10658_v60 = vld [vmem:[#allocation2 + $0x181c] ss:$20 sps:$4 sm:$0xff]  }
 0x23d   :  { %6944 = vmatprep.subr.bf16.mxu0 %v10562_v61  ;;  %7503 = vmatprep.subr.bf16.mxu1 %v10565_v62  ;;  %v10653_v61 = vld [vmem:[#allocation2 + $0x1810] ss:$20 sps:$4 sm:$0xff]   ;;  %v10656_v62 = vld [vmem:[#allocation2 + $0x1818] ss:$20 sps:$4 sm:$0xff]  }
 0x240   :  { %6945 = vmatpush1.bf16.msra.mxu0 %v10560_v63  ;;  %7504 = vmatpush1.bf16.msra.mxu1 %v10563_v0  ;;  %v10661_v63 = vld [vmem:[#allocation2 + $0x183c] ss:$20 sps:$4 sm:$0xff]   ;;  %v10664_v0 = vld [vmem:[#allocation2 + $0x1844] ss:$20 sps:$4 sm:$0xff]  }
 0x241   :  { %6946 = vmatprep.subr.bf16.mxu0 %v10568_v1  ;;  %7505 = vmatprep.subr.bf16.mxu1 %v10571_v2  ;;  %v10659_v1 = vld [vmem:[#allocation2 + $0x1838] ss:$20 sps:$4 sm:$0xff]   ;;  %v10662_v2 = vld [vmem:[#allocation2 + $0x1840] ss:$20 sps:$4 sm:$0xff]  }
 0x244   :  { %6947 = vmatpush1.bf16.msra.mxu0 %v10566_v3  ;;  %7506 = vmatpush1.bf16.msra.mxu1 %v10569_v4  ;;  %v10667_v3 = vld [vmem:[#allocation2 + $0x1864] ss:$20 sps:$4 sm:$0xff]   ;;  %v10670_v4 = vld [vmem:[#allocation2 + $0x186c] ss:$20 sps:$4 sm:$0xff]  }
 0x245   :  { %6948 = vmatprep.subr.bf16.mxu0 %v10574_v5  ;;  %7507 = vmatprep.subr.bf16.mxu1 %v10577_v6  ;;  %v10665_v5 = vld [vmem:[#allocation2 + $0x1860] ss:$20 sps:$4 sm:$0xff]   ;;  %v10668_v6 = vld [vmem:[#allocation2 + $0x1868] ss:$20 sps:$4 sm:$0xff]  }
 0x248   :  { %6949 = vmatpush1.bf16.msra.mxu0 %v10572_v7  ;;  %7508 = vmatpush1.bf16.msra.mxu1 %v10575_v8  ;;  %v10673_v7 = vld [vmem:[#allocation2 + $0x188c] ss:$20 sps:$4 sm:$0xff]   ;;  %v10676_v8 = vld [vmem:[#allocation2 + $0x1894] ss:$20 sps:$4 sm:$0xff]  }
 0x249   :  { %6950 = vmatprep.subr.bf16.mxu0 %v10580_v9  ;;  %7509 = vmatprep.subr.bf16.mxu1 %v10583_v10  ;;  %v10671_v9 = vld [vmem:[#allocation2 + $0x1888] ss:$20 sps:$4 sm:$0xff]   ;;  %v10674_v10 = vld [vmem:[#allocation2 + $0x1890] ss:$20 sps:$4 sm:$0xff]  }
 0x24c   :  { %6951 = vmatpush1.bf16.msra.mxu0 %v10578_v11  ;;  %7510 = vmatpush1.bf16.msra.mxu1 %v10581_v12  ;;  %v10679_v11 = vld [vmem:[#allocation2 + $0x18b4] ss:$20 sps:$4 sm:$0xff]   ;;  %v10682_v12 = vld [vmem:[#allocation2 + $0x18bc] ss:$20 sps:$4 sm:$0xff]  }
 0x24d   :  { %6952 = vmatprep.subr.bf16.mxu0 %v10586_v13  ;;  %7511 = vmatprep.subr.bf16.mxu1 %v10589_v14  ;;  %v10677_v13 = vld [vmem:[#allocation2 + $0x18b0] ss:$20 sps:$4 sm:$0xff]   ;;  %v10680_v14 = vld [vmem:[#allocation2 + $0x18b8] ss:$20 sps:$4 sm:$0xff]  }
 0x250   :  { %6953 = vmatpush1.bf16.msra.mxu0 %v10584_v15  ;;  %7512 = vmatpush1.bf16.msra.mxu1 %v10587_v16  ;;  %v10685_v15 = vld [vmem:[#allocation2 + $0x18dc] ss:$20 sps:$4 sm:$0xff]   ;;  %v10688_v16 = vld [vmem:[#allocation2 + $0x18e4] ss:$20 sps:$4 sm:$0xff]  }
 0x251   :  { %6965 = vmatprep.subr.bf16.mxu0 %v10595_v18  ;;  %7524 = vmatprep.subr.bf16.mxu1 %v10598_v19  ;;  %v10686_v18 = vld [vmem:[#allocation2 + $0x18e0] ss:$20 sps:$4 sm:$0xff]   ;;  %v10689_v19 = vld [vmem:[%s11403_s0 + $0x48] ss:$100 sps:$4 sm:$0xff]  }
 0x253   :  { %6955 = vmatmul.mubr.bf16.vlgmr.msra.gmra.mrb[0].mxu0 %v10590_v17  ;;  %7514 = vmatmul.mubr.bf16.vlgmr.msra.gmra.mrb[0].mxu1 %v10590_v17  ;;  %v10683_v17 = vld [vmem:[#allocation2 + $0x18d8] ss:$20 sps:$4 sm:$0xff]  }
 0x254   :  { %6966 = vmatpush1.bf16.msra.mxu0 %v10593_v20  ;;  %7525 = vmatpush1.bf16.msra.mxu1 %v10596_v21  ;;  %v10694_v20 = vld [vmem:[#allocation2 + $0x1904] ss:$20 sps:$4 sm:$0xff]   ;;  %v10697_v21 = vld [vmem:[#allocation2 + $0x190c] ss:$20 sps:$4 sm:$0xff]  }
 0x255   :  { %6967 = vmatprep.subr.bf16.mxu0 %v10601_v22  ;;  %7526 = vmatprep.subr.bf16.mxu1 %v10604_v23  ;;  %v10692_v22 = vld [vmem:[#allocation2 + $0x1900] ss:$20 sps:$4 sm:$0xff]   ;;  %v10695_v23 = vld [vmem:[#allocation2 + $0x1908] ss:$20 sps:$4 sm:$0xff]  }
 0x256   :  { %6997 = vmatprep.mubr.bf16.mxu0 %v10691_v24  ;;  %7556 = vmatprep.mubr.bf16.mxu1 %v10691_v24  ;;  %v10700_v24 = vld [vmem:[#allocation2 + $0x192c] ss:$20 sps:$4 sm:$0xff]  }
 0x258   :  { %6968 = vmatpush1.bf16.msra.mxu0 %v10599_v25  ;;  %7527 = vmatpush1.bf16.msra.mxu1 %v10602_v26  ;;  %v10703_v25 = vld [vmem:[#allocation2 + $0x1934] ss:$20 sps:$4 sm:$0xff]  }
 0x259   :  { %6969 = vmatprep.subr.bf16.mxu0 %v10607_v27  ;;  %7528 = vmatprep.subr.bf16.mxu1 %v10610_v28  ;;  %v10790_v26 = vld [vmem:[%s11403_s0 + $0x54] ss:$100 sps:$4 sm:$0xff]   ;;  %v10698_v27 = vld [vmem:[#allocation2 + $0x1928] ss:$20 sps:$4 sm:$0xff]   ;;  %v10701_v28 = vld [vmem:[#allocation2 + $0x1930] ss:$20 sps:$4 sm:$0xff]  }
 0x25c   :  { %6970 = vmatpush1.bf16.msra.mxu0 %v10605_v29  ;;  %7529 = vmatpush1.bf16.msra.mxu1 %v10608_v30  ;;  %v10706_v29 = vld [vmem:[#allocation2 + $0x1954] ss:$20 sps:$4 sm:$0xff]   ;;  %v10709_v30 = vld [vmem:[#allocation2 + $0x195c] ss:$20 sps:$4 sm:$0xff]  }
 0x25d   :  { %6971 = vmatprep.subr.bf16.mxu0 %v10613_v31  ;;  %7530 = vmatprep.subr.bf16.mxu1 %v10616_v32  ;;  %v10704_v31 = vld [vmem:[#allocation2 + $0x1950] ss:$20 sps:$4 sm:$0xff]   ;;  %v10707_v32 = vld [vmem:[#allocation2 + $0x1958] ss:$20 sps:$4 sm:$0xff]  }
 0x260   :  { %6972 = vmatpush1.bf16.msra.mxu0 %v10611_v33  ;;  %7531 = vmatpush1.bf16.msra.mxu1 %v10614_v34  ;;  %v10712_v33 = vld [vmem:[#allocation2 + $0x197c] ss:$20 sps:$4 sm:$0xff]   ;;  %v10715_v34 = vld [vmem:[#allocation2 + $0x1984] ss:$20 sps:$4 sm:$0xff]  }
 0x261   :  { %6973 = vmatprep.subr.bf16.mxu0 %v10619_v35  ;;  %7532 = vmatprep.subr.bf16.mxu1 %v10622_v36  ;;  %v10710_v35 = vld [vmem:[#allocation2 + $0x1978] ss:$20 sps:$4 sm:$0xff]   ;;  %v10713_v36 = vld [vmem:[#allocation2 + $0x1980] ss:$20 sps:$4 sm:$0xff]  }
 0x264   :  { %6974 = vmatpush1.bf16.msra.mxu0 %v10617_v37  ;;  %7533 = vmatpush1.bf16.msra.mxu1 %v10620_v38  ;;  %v10718_v37 = vld [vmem:[#allocation2 + $0x19a4] ss:$20 sps:$4 sm:$0xff]   ;;  %v10721_v38 = vld [vmem:[#allocation2 + $0x19ac] ss:$20 sps:$4 sm:$0xff]  }
 0x265   :  { %6975 = vmatprep.subr.bf16.mxu0 %v10625_v39  ;;  %7534 = vmatprep.subr.bf16.mxu1 %v10628_v40  ;;  %v10716_v39 = vld [vmem:[#allocation2 + $0x19a0] ss:$20 sps:$4 sm:$0xff]   ;;  %v10719_v40 = vld [vmem:[#allocation2 + $0x19a8] ss:$20 sps:$4 sm:$0xff]  }
 0x268   :  { %6976 = vmatpush1.bf16.msra.mxu0 %v10623_v41  ;;  %7535 = vmatpush1.bf16.msra.mxu1 %v10626_v42  ;;  %v10724_v41 = vld [vmem:[#allocation2 + $0x19cc] ss:$20 sps:$4 sm:$0xff]   ;;  %v10727_v42 = vld [vmem:[#allocation2 + $0x19d4] ss:$20 sps:$4 sm:$0xff]  }
 0x269   :  { %6977 = vmatprep.subr.bf16.mxu0 %v10631_v43  ;;  %7536 = vmatprep.subr.bf16.mxu1 %v10634_v44  ;;  %v10722_v43 = vld [vmem:[#allocation2 + $0x19c8] ss:$20 sps:$4 sm:$0xff]   ;;  %v10725_v44 = vld [vmem:[#allocation2 + $0x19d0] ss:$20 sps:$4 sm:$0xff]  }
 0x26c   :  { %6978 = vmatpush1.bf16.msra.mxu0 %v10629_v45  ;;  %7537 = vmatpush1.bf16.msra.mxu1 %v10632_v46  ;;  %v10730_v45 = vld [vmem:[#allocation2 + $0x19f4] ss:$20 sps:$4 sm:$0xff]   ;;  %v10733_v46 = vld [vmem:[#allocation2 + $0x19fc] ss:$20 sps:$4 sm:$0xff]  }
 0x26d   :  { %6979 = vmatprep.subr.bf16.mxu0 %v10637_v47  ;;  %7538 = vmatprep.subr.bf16.mxu1 %v10640_v48  ;;  %v10728_v47 = vld [vmem:[#allocation2 + $0x19f0] ss:$20 sps:$4 sm:$0xff]   ;;  %v10731_v48 = vld [vmem:[#allocation2 + $0x19f8] ss:$20 sps:$4 sm:$0xff]  }
 0x270   :  { %6980 = vmatpush1.bf16.msra.mxu0 %v10635_v49  ;;  %7539 = vmatpush1.bf16.msra.mxu1 %v10638_v50  ;;  %v10736_v49 = vld [vmem:[#allocation2 + $0x1a1c] ss:$20 sps:$4 sm:$0xff]   ;;  %v10739_v50 = vld [vmem:[#allocation2 + $0x1a24] ss:$20 sps:$4 sm:$0xff]  }
 0x271   :  { %6981 = vmatprep.subr.bf16.mxu0 %v10643_v51  ;;  %7540 = vmatprep.subr.bf16.mxu1 %v10646_v52  ;;  %v10734_v51 = vld [vmem:[#allocation2 + $0x1a18] ss:$20 sps:$4 sm:$0xff]   ;;  %v10737_v52 = vld [vmem:[#allocation2 + $0x1a20] ss:$20 sps:$4 sm:$0xff]  }
 0x274   :  { %6982 = vmatpush1.bf16.msra.mxu0 %v10641_v53  ;;  %7541 = vmatpush1.bf16.msra.mxu1 %v10644_v54  ;;  %v10742_v53 = vld [vmem:[#allocation2 + $0x1a44] ss:$20 sps:$4 sm:$0xff]   ;;  %v10745_v54 = vld [vmem:[#allocation2 + $0x1a4c] ss:$20 sps:$4 sm:$0xff]  }
 0x275   :  { %6983 = vmatprep.subr.bf16.mxu0 %v10649_v55  ;;  %7542 = vmatprep.subr.bf16.mxu1 %v10652_v56  ;;  %v10740_v55 = vld [vmem:[#allocation2 + $0x1a40] ss:$20 sps:$4 sm:$0xff]   ;;  %v10743_v56 = vld [vmem:[#allocation2 + $0x1a48] ss:$20 sps:$4 sm:$0xff]  }
 0x278   :  { %6984 = vmatpush1.bf16.msra.mxu0 %v10647_v57  ;;  %7543 = vmatpush1.bf16.msra.mxu1 %v10650_v58  ;;  %v10748_v57 = vld [vmem:[#allocation2 + $0x1a6c] ss:$20 sps:$4 sm:$0xff]   ;;  %v10751_v58 = vld [vmem:[#allocation2 + $0x1a74] ss:$20 sps:$4 sm:$0xff]  }
 0x279   :  { %6985 = vmatprep.subr.bf16.mxu0 %v10655_v59  ;;  %7544 = vmatprep.subr.bf16.mxu1 %v10658_v60  ;;  %v10746_v59 = vld [vmem:[#allocation2 + $0x1a68] ss:$20 sps:$4 sm:$0xff]   ;;  %v10749_v60 = vld [vmem:[#allocation2 + $0x1a70] ss:$20 sps:$4 sm:$0xff]  }
 0x27c   :  { %6986 = vmatpush1.bf16.msra.mxu0 %v10653_v61  ;;  %7545 = vmatpush1.bf16.msra.mxu1 %v10656_v62  ;;  %v10754_v61 = vld [vmem:[#allocation2 + $0x1a94] ss:$20 sps:$4 sm:$0xff]   ;;  %v10757_v62 = vld [vmem:[#allocation2 + $0x1a9c] ss:$20 sps:$4 sm:$0xff]  }
 0x27d   :  { %6987 = vmatprep.subr.bf16.mxu0 %v10661_v63  ;;  %7546 = vmatprep.subr.bf16.mxu1 %v10664_v0  ;;  %v10752_v63 = vld [vmem:[#allocation2 + $0x1a90] ss:$20 sps:$4 sm:$0xff]   ;;  %v10755_v0 = vld [vmem:[#allocation2 + $0x1a98] ss:$20 sps:$4 sm:$0xff]  }
 0x280   :  { %6988 = vmatpush1.bf16.msra.mxu0 %v10659_v1  ;;  %7547 = vmatpush1.bf16.msra.mxu1 %v10662_v2  ;;  %v10760_v1 = vld [vmem:[#allocation2 + $0x1abc] ss:$20 sps:$4 sm:$0xff]   ;;  %v10763_v2 = vld [vmem:[#allocation2 + $0x1ac4] ss:$20 sps:$4 sm:$0xff]  }
 0x281   :  { %6989 = vmatprep.subr.bf16.mxu0 %v10667_v3  ;;  %7548 = vmatprep.subr.bf16.mxu1 %v10670_v4  ;;  %v10758_v3 = vld [vmem:[#allocation2 + $0x1ab8] ss:$20 sps:$4 sm:$0xff]   ;;  %v10761_v4 = vld [vmem:[#allocation2 + $0x1ac0] ss:$20 sps:$4 sm:$0xff]  }
 0x284   :  { %6990 = vmatpush1.bf16.msra.mxu0 %v10665_v5  ;;  %7549 = vmatpush1.bf16.msra.mxu1 %v10668_v6  ;;  %v10766_v5 = vld [vmem:[#allocation2 + $0x1ae4] ss:$20 sps:$4 sm:$0xff]   ;;  %v10769_v6 = vld [vmem:[#allocation2 + $0x1aec] ss:$20 sps:$4 sm:$0xff]  }
 0x285   :  { %6991 = vmatprep.subr.bf16.mxu0 %v10673_v7  ;;  %7550 = vmatprep.subr.bf16.mxu1 %v10676_v8  ;;  %v10764_v7 = vld [vmem:[#allocation2 + $0x1ae0] ss:$20 sps:$4 sm:$0xff]   ;;  %v10767_v8 = vld [vmem:[#allocation2 + $0x1ae8] ss:$20 sps:$4 sm:$0xff]  }
 0x288   :  { %6992 = vmatpush1.bf16.msra.mxu0 %v10671_v9  ;;  %7551 = vmatpush1.bf16.msra.mxu1 %v10674_v10  ;;  %v10772_v9 = vld [vmem:[#allocation2 + $0x1b0c] ss:$20 sps:$4 sm:$0xff]   ;;  %v10775_v10 = vld [vmem:[#allocation2 + $0x1b14] ss:$20 sps:$4 sm:$0xff]  }
 0x289   :  { %6993 = vmatprep.subr.bf16.mxu0 %v10679_v11  ;;  %7552 = vmatprep.subr.bf16.mxu1 %v10682_v12  ;;  %v10770_v11 = vld [vmem:[#allocation2 + $0x1b08] ss:$20 sps:$4 sm:$0xff]   ;;  %v10773_v12 = vld [vmem:[#allocation2 + $0x1b10] ss:$20 sps:$4 sm:$0xff]  }
 0x28c   :  { %6994 = vmatpush1.bf16.msra.mxu0 %v10677_v13  ;;  %7553 = vmatpush1.bf16.msra.mxu1 %v10680_v14  ;;  %v10778_v13 = vld [vmem:[#allocation2 + $0x1b34] ss:$20 sps:$4 sm:$0xff]   ;;  %v10781_v14 = vld [vmem:[#allocation2 + $0x1b3c] ss:$20 sps:$4 sm:$0xff]  }
 0x28d   :  { %6995 = vmatprep.subr.bf16.mxu0 %v10685_v15  ;;  %7554 = vmatprep.subr.bf16.mxu1 %v10688_v16  ;;  %v10776_v15 = vld [vmem:[#allocation2 + $0x1b30] ss:$20 sps:$4 sm:$0xff]   ;;  %v10779_v16 = vld [vmem:[#allocation2 + $0x1b38] ss:$20 sps:$4 sm:$0xff]  }
 0x290   :  { %6996 = vmatpush1.bf16.msra.mxu0 %v10683_v17  ;;  %7555 = vmatpush1.bf16.msra.mxu1 %v10686_v18  ;;  %v10784_v17 = vld [vmem:[#allocation2 + $0x1b5c] ss:$20 sps:$4 sm:$0xff]   ;;  %v10787_v18 = vld [vmem:[#allocation2 + $0x1b64] ss:$20 sps:$4 sm:$0xff]  }
 0x291   :  { %7008 = vmatprep.subr.bf16.mxu0 %v10694_v20  ;;  %7567 = vmatprep.subr.bf16.mxu1 %v10697_v21  ;;  %v10785_v20 = vld [vmem:[#allocation2 + $0x1b60] ss:$20 sps:$4 sm:$0xff]   ;;  %v10793_v21 = vld [vmem:[#allocation2 + $0x1b84] ss:$20 sps:$4 sm:$0xff]  }
 0x293   :  { %6998 = vmatmul.mubr.bf16.vlgmr.msra.gmra.mrb[0].mxu0 %v10689_v19  ;;  %7557 = vmatmul.mubr.bf16.vlgmr.msra.gmra.mrb[0].mxu1 %v10689_v19  ;;  %v10782_v19 = vld [vmem:[#allocation2 + $0x1b58] ss:$20 sps:$4 sm:$0xff]  }
 0x294   :  { %7009 = vmatpush1.bf16.msra.mxu0 %v10692_v22  ;;  %7568 = vmatpush1.bf16.msra.mxu1 %v10695_v23  ;;  %v10796_v22 = vld [vmem:[#allocation2 + $0x1b8c] ss:$20 sps:$4 sm:$0xff]   ;;  %v10788_v23 = vld [vmem:[%s11403_s0 + $0x50] ss:$100 sps:$4 sm:$0xff]  }
 0x295   :  { %7010 = vmatprep.subr.bf16.mxu0 %v10700_v24  ;;  %7569 = vmatprep.subr.bf16.mxu1 %v10703_v25  ;;  %v10791_v24 = vld [vmem:[#allocation2 + $0x1b80] ss:$20 sps:$4 sm:$0xff]   ;;  %v10794_v25 = vld [vmem:[#allocation2 + $0x1b88] ss:$20 sps:$4 sm:$0xff]  }
 0x296   :  { %7040 = vmatprep.mubr.bf16.mxu0 %v10790_v26  ;;  %7599 = vmatprep.mubr.bf16.mxu1 %v10790_v26  ;;  %v10799_v26 = vld [vmem:[#allocation2 + $0x1bac] ss:$20 sps:$4 sm:$0xff]  }
 0x298   :  { %7011 = vmatpush1.bf16.msra.mxu0 %v10698_v27  ;;  %7570 = vmatpush1.bf16.msra.mxu1 %v10701_v28  ;;  %v10802_v27 = vld [vmem:[#allocation2 + $0x1bb4] ss:$20 sps:$4 sm:$0xff]   ;;  %v10889_v28 = vld [vmem:[%s11403_s0 + $0x5c] ss:$100 sps:$4 sm:$0xff]  }
 0x299   :  { %7012 = vmatprep.subr.bf16.mxu0 %v10706_v29  ;;  %7571 = vmatprep.subr.bf16.mxu1 %v10709_v30  ;;  %v10797_v29 = vld [vmem:[#allocation2 + $0x1ba8] ss:$20 sps:$4 sm:$0xff]   ;;  %v10800_v30 = vld [vmem:[#allocation2 + $0x1bb0] ss:$20 sps:$4 sm:$0xff]  }
 0x29c   :  { %7013 = vmatpush1.bf16.msra.mxu0 %v10704_v31  ;;  %7572 = vmatpush1.bf16.msra.mxu1 %v10707_v32  ;;  %v10805_v31 = vld [vmem:[#allocation2 + $0x1bd4] ss:$20 sps:$4 sm:$0xff]   ;;  %v10808_v32 = vld [vmem:[#allocation2 + $0x1bdc] ss:$20 sps:$4 sm:$0xff]  }
 0x29d   :  { %7014 = vmatprep.subr.bf16.mxu0 %v10712_v33  ;;  %7573 = vmatprep.subr.bf16.mxu1 %v10715_v34  ;;  %v10803_v33 = vld [vmem:[#allocation2 + $0x1bd0] ss:$20 sps:$4 sm:$0xff]   ;;  %v10806_v34 = vld [vmem:[#allocation2 + $0x1bd8] ss:$20 sps:$4 sm:$0xff]  }
 0x2a0   :  { %7015 = vmatpush1.bf16.msra.mxu0 %v10710_v35  ;;  %7574 = vmatpush1.bf16.msra.mxu1 %v10713_v36  ;;  %v10811_v35 = vld [vmem:[#allocation2 + $0x1bfc] ss:$20 sps:$4 sm:$0xff]   ;;  %v10814_v36 = vld [vmem:[#allocation2 + $0x1c04] ss:$20 sps:$4 sm:$0xff]  }
 0x2a1   :  { %7016 = vmatprep.subr.bf16.mxu0 %v10718_v37  ;;  %7575 = vmatprep.subr.bf16.mxu1 %v10721_v38  ;;  %v10809_v37 = vld [vmem:[#allocation2 + $0x1bf8] ss:$20 sps:$4 sm:$0xff]   ;;  %v10812_v38 = vld [vmem:[#allocation2 + $0x1c00] ss:$20 sps:$4 sm:$0xff]  }
 0x2a4   :  { %7017 = vmatpush1.bf16.msra.mxu0 %v10716_v39  ;;  %7576 = vmatpush1.bf16.msra.mxu1 %v10719_v40  ;;  %v10817_v39 = vld [vmem:[#allocation2 + $0x1c24] ss:$20 sps:$4 sm:$0xff]   ;;  %v10820_v40 = vld [vmem:[#allocation2 + $0x1c2c] ss:$20 sps:$4 sm:$0xff]  }
 0x2a5   :  { %7018 = vmatprep.subr.bf16.mxu0 %v10724_v41  ;;  %7577 = vmatprep.subr.bf16.mxu1 %v10727_v42  ;;  %v10815_v41 = vld [vmem:[#allocation2 + $0x1c20] ss:$20 sps:$4 sm:$0xff]   ;;  %v10818_v42 = vld [vmem:[#allocation2 + $0x1c28] ss:$20 sps:$4 sm:$0xff]  }
 0x2a8   :  { %7019 = vmatpush1.bf16.msra.mxu0 %v10722_v43  ;;  %7578 = vmatpush1.bf16.msra.mxu1 %v10725_v44  ;;  %v10823_v43 = vld [vmem:[#allocation2 + $0x1c4c] ss:$20 sps:$4 sm:$0xff]   ;;  %v10826_v44 = vld [vmem:[#allocation2 + $0x1c54] ss:$20 sps:$4 sm:$0xff]  }
 0x2a9   :  { %7020 = vmatprep.subr.bf16.mxu0 %v10730_v45  ;;  %7579 = vmatprep.subr.bf16.mxu1 %v10733_v46  ;;  %v10821_v45 = vld [vmem:[#allocation2 + $0x1c48] ss:$20 sps:$4 sm:$0xff]   ;;  %v10824_v46 = vld [vmem:[#allocation2 + $0x1c50] ss:$20 sps:$4 sm:$0xff]  }
 0x2ac   :  { %7021 = vmatpush1.bf16.msra.mxu0 %v10728_v47  ;;  %7580 = vmatpush1.bf16.msra.mxu1 %v10731_v48  ;;  %v10829_v47 = vld [vmem:[#allocation2 + $0x1c74] ss:$20 sps:$4 sm:$0xff]   ;;  %v10832_v48 = vld [vmem:[#allocation2 + $0x1c7c] ss:$20 sps:$4 sm:$0xff]  }
 0x2ad   :  { %7022 = vmatprep.subr.bf16.mxu0 %v10736_v49  ;;  %7581 = vmatprep.subr.bf16.mxu1 %v10739_v50  ;;  %v10827_v49 = vld [vmem:[#allocation2 + $0x1c70] ss:$20 sps:$4 sm:$0xff]   ;;  %v10830_v50 = vld [vmem:[#allocation2 + $0x1c78] ss:$20 sps:$4 sm:$0xff]  }
 0x2b0   :  { %7023 = vmatpush1.bf16.msra.mxu0 %v10734_v51  ;;  %7582 = vmatpush1.bf16.msra.mxu1 %v10737_v52  ;;  %v10835_v51 = vld [vmem:[#allocation2 + $0x1c9c] ss:$20 sps:$4 sm:$0xff]   ;;  %v10838_v52 = vld [vmem:[#allocation2 + $0x1ca4] ss:$20 sps:$4 sm:$0xff]  }
 0x2b1   :  { %7024 = vmatprep.subr.bf16.mxu0 %v10742_v53  ;;  %7583 = vmatprep.subr.bf16.mxu1 %v10745_v54  ;;  %v10833_v53 = vld [vmem:[#allocation2 + $0x1c98] ss:$20 sps:$4 sm:$0xff]   ;;  %v10836_v54 = vld [vmem:[#allocation2 + $0x1ca0] ss:$20 sps:$4 sm:$0xff]  }
 0x2b4   :  { %7025 = vmatpush1.bf16.msra.mxu0 %v10740_v55  ;;  %7584 = vmatpush1.bf16.msra.mxu1 %v10743_v56  ;;  %v10841_v55 = vld [vmem:[#allocation2 + $0x1cc4] ss:$20 sps:$4 sm:$0xff]   ;;  %v10844_v56 = vld [vmem:[#allocation2 + $0x1ccc] ss:$20 sps:$4 sm:$0xff]  }
 0x2b5   :  { %7026 = vmatprep.subr.bf16.mxu0 %v10748_v57  ;;  %7585 = vmatprep.subr.bf16.mxu1 %v10751_v58  ;;  %v10839_v57 = vld [vmem:[#allocation2 + $0x1cc0] ss:$20 sps:$4 sm:$0xff]   ;;  %v10842_v58 = vld [vmem:[#allocation2 + $0x1cc8] ss:$20 sps:$4 sm:$0xff]  }
 0x2b8   :  { %7027 = vmatpush1.bf16.msra.mxu0 %v10746_v59  ;;  %7586 = vmatpush1.bf16.msra.mxu1 %v10749_v60  ;;  %v10847_v59 = vld [vmem:[#allocation2 + $0x1cec] ss:$20 sps:$4 sm:$0xff]   ;;  %v10850_v60 = vld [vmem:[#allocation2 + $0x1cf4] ss:$20 sps:$4 sm:$0xff]  }
 0x2b9   :  { %7028 = vmatprep.subr.bf16.mxu0 %v10754_v61  ;;  %7587 = vmatprep.subr.bf16.mxu1 %v10757_v62  ;;  %v10845_v61 = vld [vmem:[#allocation2 + $0x1ce8] ss:$20 sps:$4 sm:$0xff]   ;;  %v10848_v62 = vld [vmem:[#allocation2 + $0x1cf0] ss:$20 sps:$4 sm:$0xff]  }
 0x2bc   :  { %7029 = vmatpush1.bf16.msra.mxu0 %v10752_v63  ;;  %7588 = vmatpush1.bf16.msra.mxu1 %v10755_v0  ;;  %v10853_v63 = vld [vmem:[#allocation2 + $0x1d14] ss:$20 sps:$4 sm:$0xff]   ;;  %v10856_v0 = vld [vmem:[#allocation2 + $0x1d1c] ss:$20 sps:$4 sm:$0xff]  }
 0x2bd   :  { %7030 = vmatprep.subr.bf16.mxu0 %v10760_v1  ;;  %7589 = vmatprep.subr.bf16.mxu1 %v10763_v2  ;;  %v10851_v1 = vld [vmem:[#allocation2 + $0x1d10] ss:$20 sps:$4 sm:$0xff]   ;;  %v10854_v2 = vld [vmem:[#allocation2 + $0x1d18] ss:$20 sps:$4 sm:$0xff]  }
 0x2c0   :  { %7031 = vmatpush1.bf16.msra.mxu0 %v10758_v3  ;;  %7590 = vmatpush1.bf16.msra.mxu1 %v10761_v4  ;;  %v10859_v3 = vld [vmem:[#allocation2 + $0x1d3c] ss:$20 sps:$4 sm:$0xff]   ;;  %v10862_v4 = vld [vmem:[#allocation2 + $0x1d44] ss:$20 sps:$4 sm:$0xff]  }
 0x2c1   :  { %7032 = vmatprep.subr.bf16.mxu0 %v10766_v5  ;;  %7591 = vmatprep.subr.bf16.mxu1 %v10769_v6  ;;  %v10857_v5 = vld [vmem:[#allocation2 + $0x1d38] ss:$20 sps:$4 sm:$0xff]   ;;  %v10860_v6 = vld [vmem:[#allocation2 + $0x1d40] ss:$20 sps:$4 sm:$0xff]  }
 0x2c4   :  { %7033 = vmatpush1.bf16.msra.mxu0 %v10764_v7  ;;  %7592 = vmatpush1.bf16.msra.mxu1 %v10767_v8  ;;  %v10865_v7 = vld [vmem:[#allocation2 + $0x1d64] ss:$20 sps:$4 sm:$0xff]   ;;  %v10868_v8 = vld [vmem:[#allocation2 + $0x1d6c] ss:$20 sps:$4 sm:$0xff]  }
 0x2c5   :  { %7034 = vmatprep.subr.bf16.mxu0 %v10772_v9  ;;  %7593 = vmatprep.subr.bf16.mxu1 %v10775_v10  ;;  %v10863_v9 = vld [vmem:[#allocation2 + $0x1d60] ss:$20 sps:$4 sm:$0xff]   ;;  %v10866_v10 = vld [vmem:[#allocation2 + $0x1d68] ss:$20 sps:$4 sm:$0xff]  }
 0x2c8   :  { %7035 = vmatpush1.bf16.msra.mxu0 %v10770_v11  ;;  %7594 = vmatpush1.bf16.msra.mxu1 %v10773_v12  ;;  %v10871_v11 = vld [vmem:[#allocation2 + $0x1d8c] ss:$20 sps:$4 sm:$0xff]   ;;  %v10874_v12 = vld [vmem:[#allocation2 + $0x1d94] ss:$20 sps:$4 sm:$0xff]  }
 0x2c9   :  { %7036 = vmatprep.subr.bf16.mxu0 %v10778_v13  ;;  %7595 = vmatprep.subr.bf16.mxu1 %v10781_v14  ;;  %v10869_v13 = vld [vmem:[#allocation2 + $0x1d88] ss:$20 sps:$4 sm:$0xff]   ;;  %v10872_v14 = vld [vmem:[#allocation2 + $0x1d90] ss:$20 sps:$4 sm:$0xff]  }
 0x2cc   :  { %7037 = vmatpush1.bf16.msra.mxu0 %v10776_v15  ;;  %7596 = vmatpush1.bf16.msra.mxu1 %v10779_v16  ;;  %v10877_v15 = vld [vmem:[#allocation2 + $0x1db4] ss:$20 sps:$4 sm:$0xff]   ;;  %v10880_v16 = vld [vmem:[#allocation2 + $0x1dbc] ss:$20 sps:$4 sm:$0xff]  }
 0x2cd   :  { %7038 = vmatprep.subr.bf16.mxu0 %v10784_v17  ;;  %7597 = vmatprep.subr.bf16.mxu1 %v10787_v18  ;;  %v10875_v17 = vld [vmem:[#allocation2 + $0x1db0] ss:$20 sps:$4 sm:$0xff]   ;;  %v10878_v18 = vld [vmem:[#allocation2 + $0x1db8] ss:$20 sps:$4 sm:$0xff]  }
 0x2d0   :  { %7039 = vmatpush1.bf16.msra.mxu0 %v10782_v19  ;;  %7598 = vmatpush1.bf16.msra.mxu1 %v10785_v20  ;;  %v10883_v19 = vld [vmem:[#allocation2 + $0x1ddc] ss:$20 sps:$4 sm:$0xff]   ;;  %v10886_v20 = vld [vmem:[#allocation2 + $0x1de4] ss:$20 sps:$4 sm:$0xff]  }
 0x2d1   :  { %7051 = vmatprep.subr.bf16.mxu0 %v10793_v21  ;;  %7610 = vmatprep.subr.bf16.mxu1 %v10796_v22  ;;  %v10881_v21 = vld [vmem:[#allocation2 + $0x1dd8] ss:$20 sps:$4 sm:$0xff]   ;;  %v10884_v22 = vld [vmem:[#allocation2 + $0x1de0] ss:$20 sps:$4 sm:$0xff]  }
 0x2d3   :  { %7041 = vmatmul.mubr.bf16.vlgmr.msra.gmra.mrb[0].mxu0 %v10788_v23  ;;  %7600 = vmatmul.mubr.bf16.vlgmr.msra.gmra.mrb[0].mxu1 %v10788_v23  ;;  %v10892_v23 = vld [vmem:[#allocation2 + $0x1e04] ss:$20 sps:$4 sm:$0xff]  }
 0x2d4   :  { %7052 = vmatpush1.bf16.msra.mxu0 %v10791_v24  ;;  %7611 = vmatpush1.bf16.msra.mxu1 %v10794_v25  ;;  %v10895_v24 = vld [vmem:[#allocation2 + $0x1e0c] ss:$20 sps:$4 sm:$0xff]   ;;  %v11291_v25 = vld [vmem:[%s11403_s0 + $0x58] ss:$100 sps:$4 sm:$0xff]  }
 0x2d5   :  { %7053 = vmatprep.subr.bf16.mxu0 %v10799_v26  ;;  %7612 = vmatprep.subr.bf16.mxu1 %v10802_v27  ;;  %v10890_v26 = vld [vmem:[#allocation2 + $0x1e00] ss:$20 sps:$4 sm:$0xff]   ;;  %v10893_v27 = vld [vmem:[#allocation2 + $0x1e08] ss:$20 sps:$4 sm:$0xff]  }
 0x2d6   :  { %7083 = vmatprep.mubr.bf16.mxu0 %v10889_v28  ;;  %7642 = vmatprep.mubr.bf16.mxu1 %v10889_v28  ;;  %v10898_v28 = vld [vmem:[#allocation2 + $0x1e2c] ss:$20 sps:$4 sm:$0xff]  }
 0x2d8   :  { %7054 = vmatpush1.bf16.msra.mxu0 %v10797_v29  ;;  %7613 = vmatpush1.bf16.msra.mxu1 %v10800_v30  ;;  %v10901_v29 = vld [vmem:[#allocation2 + $0x1e34] ss:$20 sps:$4 sm:$0xff]  }
 0x2d9   :  { %7055 = vmatprep.subr.bf16.mxu0 %v10805_v31  ;;  %7614 = vmatprep.subr.bf16.mxu1 %v10808_v32  ;;  %v10896_v30 = vld [vmem:[#allocation2 + $0x1e28] ss:$20 sps:$4 sm:$0xff]   ;;  %v10899_v31 = vld [vmem:[#allocation2 + $0x1e30] ss:$20 sps:$4 sm:$0xff]  }
 0x2da   :  { %v10904_v32 = vld [vmem:[#allocation2 + $0x1e54] ss:$20 sps:$4 sm:$0xff]  }
 0x2dc   :  { %7056 = vmatpush1.bf16.msra.mxu0 %v10803_v33  ;;  %7615 = vmatpush1.bf16.msra.mxu1 %v10806_v34  ;;  %v10907_v33 = vld [vmem:[#allocation2 + $0x1e5c] ss:$20 sps:$4 sm:$0xff]   ;;  %v11189_v34 = vmov 0  }
 0x2dd   :  { %7057 = vmatprep.subr.bf16.mxu0 %v10811_v35  ;;  %7616 = vmatprep.subr.bf16.mxu1 %v10814_v36  ;;  %v10902_v35 = vld [vmem:[#allocation2 + $0x1e50] ss:$20 sps:$4 sm:$0xff]   ;;  %v10905_v36 = vld [vmem:[#allocation2 + $0x1e58] ss:$20 sps:$4 sm:$0xff]  }
 0x2e0   :  { %7058 = vmatpush1.bf16.msra.mxu0 %v10809_v37  ;;  %7617 = vmatpush1.bf16.msra.mxu1 %v10812_v38  ;;  %v10910_v37 = vld [vmem:[#allocation2 + $0x1e7c] ss:$20 sps:$4 sm:$0xff]   ;;  %v10913_v38 = vld [vmem:[#allocation2 + $0x1e84] ss:$20 sps:$4 sm:$0xff]  }
 0x2e1   :  { %7059 = vmatprep.subr.bf16.mxu0 %v10817_v39  ;;  %7618 = vmatprep.subr.bf16.mxu1 %v10820_v40  ;;  %v10908_v39 = vld [vmem:[#allocation2 + $0x1e78] ss:$20 sps:$4 sm:$0xff]   ;;  %v10911_v40 = vld [vmem:[#allocation2 + $0x1e80] ss:$20 sps:$4 sm:$0xff]  }
 0x2e4   :  { %7060 = vmatpush1.bf16.msra.mxu0 %v10815_v41  ;;  %7619 = vmatpush1.bf16.msra.mxu1 %v10818_v42  ;;  %v10916_v41 = vld [vmem:[#allocation2 + $0x1ea4] ss:$20 sps:$4 sm:$0xff]   ;;  %v10919_v42 = vld [vmem:[#allocation2 + $0x1eac] ss:$20 sps:$4 sm:$0xff]  }
 0x2e5   :  { %7061 = vmatprep.subr.bf16.mxu0 %v10823_v43  ;;  %7620 = vmatprep.subr.bf16.mxu1 %v10826_v44  ;;  %v10914_v43 = vld [vmem:[#allocation2 + $0x1ea0] ss:$20 sps:$4 sm:$0xff]   ;;  %v10917_v44 = vld [vmem:[#allocation2 + $0x1ea8] ss:$20 sps:$4 sm:$0xff]  }
 0x2e8   :  { %7062 = vmatpush1.bf16.msra.mxu0 %v10821_v45  ;;  %7621 = vmatpush1.bf16.msra.mxu1 %v10824_v46  ;;  %v10922_v45 = vld [vmem:[#allocation2 + $0x1ecc] ss:$20 sps:$4 sm:$0xff]   ;;  %v10925_v46 = vld [vmem:[#allocation2 + $0x1ed4] ss:$20 sps:$4 sm:$0xff]  }
 0x2e9   :  { %7063 = vmatprep.subr.bf16.mxu0 %v10829_v47  ;;  %7622 = vmatprep.subr.bf16.mxu1 %v10832_v48  ;;  %v10920_v47 = vld [vmem:[#allocation2 + $0x1ec8] ss:$20 sps:$4 sm:$0xff]   ;;  %v10923_v48 = vld [vmem:[#allocation2 + $0x1ed0] ss:$20 sps:$4 sm:$0xff]  }
 0x2ec   :  { %7064 = vmatpush1.bf16.msra.mxu0 %v10827_v49  ;;  %7623 = vmatpush1.bf16.msra.mxu1 %v10830_v50  ;;  %v10928_v49 = vld [vmem:[#allocation2 + $0x1ef4] ss:$20 sps:$4 sm:$0xff]   ;;  %v10931_v50 = vld [vmem:[#allocation2 + $0x1efc] ss:$20 sps:$4 sm:$0xff]  }
 0x2ed   :  { %7065 = vmatprep.subr.bf16.mxu0 %v10835_v51  ;;  %7624 = vmatprep.subr.bf16.mxu1 %v10838_v52  ;;  %v10926_v51 = vld [vmem:[#allocation2 + $0x1ef0] ss:$20 sps:$4 sm:$0xff]   ;;  %v10929_v52 = vld [vmem:[#allocation2 + $0x1ef8] ss:$20 sps:$4 sm:$0xff]  }
 0x2f0   :  { %7066 = vmatpush1.bf16.msra.mxu0 %v10833_v53  ;;  %7625 = vmatpush1.bf16.msra.mxu1 %v10836_v54  ;;  %v10934_v53 = vld [vmem:[#allocation2 + $0x1f1c] ss:$20 sps:$4 sm:$0xff]   ;;  %v10937_v54 = vld [vmem:[#allocation2 + $0x1f24] ss:$20 sps:$4 sm:$0xff]  }
 0x2f1   :  { %7067 = vmatprep.subr.bf16.mxu0 %v10841_v55  ;;  %7626 = vmatprep.subr.bf16.mxu1 %v10844_v56  ;;  %v10932_v55 = vld [vmem:[#allocation2 + $0x1f18] ss:$20 sps:$4 sm:$0xff]   ;;  %v10935_v56 = vld [vmem:[#allocation2 + $0x1f20] ss:$20 sps:$4 sm:$0xff]  }
 0x2f4   :  { %7068 = vmatpush1.bf16.msra.mxu0 %v10839_v57  ;;  %7627 = vmatpush1.bf16.msra.mxu1 %v10842_v58  ;;  %v10939_v57 = vld [vmem:[#allocation2 + $0x150] ss:$20 sps:$4 sm:$0xff]  }
 0x2f5   :  { %7069 = vmatprep.subr.bf16.mxu0 %v10847_v59  ;;  %7628 = vmatprep.subr.bf16.mxu1 %v10850_v60  ;;  %v10941_v58 = vld [vmem:[#allocation2 + $0x3d0] ss:$20 sps:$4 sm:$0xff]  }
 0x2f6   :  { %v11298_v59 = vld [vmem:[%s11403_s0 + $0x60] ss:$100 sps:$4 sm:$0xff]  }
 0x2f7   :  { %v10940_v60 = vld [vmem:[#allocation2 + $0x10] ss:$20 sps:$4 sm:$0xff]  }
 0x2f8   :  { %7070 = vmatpush1.bf16.msra.mxu0 %v10845_v61  ;;  %7629 = vmatpush1.bf16.msra.mxu1 %v10848_v62  ;;  %v10942_v61 = vld [vmem:[#allocation2 + $0x290] ss:$20 sps:$4 sm:$0xff]   ;;  %v10943_v62 = vld [vmem:[#allocation2 + $0x178] ss:$20 sps:$4 sm:$0xff]  }
 0x2f9   :  { %7071 = vmatprep.subr.bf16.mxu0 %v10853_v63  ;;  %7630 = vmatprep.subr.bf16.mxu1 %v10856_v0  ;;  %v10945_v63 = vld [vmem:[#allocation2 + $0x3f8] ss:$20 sps:$4 sm:$0xff]  }
 0x2fa   :  { %v10944_v0 = vld [vmem:[#allocation2 + $0x38] ss:$20 sps:$4 sm:$0xff]  }
 0x2fc   :  { %7072 = vmatpush1.bf16.msra.mxu0 %v10851_v1  ;;  %7631 = vmatpush1.bf16.msra.mxu1 %v10854_v2  ;;  %v10946_v1 = vld [vmem:[#allocation2 + $0x2b8] ss:$20 sps:$4 sm:$0xff]   ;;  %v10947_v2 = vld [vmem:[#allocation2 + $0x1a0] ss:$20 sps:$4 sm:$0xff]  }
 0x2fd   :  { %7073 = vmatprep.subr.bf16.mxu0 %v10859_v3  ;;  %7632 = vmatprep.subr.bf16.mxu1 %v10862_v4  ;;  %v10949_v3 = vld [vmem:[#allocation2 + $0x420] ss:$20 sps:$4 sm:$0xff]   ;;  %v11139_v4 = vld [vmem:[%s11403_s0 + $0x4] ss:$100 sps:$4 sm:$0xff]  }
 0x300   :  { %7074 = vmatpush1.bf16.msra.mxu0 %v10857_v5  ;;  %7633 = vmatpush1.bf16.msra.mxu1 %v10860_v6  ;;  %v11140_v5 = vld [vmem:[%s11403_s0 + $0xc] ss:$100 sps:$4 sm:$0xff]   ;;  %v10948_v6 = vld [vmem:[#allocation2 + $0x60] ss:$20 sps:$4 sm:$0xff]  }
 0x301   :  { %7075 = vmatprep.subr.bf16.mxu0 %v10865_v7  ;;  %7634 = vmatprep.subr.bf16.mxu1 %v10868_v8  ;;  %v10950_v7 = vld [vmem:[#allocation2 + $0x2e0] ss:$20 sps:$4 sm:$0xff]   ;;  %v10951_v8 = vld [vmem:[#allocation2 + $0x1c8] ss:$20 sps:$4 sm:$0xff]  }
 0x304   :  { %7076 = vmatpush1.bf16.msra.mxu0 %v10863_v9  ;;  %7635 = vmatpush1.bf16.msra.mxu1 %v10866_v10  ;;  %v10953_v9 = vld [vmem:[#allocation2 + $0x448] ss:$20 sps:$4 sm:$0xff]  }
 0x305   :  { %7077 = vmatprep.subr.bf16.mxu0 %v10871_v11  ;;  %7636 = vmatprep.subr.bf16.mxu1 %v10874_v12  ;;  %v10952_v10 = vld [vmem:[#allocation2 + $0x88] ss:$20 sps:$4 sm:$0xff]   ;;  %v10955_v12 = vld [vmem:[#allocation2 + $0x1f0] ss:$20 sps:$4 sm:$0xff]  }
 0x306   :  { %v10954_v11 = vld [vmem:[#allocation2 + $0x308] ss:$20 sps:$4 sm:$0xff]  }
 0x308   :  { %7078 = vmatpush1.bf16.msra.mxu0 %v10869_v13  ;;  %7637 = vmatpush1.bf16.msra.mxu1 %v10872_v14  ;;  %v10957_v13 = vld [vmem:[#allocation2 + $0x470] ss:$20 sps:$4 sm:$0xff]  }
 0x309   :  { %7079 = vmatprep.subr.bf16.mxu0 %v10877_v15  ;;  %7638 = vmatprep.subr.bf16.mxu1 %v10880_v16  ;;  %v10956_v14 = vld [vmem:[#allocation2 + $0xb0] ss:$20 sps:$4 sm:$0xff]   ;;  %v10959_v16 = vld [vmem:[#allocation2 + $0x218] ss:$20 sps:$4 sm:$0xff]  }
 0x30a   :  { %v10958_v15 = vld [vmem:[#allocation2 + $0x330] ss:$20 sps:$4 sm:$0xff]  }
 0x30c   :  { %7080 = vmatpush1.bf16.msra.mxu0 %v10875_v17  ;;  %7639 = vmatpush1.bf16.msra.mxu1 %v10878_v18  ;;  %v10961_v17 = vld [vmem:[#allocation2 + $0x498] ss:$20 sps:$4 sm:$0xff]  }
 0x30d   :  { %7081 = vmatprep.subr.bf16.mxu0 %v10883_v19  ;;  %7640 = vmatprep.subr.bf16.mxu1 %v10886_v20  ;;  %v10960_v18 = vld [vmem:[#allocation2 + $0xd8] ss:$20 sps:$4 sm:$0xff]   ;;  %v10963_v20 = vld [vmem:[#allocation2 + $0x240] ss:$20 sps:$4 sm:$0xff]  }
 0x30e   :  { %v10962_v19 = vld [vmem:[#allocation2 + $0x358] ss:$20 sps:$4 sm:$0xff]  }
 0x310   :  { %7082 = vmatpush1.bf16.msra.mxu0 %v10881_v21  ;;  %7641 = vmatpush1.bf16.msra.mxu1 %v10884_v22  ;;  %v10965_v21 = vld [vmem:[#allocation2 + $0x4c0] ss:$20 sps:$4 sm:$0xff]  }
 0x311   :  { %7094 = vmatprep.subr.bf16.mxu0 %v10892_v23  ;;  %7653 = vmatprep.subr.bf16.mxu1 %v10895_v24  ;;  %v10964_v22 = vld [vmem:[#allocation2 + $0x100] ss:$20 sps:$4 sm:$0xff]   ;;  %v10967_v24 = vld [vmem:[#allocation2 + $0x268] ss:$20 sps:$4 sm:$0xff]  }
 0x312   :  { %v10966_v23 = vld [vmem:[#allocation2 + $0x380] ss:$20 sps:$4 sm:$0xff]  }
 0x313   :  { %7084 = vmatmul.mubr.bf16.vlgmr.msra.gmra.mrb[0].mxu0 %v11291_v25  ;;  %7643 = vmatmul.mubr.bf16.vlgmr.msra.gmra.mrb[0].mxu1 %v11291_v25 }
 0x314   :  { %7095 = vmatpush1.bf16.msra.mxu0 %v10890_v26  ;;  %7654 = vmatpush1.bf16.msra.mxu1 %v10893_v27  ;;  %v10969_v26 = vld [vmem:[#allocation2 + $0x4e8] ss:$20 sps:$4 sm:$0xff]  }
 0x315   :  { %7096 = vmatprep.subr.bf16.mxu0 %v10898_v28  ;;  %7655 = vmatprep.subr.bf16.mxu1 %v10901_v29  ;;  %v10968_v27 = vld [vmem:[#allocation2 + $0x128] ss:$20 sps:$4 sm:$0xff]   ;;  %v10971_v29 = vld [vmem:[#allocation2 + $0x650] ss:$20 sps:$4 sm:$0xff]  }
 0x316   :  { %7126 = vmatprep.mubr.bf16.mxu0 %v11189_v34  ;;  %7685 = vmatprep.mubr.bf16.mxu1 %v11189_v34  ;;  %v10970_v28 = vld [vmem:[#allocation2 + $0x3a8] ss:$20 sps:$4 sm:$0xff]   ;;  %v10977_v34 = vld [vmem:[#allocation2 + $0x8f8] ss:$20 sps:$4 sm:$0xff]  }
 0x318   :  { %7097 = vmatpush1.bf16.msra.mxu0 %v10896_v30  ;;  %7656 = vmatpush1.bf16.msra.mxu1 %v10899_v31  ;;  %v10973_v30 = vld [vmem:[#allocation2 + $0x8d0] ss:$20 sps:$4 sm:$0xff]  }
 0x319   :  { %7098 = vmatprep.subr.bf16.mxu0 %v10904_v32  ;;  %7657 = vmatprep.subr.bf16.mxu1 %v10907_v33  ;;  %v10972_v31 = vld [vmem:[#allocation2 + $0x510] ss:$20 sps:$4 sm:$0xff]   ;;  %v10975_v33 = vld [vmem:[#allocation2 + $0x678] ss:$20 sps:$4 sm:$0xff]  }
 0x31a   :  { %v10974_v32 = vld [vmem:[#allocation2 + $0x790] ss:$20 sps:$4 sm:$0xff]  }
 0x31c   :  { %7099 = vmatpush1.bf16.msra.mxu0 %v10902_v35  ;;  %7658 = vmatpush1.bf16.msra.mxu1 %v10905_v36  ;;  %v11141_v35 = vld [vmem:[%s11403_s0] ss:$100 sps:$4 sm:$0xff]   ;;  %v11142_v36 = vld [vmem:[%s11403_s0 + $0x8] ss:$100 sps:$4 sm:$0xff]  }
 0x31d   :  { %7100 = vmatprep.subr.bf16.mxu0 %v10910_v37  ;;  %7659 = vmatprep.subr.bf16.mxu1 %v10913_v38  ;;  %v10976_v37 = vld [vmem:[#allocation2 + $0x538] ss:$20 sps:$4 sm:$0xff]  }
 0x31e   :  { %v10978_v38 = vld [vmem:[#allocation2 + $0x7b8] ss:$20 sps:$4 sm:$0xff]  }
 0x320   :  { %7101 = vmatpush1.bf16.msra.mxu0 %v10908_v39  ;;  %7660 = vmatpush1.bf16.msra.mxu1 %v10911_v40  ;;  %v10979_v39 = vld [vmem:[#allocation2 + $0x6a0] ss:$20 sps:$4 sm:$0xff]  }
 0x321   :  { %7102 = vmatprep.subr.bf16.mxu0 %v10916_v41  ;;  %7661 = vmatprep.subr.bf16.mxu1 %v10919_v42  ;;  %v10981_v40 = vld [vmem:[#allocation2 + $0x920] ss:$20 sps:$4 sm:$0xff]  }
 0x322   :  { %v11143_v41 = vld [vmem:[%s11403_s0 + $0x14] ss:$100 sps:$4 sm:$0xff]   ;;  %v11144_v42 = vld [vmem:[%s11403_s0 + $0x1c] ss:$100 sps:$4 sm:$0xff]  }
 0x324   :  { %7103 = vmatpush1.bf16.msra.mxu0 %v10914_v43  ;;  %7662 = vmatpush1.bf16.msra.mxu1 %v10917_v44  ;;  %v10980_v43 = vld [vmem:[#allocation2 + $0x560] ss:$20 sps:$4 sm:$0xff]  }
 0x325   :  { %7104 = vmatprep.subr.bf16.mxu0 %v10922_v45  ;;  %7663 = vmatprep.subr.bf16.mxu1 %v10925_v46  ;;  %v10982_v44 = vld [vmem:[#allocation2 + $0x7e0] ss:$20 sps:$4 sm:$0xff]   ;;  %v10983_v45 = vld [vmem:[#allocation2 + $0x6c8] ss:$20 sps:$4 sm:$0xff]  }
 0x326   :  { %v10985_v46 = vld [vmem:[#allocation2 + $0x948] ss:$20 sps:$4 sm:$0xff]  }
 0x328   :  { %7105 = vmatpush1.bf16.msra.mxu0 %v10920_v47  ;;  %7664 = vmatpush1.bf16.msra.mxu1 %v10923_v48  ;;  %v10984_v47 = vld [vmem:[#allocation2 + $0x588] ss:$20 sps:$4 sm:$0xff]  }
 0x329   :  { %7106 = vmatprep.subr.bf16.mxu0 %v10928_v49  ;;  %7665 = vmatprep.subr.bf16.mxu1 %v10931_v50  ;;  %v10986_v48 = vld [vmem:[#allocation2 + $0x808] ss:$20 sps:$4 sm:$0xff]   ;;  %v10987_v49 = vld [vmem:[#allocation2 + $0x6f0] ss:$20 sps:$4 sm:$0xff]  }
 0x32a   :  { %v10989_v50 = vld [vmem:[#allocation2 + $0x970] ss:$20 sps:$4 sm:$0xff]  }
 0x32c   :  { %7107 = vmatpush1.bf16.msra.mxu0 %v10926_v51  ;;  %7666 = vmatpush1.bf16.msra.mxu1 %v10929_v52  ;;  %v10988_v51 = vld [vmem:[#allocation2 + $0x5b0] ss:$20 sps:$4 sm:$0xff]  }
 0x32d   :  { %7108 = vmatprep.subr.bf16.mxu0 %v10934_v53  ;;  %7667 = vmatprep.subr.bf16.mxu1 %v10937_v54  ;;  %v10990_v52 = vld [vmem:[#allocation2 + $0x830] ss:$20 sps:$4 sm:$0xff]   ;;  %v10991_v53 = vld [vmem:[#allocation2 + $0x718] ss:$20 sps:$4 sm:$0xff]  }
 0x32e   :  { %v10993_v54 = vld [vmem:[#allocation2 + $0x998] ss:$20 sps:$4 sm:$0xff]  }
 0x330   :  { %7109 = vmatpush1.bf16.msra.mxu0 %v10932_v55  ;;  %7668 = vmatpush1.bf16.msra.mxu1 %v10935_v56  ;;  %v10992_v55 = vld [vmem:[#allocation2 + $0x5d8] ss:$20 sps:$4 sm:$0xff]  }
 0x331   :  { %9299 = vmatprep.subr.bf16.mxu0 %v10939_v57  ;;  %9321 = vmatprep.subr.bf16.mxu1 %v10941_v58  ;;  %v10994_v56 = vld [vmem:[#allocation2 + $0x858] ss:$20 sps:$4 sm:$0xff]   ;;  %v10995_v57 = vld [vmem:[#allocation2 + $0x740] ss:$20 sps:$4 sm:$0xff]  }
 0x332   :  { %v10997_v58 = vld [vmem:[#allocation2 + $0x9c0] ss:$20 sps:$4 sm:$0xff]  }
 0x333   :  { %7127 = vmatmul.mubr.bf16.vlgmr.msra.gmra.mrb[0].mxu0 %v11298_v59  ;;  %7686 = vmatmul.mubr.bf16.vlgmr.msra.gmra.mrb[0].mxu1 %v11298_v59 }
 0x334   :  { %9300 = vmatpush3.bf16.msra.mxu0 %v10940_v60  ;;  %9322 = vmatpush3.bf16.msra.mxu1 %v10942_v61  ;;  %v10996_v60 = vld [vmem:[#allocation2 + $0x600] ss:$20 sps:$4 sm:$0xff]  }
 0x335   :  { %9301 = vmatprep.subr.bf16.mxu0 %v10943_v62  ;;  %9323 = vmatprep.subr.bf16.mxu1 %v10945_v63  ;;  %v10998_v61 = vld [vmem:[#allocation2 + $0x880] ss:$20 sps:$4 sm:$0xff]   ;;  %v10999_v62 = vld [vmem:[#allocation2 + $0x768] ss:$20 sps:$4 sm:$0xff]  }
 0x336   :  { %7728 = vmatprep.mubr.bf16.mxu0 %v11139_v4  ;;  %7769 = vmatprep.mubr.bf16.mxu1 %v11140_v5  ;;  %v11001_v63 = vld [vmem:[#allocation2 + $0x9e8] ss:$20 sps:$4 sm:$0xff]   ;;  %v11004_v4 = vld [vmem:[#allocation2 + $0xa10] ss:$20 sps:$4 sm:$0xff]  }
 0x337   :  { %v11006_v5 = vld [vmem:[#allocation2 + $0xc90] ss:$20 sps:$4 sm:$0xff]  }
 0x338   :  { %9302 = vmatpush3.bf16.msra.mxu0 %v10944_v0  ;;  %9324 = vmatpush3.bf16.msra.mxu1 %v10946_v1  ;;  %v11000_v0 = vld [vmem:[#allocation2 + $0x628] ss:$20 sps:$4 sm:$0xff]  }
 0x339   :  { %9303 = vmatprep.subr.bf16.mxu0 %v10947_v2  ;;  %9325 = vmatprep.subr.bf16.mxu1 %v10949_v3  ;;  %v11002_v1 = vld [vmem:[#allocation2 + $0x8a8] ss:$20 sps:$4 sm:$0xff]   ;;  %v11003_v2 = vld [vmem:[#allocation2 + $0xb50] ss:$20 sps:$4 sm:$0xff]  }
 0x33a   :  { %v11005_v3 = vld [vmem:[#allocation2 + $0xdd0] ss:$20 sps:$4 sm:$0xff]  }
 0x33c   :  { %9304 = vmatpush3.bf16.msra.mxu0 %v10948_v6  ;;  %9326 = vmatpush3.bf16.msra.mxu1 %v10950_v7  ;;  %v11007_v6 = vld [vmem:[#allocation2 + $0xb78] ss:$20 sps:$4 sm:$0xff]  }
 0x33d   :  { %9305 = vmatprep.subr.bf16.mxu0 %v10951_v8  ;;  %9327 = vmatprep.subr.bf16.mxu1 %v10953_v9  ;;  %v11009_v7 = vld [vmem:[#allocation2 + $0xdf8] ss:$20 sps:$4 sm:$0xff]   ;;  %v11145_v8 = vld [vmem:[%s11403_s0 + $0x10] ss:$100 sps:$4 sm:$0xff]  }
 0x33e   :  { %v11146_v9 = vld [vmem:[%s11403_s0 + $0x18] ss:$100 sps:$4 sm:$0xff]  }
 0x340   :  { %9306 = vmatpush3.bf16.msra.mxu0 %v10952_v10  ;;  %9328 = vmatpush3.bf16.msra.mxu1 %v10954_v11  ;;  %v11008_v10 = vld [vmem:[#allocation2 + $0xa38] ss:$20 sps:$4 sm:$0xff]  }
 0x341   :  { %9307 = vmatprep.subr.bf16.mxu0 %v10955_v12  ;;  %9329 = vmatprep.subr.bf16.mxu1 %v10957_v13  ;;  %v11010_v11 = vld [vmem:[#allocation2 + $0xcb8] ss:$20 sps:$4 sm:$0xff]   ;;  %v11011_v12 = vld [vmem:[#allocation2 + $0xba0] ss:$20 sps:$4 sm:$0xff]  }
 0x342   :  { %v11013_v13 = vld [vmem:[#allocation2 + $0xe20] ss:$20 sps:$4 sm:$0xff]  }
 0x344   :  { %9308 = vmatpush3.bf16.msra.mxu0 %v10956_v14  ;;  %9330 = vmatpush3.bf16.msra.mxu1 %v10958_v15  ;;  %v11147_v14 = vld [vmem:[%s11403_s0 + $0x24] ss:$100 sps:$4 sm:$0xff]   ;;  %v11148_v15 = vld [vmem:[%s11403_s0 + $0x2c] ss:$100 sps:$4 sm:$0xff]  }
 0x345   :  { %9309 = vmatprep.subr.bf16.mxu0 %v10959_v16  ;;  %9331 = vmatprep.subr.bf16.mxu1 %v10961_v17  ;;  %v11012_v16 = vld [vmem:[#allocation2 + $0xa60] ss:$20 sps:$4 sm:$0xff]  }
 0x346   :  { %v11014_v17 = vld [vmem:[#allocation2 + $0xce0] ss:$20 sps:$4 sm:$0xff]  }
 0x348   :  { %9310 = vmatpush3.bf16.msra.mxu0 %v10960_v18  ;;  %9332 = vmatpush3.bf16.msra.mxu1 %v10962_v19  ;;  %v11015_v18 = vld [vmem:[#allocation2 + $0xbc8] ss:$20 sps:$4 sm:$0xff]  }
 0x349   :  { %9311 = vmatprep.subr.bf16.mxu0 %v10963_v20  ;;  %9333 = vmatprep.subr.bf16.mxu1 %v10965_v21  ;;  %v11017_v19 = vld [vmem:[#allocation2 + $0xe48] ss:$20 sps:$4 sm:$0xff]  }
 0x34a   :  { %v11016_v20 = vld [vmem:[#allocation2 + $0xa88] ss:$20 sps:$4 sm:$0xff]  }
 0x34b   :  { %v11018_v21 = vld [vmem:[#allocation2 + $0xd08] ss:$20 sps:$4 sm:$0xff]  }
 0x34c   :  { %9312 = vmatpush3.bf16.msra.mxu0 %v10964_v22  ;;  %9334 = vmatpush3.bf16.msra.mxu1 %v10966_v23  ;;  %v11019_v22 = vld [vmem:[#allocation2 + $0xbf0] ss:$20 sps:$4 sm:$0xff]  }
 0x34d   :  { %9313 = vmatprep.subr.bf16.mxu0 %v10967_v24  ;;  %9335 = vmatprep.subr.bf16.mxu1 %v10969_v26  ;;  %v11021_v23 = vld [vmem:[#allocation2 + $0xe70] ss:$20 sps:$4 sm:$0xff]  }
 0x34e   :  { %v11020_v24 = vld [vmem:[#allocation2 + $0xab0] ss:$20 sps:$4 sm:$0xff]  }
 0x34f   :  { %v11022_v26 = vld [vmem:[#allocation2 + $0xd30] ss:$20 sps:$4 sm:$0xff]  }
 0x350   :  { %9314 = vmatpush3.bf16.msra.mxu0 %v10968_v27  ;;  %9336 = vmatpush3.bf16.msra.mxu1 %v10970_v28  ;;  %v11023_v27 = vld [vmem:[#allocation2 + $0xc18] ss:$20 sps:$4 sm:$0xff]  }
 0x351   :  { %9343 = vmatprep.subr.bf16.mxu0 %v10971_v29  ;;  %9365 = vmatprep.subr.bf16.mxu1 %v10973_v30  ;;  %v11025_v28 = vld [vmem:[#allocation2 + $0xe98] ss:$20 sps:$4 sm:$0xff]  }
 0x352   :  { %v11024_v29 = vld [vmem:[#allocation2 + $0xad8] ss:$20 sps:$4 sm:$0xff]  }
 0x353   :  { %7729 = vmatmul.mubr.bf16.vlgmr.msra.gmra.mrb[4].mxu0 %v11141_v35  ;;  %7770 = vmatmul.mubr.bf16.vlgmr.msra.gmra.mrb[4].mxu1 %v11142_v36  ;;  %v11026_v30 = vld [vmem:[#allocation2 + $0xd58] ss:$20 sps:$4 sm:$0xff]   ;;  %v11031_v35 = vld [vmem:[#allocation2 + $0xc68] ss:$20 sps:$4 sm:$0xff]  }
 0x354   :  { %9344 = vmatpush3.bf16.msra.mxu0 %v10972_v31  ;;  %9366 = vmatpush3.bf16.msra.mxu1 %v10974_v32  ;;  %v11027_v31 = vld [vmem:[#allocation2 + $0xc40] ss:$20 sps:$4 sm:$0xff]   ;;  %v11033_v36 = vld [vmem:[#allocation2 + $0xee8] ss:$20 sps:$4 sm:$0xff]  }
 0x355   :  { %9345 = vmatprep.subr.bf16.mxu0 %v10975_v33  ;;  %9367 = vmatprep.subr.bf16.mxu1 %v10977_v34  ;;  %v11029_v32 = vld [vmem:[#allocation2 + $0xec0] ss:$20 sps:$4 sm:$0xff]  }
 0x356   :  { %7810 = vmatprep.mubr.bf16.mxu0 %v11143_v41  ;;  %7851 = vmatprep.mubr.bf16.mxu1 %v11144_v42  ;;  %v11028_v33 = vld [vmem:[#allocation2 + $0xb00] ss:$20 sps:$4 sm:$0xff]   ;;  %v11036_v41 = vld [vmem:[#allocation2 + $0xf10] ss:$20 sps:$4 sm:$0xff]  }
 0x357   :  { %v11030_v34 = vld [vmem:[#allocation2 + $0xd80] ss:$20 sps:$4 sm:$0xff]   ;;  %v11038_v42 = vld [vmem:[#allocation2 + $0x1190] ss:$20 sps:$4 sm:$0xff]  }
 0x358   :  { %9346 = vmatpush3.bf16.msra.mxu0 %v10976_v37  ;;  %9368 = vmatpush3.bf16.msra.mxu1 %v10978_v38  ;;  %v11032_v37 = vld [vmem:[#allocation2 + $0xb28] ss:$20 sps:$4 sm:$0xff]  }
 0x359   :  { %9347 = vmatprep.subr.bf16.mxu0 %v10979_v39  ;;  %9369 = vmatprep.subr.bf16.mxu1 %v10981_v40  ;;  %v11034_v38 = vld [vmem:[#allocation2 + $0xda8] ss:$20 sps:$4 sm:$0xff]   ;;  %v11035_v39 = vld [vmem:[#allocation2 + $0x1050] ss:$20 sps:$4 sm:$0xff]  }
 0x35a   :  { %v11037_v40 = vld [vmem:[#allocation2 + $0x12d0] ss:$20 sps:$4 sm:$0xff]  }
 0x35c   :  { %9348 = vmatpush3.bf16.msra.mxu0 %v10980_v43  ;;  %9370 = vmatpush3.bf16.msra.mxu1 %v10982_v44  ;;  %v11039_v43 = vld [vmem:[#allocation2 + $0x1078] ss:$20 sps:$4 sm:$0xff]  }
 0x35d   :  { %9349 = vmatprep.subr.bf16.mxu0 %v10983_v45  ;;  %9371 = vmatprep.subr.bf16.mxu1 %v10985_v46  ;;  %v11041_v44 = vld [vmem:[#allocation2 + $0x12f8] ss:$20 sps:$4 sm:$0xff]   ;;  %v11149_v45 = vld [vmem:[%s11403_s0 + $0x20] ss:$100 sps:$4 sm:$0xff]  }
 0x35e   :  { %v11150_v46 = vld [vmem:[%s11403_s0 + $0x28] ss:$100 sps:$4 sm:$0xff]  }
 0x360   :  { %9350 = vmatpush3.bf16.msra.mxu0 %v10984_v47  ;;  %9372 = vmatpush3.bf16.msra.mxu1 %v10986_v48  ;;  %v11040_v47 = vld [vmem:[#allocation2 + $0xf38] ss:$20 sps:$4 sm:$0xff]  }
 0x361   :  { %9351 = vmatprep.subr.bf16.mxu0 %v10987_v49  ;;  %9373 = vmatprep.subr.bf16.mxu1 %v10989_v50  ;;  %v11042_v48 = vld [vmem:[#allocation2 + $0x11b8] ss:$20 sps:$4 sm:$0xff]   ;;  %v11043_v49 = vld [vmem:[#allocation2 + $0x10a0] ss:$20 sps:$4 sm:$0xff]  }
 0x362   :  { %v11045_v50 = vld [vmem:[#allocation2 + $0x1320] ss:$20 sps:$4 sm:$0xff]  }
 0x364   :  { %9352 = vmatpush3.bf16.msra.mxu0 %v10988_v51  ;;  %9374 = vmatpush3.bf16.msra.mxu1 %v10990_v52  ;;  %v11151_v51 = vld [vmem:[%s11403_s0 + $0x34] ss:$100 sps:$4 sm:$0xff]   ;;  %v11152_v52 = vld [vmem:[%s11403_s0 + $0x3c] ss:$100 sps:$4 sm:$0xff]  }
 0x365   :  { %9353 = vmatprep.subr.bf16.mxu0 %v10991_v53  ;;  %9375 = vmatprep.subr.bf16.mxu1 %v10993_v54  ;;  %v11044_v53 = vld [vmem:[#allocation2 + $0xf60] ss:$20 sps:$4 sm:$0xff]  }
 0x366   :  { %v11046_v54 = vld [vmem:[#allocation2 + $0x11e0] ss:$20 sps:$4 sm:$0xff]  }
 0x368   :  { %9354 = vmatpush3.bf16.msra.mxu0 %v10992_v55  ;;  %9376 = vmatpush3.bf16.msra.mxu1 %v10994_v56  ;;  %v11047_v55 = vld [vmem:[#allocation2 + $0x10c8] ss:$20 sps:$4 sm:$0xff]  }
 0x369   :  { %9355 = vmatprep.subr.bf16.mxu0 %v10995_v57  ;;  %9377 = vmatprep.subr.bf16.mxu1 %v10997_v58  ;;  %v11049_v56 = vld [vmem:[#allocation2 + $0x1348] ss:$20 sps:$4 sm:$0xff]  }
 0x36a   :  { %v11048_v57 = vld [vmem:[#allocation2 + $0xf88] ss:$20 sps:$4 sm:$0xff]  }
 0x36b   :  { %v11050_v58 = vld [vmem:[#allocation2 + $0x1208] ss:$20 sps:$4 sm:$0xff]  }
 0x36c   :  { %9356 = vmatpush3.bf16.msra.mxu0 %v10996_v60  ;;  %9378 = vmatpush3.bf16.msra.mxu1 %v10998_v61  ;;  %v11051_v60 = vld [vmem:[#allocation2 + $0x10f0] ss:$20 sps:$4 sm:$0xff]  }
 0x36d   :  { %9357 = vmatprep.subr.bf16.mxu0 %v10999_v62  ;;  %9379 = vmatprep.subr.bf16.mxu1 %v11001_v63  ;;  %v11053_v61 = vld [vmem:[#allocation2 + $0x1370] ss:$20 sps:$4 sm:$0xff]  }
 0x36e   :  { %v11052_v62 = vld [vmem:[#allocation2 + $0xfb0] ss:$20 sps:$4 sm:$0xff]  }
 0x36f   :  { %v11054_v63 = vld [vmem:[#allocation2 + $0x1230] ss:$20 sps:$4 sm:$0xff]  }
 0x370   :  { %9358 = vmatpush3.bf16.msra.mxu0 %v11000_v0  ;;  %9380 = vmatpush3.bf16.msra.mxu1 %v11002_v1  ;;  %v11055_v0 = vld [vmem:[#allocation2 + $0x1118] ss:$20 sps:$4 sm:$0xff]  }
 0x371   :  { %9387 = vmatprep.subr.bf16.mxu0 %v11003_v2  ;;  %9409 = vmatprep.subr.bf16.mxu1 %v11005_v3  ;;  %v11057_v1 = vld [vmem:[#allocation2 + $0x1398] ss:$20 sps:$4 sm:$0xff]  }
 0x372   :  { %v11056_v2 = vld [vmem:[#allocation2 + $0xfd8] ss:$20 sps:$4 sm:$0xff]  }
 0x373   :  { %7811 = vmatmul.mubr.bf16.vlgmr.msra.gmra.mrb[8].mxu0 %v11145_v8  ;;  %7852 = vmatmul.mubr.bf16.vlgmr.msra.gmra.mrb[8].mxu1 %v11146_v9  ;;  %v11058_v3 = vld [vmem:[#allocation2 + $0x1258] ss:$20 sps:$4 sm:$0xff]   ;;  %v11063_v8 = vld [vmem:[#allocation2 + $0x1168] ss:$20 sps:$4 sm:$0xff]  }
 0x374   :  { %9388 = vmatpush3.bf16.msra.mxu0 %v11004_v4  ;;  %9410 = vmatpush3.bf16.msra.mxu1 %v11006_v5  ;;  %v11059_v4 = vld [vmem:[#allocation2 + $0x1140] ss:$20 sps:$4 sm:$0xff]   ;;  %v11065_v9 = vld [vmem:[#allocation2 + $0x13e8] ss:$20 sps:$4 sm:$0xff]  }
 0x375   :  { %9389 = vmatprep.subr.bf16.mxu0 %v11007_v6  ;;  %9411 = vmatprep.subr.bf16.mxu1 %v11009_v7  ;;  %v11061_v5 = vld [vmem:[#allocation2 + $0x13c0] ss:$20 sps:$4 sm:$0xff]  }
 0x376   :  { %7892 = vmatprep.mubr.bf16.mxu0 %v11147_v14  ;;  %7933 = vmatprep.mubr.bf16.mxu1 %v11148_v15  ;;  %v11060_v6 = vld [vmem:[#allocation2 + $0x1000] ss:$20 sps:$4 sm:$0xff]   ;;  %v11068_v14 = vld [vmem:[#allocation2 + $0x1410] ss:$20 sps:$4 sm:$0xff]  }
 0x377   :  { %v11062_v7 = vld [vmem:[#allocation2 + $0x1280] ss:$20 sps:$4 sm:$0xff]   ;;  %v11070_v15 = vld [vmem:[#allocation2 + $0x1690] ss:$20 sps:$4 sm:$0xff]  }
 0x378   :  { %9390 = vmatpush3.bf16.msra.mxu0 %v11008_v10  ;;  %9412 = vmatpush3.bf16.msra.mxu1 %v11010_v11  ;;  %v11064_v10 = vld [vmem:[#allocation2 + $0x1028] ss:$20 sps:$4 sm:$0xff]  }
 0x379   :  { %9391 = vmatprep.subr.bf16.mxu0 %v11011_v12  ;;  %9413 = vmatprep.subr.bf16.mxu1 %v11013_v13  ;;  %v11066_v11 = vld [vmem:[#allocation2 + $0x12a8] ss:$20 sps:$4 sm:$0xff]   ;;  %v11067_v12 = vld [vmem:[#allocation2 + $0x1550] ss:$20 sps:$4 sm:$0xff]  }
 0x37a   :  { %v11069_v13 = vld [vmem:[#allocation2 + $0x17d0] ss:$20 sps:$4 sm:$0xff]  }
 0x37c   :  { %9392 = vmatpush3.bf16.msra.mxu0 %v11012_v16  ;;  %9414 = vmatpush3.bf16.msra.mxu1 %v11014_v17  ;;  %v11071_v16 = vld [vmem:[#allocation2 + $0x1578] ss:$20 sps:$4 sm:$0xff]  }
 0x37d   :  { %9393 = vmatprep.subr.bf16.mxu0 %v11015_v18  ;;  %9415 = vmatprep.subr.bf16.mxu1 %v11017_v19  ;;  %v11073_v17 = vld [vmem:[#allocation2 + $0x17f8] ss:$20 sps:$4 sm:$0xff]   ;;  %v11153_v18 = vld [vmem:[%s11403_s0 + $0x30] ss:$100 sps:$4 sm:$0xff]  }
 0x37e   :  { %v11154_v19 = vld [vmem:[%s11403_s0 + $0x38] ss:$100 sps:$4 sm:$0xff]  }
 0x380   :  { %9394 = vmatpush3.bf16.msra.mxu0 %v11016_v20  ;;  %9416 = vmatpush3.bf16.msra.mxu1 %v11018_v21  ;;  %v11072_v20 = vld [vmem:[#allocation2 + $0x1438] ss:$20 sps:$4 sm:$0xff]  }
 0x381   :  { %9395 = vmatprep.subr.bf16.mxu0 %v11019_v22  ;;  %9417 = vmatprep.subr.bf16.mxu1 %v11021_v23  ;;  %v11074_v21 = vld [vmem:[#allocation2 + $0x16b8] ss:$20 sps:$4 sm:$0xff]   ;;  %v11075_v22 = vld [vmem:[#allocation2 + $0x15a0] ss:$20 sps:$4 sm:$0xff]  }
 0x382   :  { %v11077_v23 = vld [vmem:[#allocation2 + $0x1820] ss:$20 sps:$4 sm:$0xff]  }
 0x384   :  { %9396 = vmatpush3.bf16.msra.mxu0 %v11020_v24  ;;  %9418 = vmatpush3.bf16.msra.mxu1 %v11022_v26  ;;  %v11155_v24 = vld [vmem:[%s11403_s0 + $0x44] ss:$100 sps:$4 sm:$0xff]   ;;  %v11156_v26 = vld [vmem:[%s11403_s0 + $0x4c] ss:$100 sps:$4 sm:$0xff]  }
 0x385   :  { %9397 = vmatprep.subr.bf16.mxu0 %v11023_v27  ;;  %9419 = vmatprep.subr.bf16.mxu1 %v11025_v28  ;;  %v11076_v27 = vld [vmem:[#allocation2 + $0x1460] ss:$20 sps:$4 sm:$0xff]  }
 0x386   :  { %v11078_v28 = vld [vmem:[#allocation2 + $0x16e0] ss:$20 sps:$4 sm:$0xff]  }
 0x388   :  { %9398 = vmatpush3.bf16.msra.mxu0 %v11024_v29  ;;  %9420 = vmatpush3.bf16.msra.mxu1 %v11026_v30  ;;  %v11079_v29 = vld [vmem:[#allocation2 + $0x15c8] ss:$20 sps:$4 sm:$0xff]  }
 0x389   :  { %9399 = vmatprep.subr.bf16.mxu0 %v11027_v31  ;;  %9421 = vmatprep.subr.bf16.mxu1 %v11029_v32  ;;  %v11081_v30 = vld [vmem:[#allocation2 + $0x1848] ss:$20 sps:$4 sm:$0xff]  }
 0x38a   :  { %v11080_v31 = vld [vmem:[#allocation2 + $0x1488] ss:$20 sps:$4 sm:$0xff]  }
 0x38b   :  { %v11082_v32 = vld [vmem:[#allocation2 + $0x1708] ss:$20 sps:$4 sm:$0xff]  }
 0x38c   :  { %9400 = vmatpush3.bf16.msra.mxu0 %v11028_v33  ;;  %9422 = vmatpush3.bf16.msra.mxu1 %v11030_v34  ;;  %v11083_v33 = vld [vmem:[#allocation2 + $0x15f0] ss:$20 sps:$4 sm:$0xff]  }
 0x38d   :  { %9401 = vmatprep.subr.bf16.mxu0 %v11031_v35  ;;  %9423 = vmatprep.subr.bf16.mxu1 %v11033_v36  ;;  %v11085_v34 = vld [vmem:[#allocation2 + $0x1870] ss:$20 sps:$4 sm:$0xff]  }
 0x38e   :  { %v11084_v35 = vld [vmem:[#allocation2 + $0x14b0] ss:$20 sps:$4 sm:$0xff]  }
 0x38f   :  { %v11086_v36 = vld [vmem:[#allocation2 + $0x1730] ss:$20 sps:$4 sm:$0xff]  }
 0x390   :  { %9402 = vmatpush3.bf16.msra.mxu0 %v11032_v37  ;;  %9424 = vmatpush3.bf16.msra.mxu1 %v11034_v38  ;;  %v11087_v37 = vld [vmem:[#allocation2 + $0x1618] ss:$20 sps:$4 sm:$0xff]  }
 0x391   :  { %9431 = vmatprep.subr.bf16.mxu0 %v11035_v39  ;;  %9453 = vmatprep.subr.bf16.mxu1 %v11037_v40  ;;  %v11089_v38 = vld [vmem:[#allocation2 + $0x1898] ss:$20 sps:$4 sm:$0xff]  }
 0x392   :  { %v11088_v39 = vld [vmem:[#allocation2 + $0x14d8] ss:$20 sps:$4 sm:$0xff]  }
 0x393   :  { %7893 = vmatmul.mubr.bf16.vlgmr.msra.gmra.mrb[12].mxu0 %v11149_v45  ;;  %7934 = vmatmul.mubr.bf16.vlgmr.msra.gmra.mrb[12].mxu1 %v11150_v46  ;;  %v11090_v40 = vld [vmem:[#allocation2 + $0x1758] ss:$20 sps:$4 sm:$0xff]   ;;  %v11095_v45 = vld [vmem:[#allocation2 + $0x1668] ss:$20 sps:$4 sm:$0xff]  }
 0x394   :  { %9432 = vmatpush3.bf16.msra.mxu0 %v11036_v41  ;;  %9454 = vmatpush3.bf16.msra.mxu1 %v11038_v42  ;;  %v11091_v41 = vld [vmem:[#allocation2 + $0x1640] ss:$20 sps:$4 sm:$0xff]   ;;  %v11097_v46 = vld [vmem:[#allocation2 + $0x18e8] ss:$20 sps:$4 sm:$0xff]  }
 0x395   :  { %9433 = vmatprep.subr.bf16.mxu0 %v11039_v43  ;;  %9455 = vmatprep.subr.bf16.mxu1 %v11041_v44  ;;  %v11093_v42 = vld [vmem:[#allocation2 + $0x18c0] ss:$20 sps:$4 sm:$0xff]  }
 0x396   :  { %7974 = vmatprep.mubr.bf16.mxu0 %v11151_v51  ;;  %8015 = vmatprep.mubr.bf16.mxu1 %v11152_v52  ;;  %v11092_v43 = vld [vmem:[#allocation2 + $0x1500] ss:$20 sps:$4 sm:$0xff]   ;;  %v11100_v51 = vld [vmem:[#allocation2 + $0x1910] ss:$20 sps:$4 sm:$0xff]  }
 0x397   :  { %v11094_v44 = vld [vmem:[#allocation2 + $0x1780] ss:$20 sps:$4 sm:$0xff]   ;;  %v11102_v52 = vld [vmem:[#allocation2 + $0x1b90] ss:$20 sps:$4 sm:$0xff]  }
 0x398   :  { %9434 = vmatpush3.bf16.msra.mxu0 %v11040_v47  ;;  %9456 = vmatpush3.bf16.msra.mxu1 %v11042_v48  ;;  %v11096_v47 = vld [vmem:[#allocation2 + $0x1528] ss:$20 sps:$4 sm:$0xff]  }
 0x399   :  { %9435 = vmatprep.subr.bf16.mxu0 %v11043_v49  ;;  %9457 = vmatprep.subr.bf16.mxu1 %v11045_v50  ;;  %v11098_v48 = vld [vmem:[#allocation2 + $0x17a8] ss:$20 sps:$4 sm:$0xff]   ;;  %v11099_v49 = vld [vmem:[#allocation2 + $0x1a50] ss:$20 sps:$4 sm:$0xff]  }
 0x39a   :  { %v11101_v50 = vld [vmem:[#allocation2 + $0x1cd0] ss:$20 sps:$4 sm:$0xff]  }
 0x39c   :  { %9436 = vmatpush3.bf16.msra.mxu0 %v11044_v53  ;;  %9458 = vmatpush3.bf16.msra.mxu1 %v11046_v54  ;;  %v11103_v53 = vld [vmem:[#allocation2 + $0x1a78] ss:$20 sps:$4 sm:$0xff]  }
 0x39d   :  { %9437 = vmatprep.subr.bf16.mxu0 %v11047_v55  ;;  %9459 = vmatprep.subr.bf16.mxu1 %v11049_v56  ;;  %v11105_v54 = vld [vmem:[#allocation2 + $0x1cf8] ss:$20 sps:$4 sm:$0xff]   ;;  %v11157_v55 = vld [vmem:[%s11403_s0 + $0x40] ss:$100 sps:$4 sm:$0xff]  }
 0x39e   :  { %v11158_v56 = vld [vmem:[%s11403_s0 + $0x48] ss:$100 sps:$4 sm:$0xff]  }
 0x3a0   :  { %9438 = vmatpush3.bf16.msra.mxu0 %v11048_v57  ;;  %9460 = vmatpush3.bf16.msra.mxu1 %v11050_v58  ;;  %v11104_v57 = vld [vmem:[#allocation2 + $0x1938] ss:$20 sps:$4 sm:$0xff]  }
 0x3a1   :  { %9439 = vmatprep.subr.bf16.mxu0 %v11051_v60  ;;  %9461 = vmatprep.subr.bf16.mxu1 %v11053_v61  ;;  %v11106_v58 = vld [vmem:[#allocation2 + $0x1bb8] ss:$20 sps:$4 sm:$0xff]   ;;  %v11107_v60 = vld [vmem:[#allocation2 + $0x1aa0] ss:$20 sps:$4 sm:$0xff]  }
 0x3a2   :  { %v11109_v61 = vld [vmem:[#allocation2 + $0x1d20] ss:$20 sps:$4 sm:$0xff]  }
 0x3a4   :  { %9440 = vmatpush3.bf16.msra.mxu0 %v11052_v62  ;;  %9462 = vmatpush3.bf16.msra.mxu1 %v11054_v63  ;;  %v11159_v62 = vld [vmem:[%s11403_s0 + $0x54] ss:$100 sps:$4 sm:$0xff]   ;;  %v11160_v63 = vld [vmem:[%s11403_s0 + $0x5c] ss:$100 sps:$4 sm:$0xff]  }
 0x3a5   :  { %9441 = vmatprep.subr.bf16.mxu0 %v11055_v0  ;;  %9463 = vmatprep.subr.bf16.mxu1 %v11057_v1  ;;  %v11108_v0 = vld [vmem:[#allocation2 + $0x1960] ss:$20 sps:$4 sm:$0xff]  }
 0x3a6   :  { %v11110_v1 = vld [vmem:[#allocation2 + $0x1be0] ss:$20 sps:$4 sm:$0xff]  }
 0x3a8   :  { %9442 = vmatpush3.bf16.msra.mxu0 %v11056_v2  ;;  %9464 = vmatpush3.bf16.msra.mxu1 %v11058_v3  ;;  %v11111_v2 = vld [vmem:[#allocation2 + $0x1ac8] ss:$20 sps:$4 sm:$0xff]  }
 0x3a9   :  { %9443 = vmatprep.subr.bf16.mxu0 %v11059_v4  ;;  %9465 = vmatprep.subr.bf16.mxu1 %v11061_v5  ;;  %v11113_v3 = vld [vmem:[#allocation2 + $0x1d48] ss:$20 sps:$4 sm:$0xff]  }
 0x3aa   :  { %v11112_v4 = vld [vmem:[#allocation2 + $0x1988] ss:$20 sps:$4 sm:$0xff]  }
 0x3ab   :  { %v11114_v5 = vld [vmem:[#allocation2 + $0x1c08] ss:$20 sps:$4 sm:$0xff]  }
 0x3ac   :  { %9444 = vmatpush3.bf16.msra.mxu0 %v11060_v6  ;;  %9466 = vmatpush3.bf16.msra.mxu1 %v11062_v7  ;;  %v11115_v6 = vld [vmem:[#allocation2 + $0x1af0] ss:$20 sps:$4 sm:$0xff]  }
 0x3ad   :  { %9445 = vmatprep.subr.bf16.mxu0 %v11063_v8  ;;  %9467 = vmatprep.subr.bf16.mxu1 %v11065_v9  ;;  %v11117_v7 = vld [vmem:[#allocation2 + $0x1d70] ss:$20 sps:$4 sm:$0xff]  }
 0x3ae   :  { %v11116_v8 = vld [vmem:[#allocation2 + $0x19b0] ss:$20 sps:$4 sm:$0xff]  }
 0x3af   :  { %v11118_v9 = vld [vmem:[#allocation2 + $0x1c30] ss:$20 sps:$4 sm:$0xff]  }
 0x3b0   :  { %9446 = vmatpush3.bf16.msra.mxu0 %v11064_v10  ;;  %9468 = vmatpush3.bf16.msra.mxu1 %v11066_v11  ;;  %v11119_v10 = vld [vmem:[#allocation2 + $0x1b18] ss:$20 sps:$4 sm:$0xff]  }
 0x3b1   :  { %9475 = vmatprep.subr.bf16.mxu0 %v11067_v12  ;;  %9497 = vmatprep.subr.bf16.mxu1 %v11069_v13  ;;  %v11121_v11 = vld [vmem:[#allocation2 + $0x1d98] ss:$20 sps:$4 sm:$0xff]  }
 0x3b2   :  { %v11120_v12 = vld [vmem:[#allocation2 + $0x19d8] ss:$20 sps:$4 sm:$0xff]  }
 0x3b3   :  { %7975 = vmatmul.mubr.bf16.vlgmr.msra.gmra.mrb[16].mxu0 %v11153_v18  ;;  %8016 = vmatmul.mubr.bf16.vlgmr.msra.gmra.mrb[16].mxu1 %v11154_v19  ;;  %v11122_v13 = vld [vmem:[#allocation2 + $0x1c58] ss:$20 sps:$4 sm:$0xff]   ;;  %v11127_v18 = vld [vmem:[#allocation2 + $0x1b68] ss:$20 sps:$4 sm:$0xff]  }
 0x3b4   :  { %9476 = vmatpush3.bf16.msra.mxu0 %v11068_v14  ;;  %9498 = vmatpush3.bf16.msra.mxu1 %v11070_v15  ;;  %v11123_v14 = vld [vmem:[#allocation2 + $0x1b40] ss:$20 sps:$4 sm:$0xff]   ;;  %v11129_v19 = vld [vmem:[#allocation2 + $0x1de8] ss:$20 sps:$4 sm:$0xff]  }
 0x3b5   :  { %9477 = vmatprep.subr.bf16.mxu0 %v11071_v16  ;;  %9499 = vmatprep.subr.bf16.mxu1 %v11073_v17  ;;  %v11125_v15 = vld [vmem:[#allocation2 + $0x1dc0] ss:$20 sps:$4 sm:$0xff]  }
 0x3b6   :  { %8056 = vmatprep.mubr.bf16.mxu0 %v11155_v24  ;;  %8097 = vmatprep.mubr.bf16.mxu1 %v11156_v26  ;;  %v11124_v16 = vld [vmem:[#allocation2 + $0x1a00] ss:$20 sps:$4 sm:$0xff]   ;;  %v11132_v26 = vld [vmem:[#allocation2 + $0x1e38] ss:$20 sps:$4 sm:$0xff]  }
 0x3b7   :  { %v11126_v17 = vld [vmem:[#allocation2 + $0x1c80] ss:$20 sps:$4 sm:$0xff]  }
 0x3b8   :  { %9478 = vmatpush3.bf16.msra.mxu0 %v11072_v20  ;;  %9500 = vmatpush3.bf16.msra.mxu1 %v11074_v21  ;;  %v11128_v20 = vld [vmem:[#allocation2 + $0x1a28] ss:$20 sps:$4 sm:$0xff]   ;;  %v11161_v24 = vld [vmem:[%s11403_s0 + $0x50] ss:$100 sps:$4 sm:$0xff]  }
 0x3b9   :  { %9479 = vmatprep.subr.bf16.mxu0 %v11075_v22  ;;  %9501 = vmatprep.subr.bf16.mxu1 %v11077_v23  ;;  %v11130_v21 = vld [vmem:[#allocation2 + $0x1ca8] ss:$20 sps:$4 sm:$0xff]   ;;  %v11131_v22 = vld [vmem:[#allocation2 + $0x1e10] ss:$20 sps:$4 sm:$0xff]   ;;  %v11190_v23 = vmov 0.0  }
 0x3bc   :  { %9480 = vmatpush3.bf16.msra.mxu0 %v11076_v27  ;;  %9502 = vmatpush3.bf16.msra.mxu1 %v11078_v28  ;;  %v11133_v27 = vld [vmem:[#allocation2 + $0x1e60] ss:$20 sps:$4 sm:$0xff]   ;;  %v11134_v28 = vld [vmem:[#allocation2 + $0x1e88] ss:$20 sps:$4 sm:$0xff]  }
 0x3bd   :  { %9481 = vmatprep.subr.bf16.mxu0 %v11079_v29  ;;  %9503 = vmatprep.subr.bf16.mxu1 %v11081_v30  ;;  %v11135_v29 = vld [vmem:[#allocation2 + $0x1eb0] ss:$20 sps:$4 sm:$0xff]   ;;  %v11136_v30 = vld [vmem:[#allocation2 + $0x1ed8] ss:$20 sps:$4 sm:$0xff]  }
 0x3c0   :  { %9482 = vmatpush3.bf16.msra.mxu0 %v11080_v31  ;;  %9504 = vmatpush3.bf16.msra.mxu1 %v11082_v32 }
 0x3c1   :  { %9483 = vmatprep.subr.bf16.mxu0 %v11083_v33  ;;  %9505 = vmatprep.subr.bf16.mxu1 %v11085_v34 }
 0x3c4   :  { %9484 = vmatpush3.bf16.msra.mxu0 %v11084_v35  ;;  %9506 = vmatpush3.bf16.msra.mxu1 %v11086_v36 }
 0x3c5   :  { %9485 = vmatprep.subr.bf16.mxu0 %v11087_v37  ;;  %9507 = vmatprep.subr.bf16.mxu1 %v11089_v38 }
 0x3c8   :  { %9486 = vmatpush3.bf16.msra.mxu0 %v11088_v39  ;;  %9508 = vmatpush3.bf16.msra.mxu1 %v11090_v40  ;;  %v11137_v40 = vld [vmem:[#allocation2 + $0x1f00] ss:$20 sps:$4 sm:$0xff]  }
 0x3c9   :  { %9487 = vmatprep.subr.bf16.mxu0 %v11091_v41  ;;  %9509 = vmatprep.subr.bf16.mxu1 %v11093_v42 }
 0x3cc   :  { %9488 = vmatpush3.bf16.msra.mxu0 %v11092_v43  ;;  %9510 = vmatpush3.bf16.msra.mxu1 %v11094_v44 }
 0x3cd   :  { %9489 = vmatprep.subr.bf16.mxu0 %v11095_v45  ;;  %9511 = vmatprep.subr.bf16.mxu1 %v11097_v46 }
 0x3d0   :  { %9490 = vmatpush3.bf16.msra.mxu0 %v11096_v47  ;;  %9512 = vmatpush3.bf16.msra.mxu1 %v11098_v48 }
 0x3d1   :  { %9519 = vmatprep.subr.bf16.mxu0 %v11099_v49  ;;  %9541 = vmatprep.subr.bf16.mxu1 %v11101_v50 }
 0x3d3   :  { %8057 = vmatmul.mubr.bf16.vlgmr.msra.gmra.mrb[20].mxu0 %v11157_v55  ;;  %8098 = vmatmul.mubr.bf16.vlgmr.msra.gmra.mrb[20].mxu1 %v11158_v56 }
 0x3d4   :  { %9520 = vmatpush3.bf16.msra.mxu0 %v11100_v51  ;;  %9542 = vmatpush3.bf16.msra.mxu1 %v11102_v52 }
 0x3d5   :  { %9521 = vmatprep.subr.bf16.mxu0 %v11103_v53  ;;  %9543 = vmatprep.subr.bf16.mxu1 %v11105_v54 }
 0x3d6   :  { %8138 = vmatprep.mubr.bf16.mxu0 %v11159_v62  ;;  %8179 = vmatprep.mubr.bf16.mxu1 %v11160_v63 }
 0x3d8   :  { %9522 = vmatpush3.bf16.msra.mxu0 %v11104_v57  ;;  %9544 = vmatpush3.bf16.msra.mxu1 %v11106_v58 }
 0x3d9   :  { %9523 = vmatprep.subr.bf16.mxu0 %v11107_v60  ;;  %9545 = vmatprep.subr.bf16.mxu1 %v11109_v61  ;;  %v11138_v60 = vld [vmem:[#allocation2 + $0x1f28] ss:$20 sps:$4 sm:$0xff]  }
 0x3dc   :  { %9524 = vmatpush3.bf16.msra.mxu0 %v11108_v0  ;;  %9546 = vmatpush3.bf16.msra.mxu1 %v11110_v1 }
 0x3dd   :  { %9525 = vmatprep.subr.bf16.mxu0 %v11111_v2  ;;  %9547 = vmatprep.subr.bf16.mxu1 %v11113_v3 }
 0x3e0   :  { %9526 = vmatpush3.bf16.msra.mxu0 %v11112_v4  ;;  %9548 = vmatpush3.bf16.msra.mxu1 %v11114_v5 }
 0x3e1   :  { %9527 = vmatprep.subr.bf16.mxu0 %v11115_v6  ;;  %9549 = vmatprep.subr.bf16.mxu1 %v11117_v7 }
 0x3e4   :  { %9528 = vmatpush3.bf16.msra.mxu0 %v11116_v8  ;;  %9550 = vmatpush3.bf16.msra.mxu1 %v11118_v9 }
 0x3e5   :  { %9529 = vmatprep.subr.bf16.mxu0 %v11119_v10  ;;  %9551 = vmatprep.subr.bf16.mxu1 %v11121_v11 }
 0x3e8   :  { %9530 = vmatpush3.bf16.msra.mxu0 %v11120_v12  ;;  %9552 = vmatpush3.bf16.msra.mxu1 %v11122_v13 }
 0x3e9   :  { %9531 = vmatprep.subr.bf16.mxu0 %v11123_v14  ;;  %9553 = vmatprep.subr.bf16.mxu1 %v11125_v15 }
 0x3ec   :  { %9532 = vmatpush3.bf16.msra.mxu0 %v11124_v16  ;;  %9554 = vmatpush3.bf16.msra.mxu1 %v11126_v17 }
 0x3ed   :  { %9533 = vmatprep.subr.bf16.mxu0 %v11127_v18  ;;  %9555 = vmatprep.subr.bf16.mxu1 %v11129_v19 }
 0x3f0   :  { %9534 = vmatpush3.bf16.msra.mxu0 %v11128_v20  ;;  %9556 = vmatpush3.bf16.msra.mxu1 %v11130_v21 }
 0x3f1   :  { %9572 = vmatprep.subr.bf16.mxu0 %v11190_v23 }
 0x3f3   :  { %8139 = vmatmul.mubr.bf16.vlgmr.msra.gmra.mrb[24].mxu0 %v11161_v24  ;;  %8180 = vmatmul.mubr.bf16.vlgmr.msra.gmra.mrb[24].mxu1 %v11291_v25 }
 0x3f4   :  { %9573 = vmatpush3.bf16.msra.mxu0 %v11131_v22  ;;  %9588 = vmatprep.mubr.msk.bf16.mxu0 %vm11191_vm0, %v11190_v23 }
 0x3f5   :  { %9574 = vmatprep.subr.bf16.mxu0 %v11190_v23 }
 0x3f8   :  { %9575 = vmatpush3.bf16.msra.mxu0 %v11132_v26 }
 0x3f9   :  { %9576 = vmatprep.subr.bf16.mxu0 %v11190_v23 }
 0x3fc   :  { %9577 = vmatpush3.bf16.msra.mxu0 %v11133_v27 }
 0x3fd   :  { %9578 = vmatprep.subr.bf16.mxu0 %v11190_v23 }
 0x400   :  { %9579 = vmatpush3.bf16.msra.mxu0 %v11134_v28 }
 0x401   :  { %9580 = vmatprep.subr.bf16.mxu0 %v11190_v23 }
 0x404   :  { %9581 = vmatpush3.bf16.msra.mxu0 %v11135_v29 }
 0x405   :  { %9582 = vmatprep.subr.bf16.mxu0 %v11190_v23 }
 0x406   :  { %v7128_v31 = vpop.f32.mrb[0].mxu0  ;;  %v7687_v32 = vpop.f32.mrb[0].mxu1 }
 0x407   :  { %v9592_v25 = vadd.f32 3.0, %v7128_v31  ;;  %v9596_v33 = vadd.f32 3.0, %v7687_v32  ;;  %v7130_v34 = vpop.f32.mrb[1].mxu0  ;;  %v7689_v35 = vpop.f32.mrb[1].mxu1 }
 0x408   :  { %v9593_v36 = vadd.f32 3.0, %v7130_v34  ;;  %v9597_v37 = vadd.f32 3.0, %v7689_v35  ;;  %v7132_v38 = vpop.f32.mrb[2].mxu0  ;;  %v7691_v39 = vpop.f32.mrb[2].mxu1  ;;  %9583 = vmatpush3.bf16.msra.mxu0 %v11136_v30 }
 0x409   :  { %v8229_v41 = vmax.f32 %v9592_v25, 0.0  ;;  %v8231_v42 = vmax.f32 %v9596_v33, 0.0  ;;  %v9594_v43 = vadd.f32 3.0, %v7132_v38  ;;  %v9598_v44 = vadd.f32 3.0, %v7691_v39  ;;  %v7134_v45 = vpop.f32.mrb[3].mxu0  ;;  %v7693_v46 = vpop.f32.mrb[3].mxu1  ;;  %9584 = vmatprep.subr.bf16.mxu0 %v11190_v23 }
 0x40a   :  { %v8230_v47 = vmax.f32 %v9593_v36, 0.0  ;;  %v8232_v48 = vmax.f32 %v9597_v37, 0.0  ;;  %v9595_v49 = vadd.f32 3.0, %v7134_v45  ;;  %v9599_v50 = vadd.f32 3.0, %v7693_v46 }
 0x40b   :  { %v8239_v51 = vmin.f32 %v8229_v41, 6.0  ;;  %v8241_v52 = vmin.f32 %v8231_v42, 6.0  ;;  %v8234_v53 = vmax.f32 %v9594_v43, 0.0  ;;  %v8236_v54 = vmax.f32 %v9598_v44, 0.0 }
 0x40c   :  { %v8240_v55 = vmin.f32 %v8230_v47, 6.0  ;;  %v8242_v56 = vmin.f32 %v8232_v48, 6.0  ;;  %v8235_v57 = vmax.f32 %v9595_v49, 0.0  ;;  %v8237_v58 = vmax.f32 %v9599_v50, 0.0  ;;  %9585 = vmatpush3.bf16.msra.mxu0 %v11137_v40 }
 0x40d   :  { %v8249_v61 = vmul.f32 0.16666667, %v8239_v51  ;;  %v8251_v62 = vmul.f32 0.16666667, %v8241_v52  ;;  %v8244_v63 = vmin.f32 %v8234_v53, 6.0  ;;  %v8246_v0 = vmin.f32 %v8236_v54, 6.0  ;;  %9586 = vmatprep.subr.bf16.mxu0 %v11190_v23 }
 0x40e   :  { %v8250_v1 = vmul.f32 0.16666667, %v8240_v55  ;;  %v8252_v2 = vmul.f32 0.16666667, %v8242_v56  ;;  %v8245_v3 = vmin.f32 %v8235_v57, 6.0  ;;  %v8247_v4 = vmin.f32 %v8237_v58, 6.0 }
 0x40f   :  { %8259 = vst [vmem:[%s11405_s2] sm:$0xff] %v8249_v61  ;;  %8261 = vst [vmem:[%s11405_s2 + $0x10] sm:$0xff] %v8251_v62  ;;  %v8254_v5 = vmul.f32 0.16666667, %v8244_v63  ;;  %v8256_v6 = vmul.f32 0.16666667, %v8246_v0 }
 0x410   :  { %8260 = vst [vmem:[%s11405_s2 + $0x8] sm:$0xff] %v8250_v1  ;;  %8262 = vst [vmem:[%s11405_s2 + $0x18] sm:$0xff] %v8252_v2  ;;  %v8255_v7 = vmul.f32 0.16666667, %v8245_v3  ;;  %v8257_v8 = vmul.f32 0.16666667, %v8247_v4  ;;  %9587 = vmatpush3.bf16.msra.mxu0 %v11138_v60 }
 0x411   :  { %8264 = vst [vmem:[%s11405_s2 + $0x28] sm:$0xff] %v8254_v5  ;;  %8266 = vst [vmem:[%s11405_s2 + $0x38] sm:$0xff] %v8256_v6 }
 0x412   :  { %8265 = vst [vmem:[%s11405_s2 + $0x30] sm:$0xff] %v8255_v7  ;;  %8267 = vst [vmem:[%s11405_s2 + $0x40] sm:$0xff] %v8257_v8 }
 0x413   :  { %9589 = vmatmul.mubr.bf16.vlgmr.msra.gmra.mrb[28].mxu0 %v11298_v59 }
 0x426   :  { %v9315_v9 = vpop.f32.mrb[4].mxu0  ;;  %v9337_v10 = vpop.f32.mrb[4].mxu1 }
 0x427   :  { %v9316_v11 = vpop.f32.mrb[5].mxu0  ;;  %v9338_v12 = vpop.f32.mrb[5].mxu1 }
 0x428   :  { %v9317_v13 = vadd.f32 %v9316_v11, %v9315_v9  ;;  %v9318_v14 = vpop.f32.mrb[6].mxu0  ;;  %v9339_v15 = vadd.f32 %v9338_v12, %v9337_v10  ;;  %v9340_v16 = vpop.f32.mrb[6].mxu1 }
 0x429   :  { %v9319_v17 = vpop.f32.mrb[7].mxu0  ;;  %v9341_v18 = vpop.f32.mrb[7].mxu1 }
 0x42a   :  { %v7731_v19 = vadd.f32 3.0, %v9317_v13  ;;  %v9320_v20 = vadd.f32 %v9319_v17, %v9318_v14  ;;  %v9342_v21 = vadd.f32 %v9341_v18, %v9340_v16 }
 0x42c   :  { %v7734_v22 = vadd.f32 3.0, %v9320_v20  ;;  %v7772_v23 = vadd.f32 %v9339_v15, %v7731_v19 }
 0x42e   :  { %v7775_v24 = vadd.f32 %v9342_v21, %v7734_v22 }
 0x446   :  { %v9359_v26 = vpop.f32.mrb[8].mxu0  ;;  %v9381_v27 = vpop.f32.mrb[8].mxu1 }
 0x447   :  { %v9360_v28 = vpop.f32.mrb[9].mxu0  ;;  %v9382_v59 = vpop.f32.mrb[9].mxu1 }
 0x448   :  { %v9361_v29 = vadd.f32 %v9360_v28, %v9359_v26  ;;  %v9362_v30 = vpop.f32.mrb[10].mxu0  ;;  %v9383_v31 = vadd.f32 %v9382_v59, %v9381_v27  ;;  %v9384_v32 = vpop.f32.mrb[10].mxu1 }
 0x449   :  { %v9363_v25 = vpop.f32.mrb[11].mxu0  ;;  %v9385_v33 = vpop.f32.mrb[11].mxu1 }
 0x44a   :  { %v7813_v34 = vadd.f32 %v9361_v29, %v7772_v23  ;;  %v9364_v35 = vadd.f32 %v9363_v25, %v9362_v30  ;;  %v9386_v36 = vadd.f32 %v9385_v33, %v9384_v32 }
 0x44c   :  { %v7816_v37 = vadd.f32 %v9364_v35, %v7775_v24  ;;  %v7854_v38 = vadd.f32 %v9383_v31, %v7813_v34 }
 0x44e   :  { %v7857_v39 = vadd.f32 %v9386_v36, %v7816_v37 }
 0x466   :  { %v9403_v40 = vpop.f32.mrb[12].mxu0  ;;  %v9425_v41 = vpop.f32.mrb[12].mxu1 }
 0x467   :  { %v9404_v42 = vpop.f32.mrb[13].mxu0  ;;  %v9426_v43 = vpop.f32.mrb[13].mxu1 }
 0x468   :  { %v9405_v44 = vadd.f32 %v9404_v42, %v9403_v40  ;;  %v9406_v45 = vpop.f32.mrb[14].mxu0  ;;  %v9427_v46 = vadd.f32 %v9426_v43, %v9425_v41  ;;  %v9428_v47 = vpop.f32.mrb[14].mxu1 }
 0x469   :  { %v9407_v48 = vpop.f32.mrb[15].mxu0  ;;  %v9429_v49 = vpop.f32.mrb[15].mxu1 }
 0x46a   :  { %v7895_v50 = vadd.f32 %v9405_v44, %v7854_v38  ;;  %v9408_v51 = vadd.f32 %v9407_v48, %v9406_v45  ;;  %v9430_v52 = vadd.f32 %v9429_v49, %v9428_v47 }
 0x46c   :  { %v7898_v53 = vadd.f32 %v9408_v51, %v7857_v39  ;;  %v7936_v54 = vadd.f32 %v9427_v46, %v7895_v50 }
 0x46e   :  { %v7939_v55 = vadd.f32 %v9430_v52, %v7898_v53 }
 0x486   :  { %v9447_v56 = vpop.f32.mrb[16].mxu0  ;;  %v9469_v57 = vpop.f32.mrb[16].mxu1 }
 0x487   :  { %v9448_v58 = vpop.f32.mrb[17].mxu0  ;;  %v9470_v60 = vpop.f32.mrb[17].mxu1 }
 0x488   :  { %v9449_v61 = vadd.f32 %v9448_v58, %v9447_v56  ;;  %v9450_v62 = vpop.f32.mrb[18].mxu0  ;;  %v9471_v63 = vadd.f32 %v9470_v60, %v9469_v57  ;;  %v9472_v0 = vpop.f32.mrb[18].mxu1 }
 0x489   :  { %v9451_v1 = vpop.f32.mrb[19].mxu0  ;;  %v9473_v2 = vpop.f32.mrb[19].mxu1 }
 0x48a   :  { %v7977_v3 = vadd.f32 %v9449_v61, %v7936_v54  ;;  %v9452_v4 = vadd.f32 %v9451_v1, %v9450_v62  ;;  %v9474_v5 = vadd.f32 %v9473_v2, %v9472_v0 }
 0x48c   :  { %v7980_v6 = vadd.f32 %v9452_v4, %v7939_v55  ;;  %v8018_v7 = vadd.f32 %v9471_v63, %v7977_v3 }
 0x48e   :  { %v8021_v8 = vadd.f32 %v9474_v5, %v7980_v6 }
 0x4a6   :  { %v9491_v9 = vpop.f32.mrb[20].mxu0  ;;  %v9513_v10 = vpop.f32.mrb[20].mxu1 }
 0x4a7   :  { %v9492_v11 = vpop.f32.mrb[21].mxu0  ;;  %v9514_v12 = vpop.f32.mrb[21].mxu1 }
 0x4a8   :  { %v9493_v13 = vadd.f32 %v9492_v11, %v9491_v9  ;;  %v9494_v14 = vpop.f32.mrb[22].mxu0  ;;  %v9515_v15 = vadd.f32 %v9514_v12, %v9513_v10  ;;  %v9516_v16 = vpop.f32.mrb[22].mxu1 }
 0x4a9   :  { %v9495_v17 = vpop.f32.mrb[23].mxu0  ;;  %v9517_v18 = vpop.f32.mrb[23].mxu1 }
 0x4aa   :  { %v8059_v19 = vadd.f32 %v9493_v13, %v8018_v7  ;;  %v9496_v20 = vadd.f32 %v9495_v17, %v9494_v14  ;;  %v9518_v21 = vadd.f32 %v9517_v18, %v9516_v16 }
 0x4ac   :  { %v8062_v22 = vadd.f32 %v9496_v20, %v8021_v8  ;;  %v8100_v23 = vadd.f32 %v9515_v15, %v8059_v19 }
 0x4ae   :  { %v8103_v24 = vadd.f32 %v9518_v21, %v8062_v22 }
 0x4c6   :  { %v9535_v26 = vpop.f32.mrb[24].mxu0  ;;  %v9557_v27 = vpop.f32.mrb[24].mxu1 }
 0x4c7   :  { %v9536_v28 = vpop.f32.mrb[25].mxu0  ;;  %v9558_v59 = vpop.f32.mrb[25].mxu1 }
 0x4c8   :  { %v9537_v29 = vadd.f32 %v9536_v28, %v9535_v26  ;;  %v9538_v30 = vpop.f32.mrb[26].mxu0  ;;  %v9559_v31 = vadd.f32 %v9558_v59, %v9557_v27  ;;  %v9560_v32 = vpop.f32.mrb[26].mxu1 }
 0x4c9   :  { %v9539_v25 = vpop.f32.mrb[27].mxu0  ;;  %v9561_v33 = vpop.f32.mrb[27].mxu1 }
 0x4ca   :  { %v8141_v34 = vadd.f32 %v9537_v29, %v8100_v23  ;;  %v9540_v35 = vadd.f32 %v9539_v25, %v9538_v30  ;;  %v9562_v36 = vadd.f32 %v9561_v33, %v9560_v32 }
 0x4cc   :  { %v8144_v37 = vadd.f32 %v9540_v35, %v8103_v24  ;;  %v8182_v38 = vadd.f32 %v9559_v31, %v8141_v34 }
 0x4ce   :  { %v8185_v39 = vadd.f32 %v9562_v36, %v8144_v37 }
 0x4e6   :  { %v8222_v40 = vpop.f32.mrb[28].mxu0 }
 0x4e7   :  { %v8223_v41 = vadd.f32 %v8222_v40, %v8182_v38  ;;  %v9590_v42 = vpop.f32.mrb[29].mxu0 }
 0x4e8   :  { %v8225_v43 = vpop.f32.mrb[30].mxu0 }
 0x4e9   :  { %v8233_v44 = vmax.f32 %v8223_v41, 0.0  ;;  %v8226_v45 = vadd.f32 %v8225_v43, %v8185_v39  ;;  %v9591_v46 = vpop.f32.mrb[31].mxu0 }
 0x4eb   :  { %v8243_v47 = vmin.f32 %v8233_v44, 6.0  ;;  %v8238_v48 = vmax.f32 %v8226_v45, 0.0 }
 0x4ed   :  { %v8253_v49 = vmul.f32 0.16666667, %v8243_v47  ;;  %v8248_v50 = vmin.f32 %v8238_v48, 6.0 }
 0x4ef   :  { %8263 = vst [vmem:[%s11405_s2 + $0x20] sm:$0xff] %v8253_v49  ;;  %v8258_v51 = vmul.f32 0.16666667, %v8248_v50 }
 0x4f1   :  { %8268 = vst [vmem:[%s11405_s2 + $0x48] sm:$0xff] %v8258_v51 }
 0x4f2   :  { %8273 = vsyncpa [#allocation3], 1 }

</bundles_post_ra>
